<compile_context>
chip_gen: v6e
topology: v6e:2x2x1
jax: 0.10.0
libtpu: 0.0.40
codegen_flags: <defaults>
</compile_context>

<pallas_src>
import functools

import jax
import jax.numpy as jnp
import numpy as np
from jax.experimental import pallas as pl
from jax.experimental.pallas import tpu as pltpu


# ---------------------------------------------------------------------------
# Kernel 1: full DKVMN recurrence (attention -> read -> erase/add write).
# Time loop lives INSIDE the kernel; grid is only over independent batch blocks.
# ---------------------------------------------------------------------------
def dkvmn_kernel(q_ref, qa_ref, wm_ref, keyT_ref, init_ref, wea_ref, bea_ref,
                 read_ref, mem_ref):
    S, Bt, _ = q_ref.shape
    M, Dv = init_ref.shape

    # Initialize this batch block's value memory; the output block is resident
    # in VMEM and serves as the recurrent state for the whole time loop.
    mem_ref[...] = jnp.broadcast_to(init_ref[...][None, :, :], mem_ref.shape)

    # Hoist weight/bias loads out of the time loop (JAX does not CSE these).
    keyT = keyT_ref[...]            # (Dq, M)     bf16  (pre-transposed key)
    wea = wea_ref[...]              # (Dqa, 2*Dv) bf16  fused [erase | add]
    bea = bea_ref[...]              # (1, 2*Dv)   f32

    def step(s):
        q = q_ref[s]                # (Bt, Dq)  bf16
        qa = qa_ref[s]              # (Bt, Dqa) bf16
        gate = wm_ref[s]            # (Bt, 1)   f32 write gate

        # --- attention: softmax(q @ K^T), f32 accumulation + f32 softmax ---
        logits = jnp.dot(q, keyT, preferred_element_type=jnp.float32)     # (Bt, M)
        logits = logits - jnp.max(logits, axis=-1, keepdims=True)
        e = jnp.exp(logits)
        w = e * pl.reciprocal(jnp.sum(e, axis=-1, keepdims=True), approx=True)

        # --- read: weighted sum over memory slots (VPU mult + sublane reduce) ---
        V = mem_ref[...]                                                   # (Bt, M, Dv)
        read = jnp.sum(w[:, :, None] * V, axis=1)                          # (Bt, Dv)
        read_ref[s] = read.astype(read_ref.dtype)

        # --- fused erase/add projection: one matmul per step, split halves ---
        ea = jnp.dot(qa, wea, preferred_element_type=jnp.float32) + bea    # (Bt, 2*Dv)
        erase = jax.nn.sigmoid(ea[:, :Dv])                                 # (Bt, Dv)
        add = jnp.tanh(ea[:, Dv:])                                         # (Bt, Dv)

        # --- gated write ---
        wg = (w * gate)[:, :, None]                                        # (Bt, M, 1)
        mem_ref[...] = V * (1.0 - wg * erase[:, None, :]) + wg * add[:, None, :]

    if S <= 64:
        # Fully unrolled: all ref indices static, whole recurrence visible to
        # the LLO scheduler in one basic block.
        for s in range(S):
            step(s)
    else:
        def body(s, carry):
            step(s)
            return carry
        jax.lax.fori_loop(0, S, body, 0)


def run_dkvmn(q_embed_sbd, qa_embed_sbd, wmask_sb1,
              memory_key, init_memory_value,
              w_erase, b_erase, w_add, b_add, *, batch_block=None):
    S, B, Dq = q_embed_sbd.shape
    Dqa = qa_embed_sbd.shape[-1]
    M, Dv = init_memory_value.shape

    # Optional batch-parallel grid (useful on multi-TC chips when B is large
    # and a multiple of 8); demo uses the full batch in one block.
    Bt = B if batch_block is None else batch_block
    assert B % Bt == 0 and (Bt == B or Bt % 8 == 0), \
        "batch block must equal B or be a multiple of 8"
    nb = B // Bt

    # bf16 MXU operands (f32 accumulation inside the kernel); pre-transpose the
    # key and fuse erase/add weights so each step does exactly two matmuls.
    q_bf = q_embed_sbd.astype(jnp.bfloat16)
    qa_bf = qa_embed_sbd.astype(jnp.bfloat16)
    keyT = memory_key.T.astype(jnp.bfloat16)                                # (Dq, M)
    w_ea = jnp.concatenate([w_erase, w_add], axis=1).astype(jnp.bfloat16)   # (Dqa, 2*Dv)
    b_ea = jnp.concatenate([b_erase, b_add], axis=1).astype(jnp.float32)    # (1, 2*Dv)

    read_out, mem_out = pl.pallas_call(
        dkvmn_kernel,
        out_shape=(jax.ShapeDtypeStruct((S, B, Dv), jnp.float32),
                   jax.ShapeDtypeStruct((B, M, Dv), jnp.float32)),
        grid=(nb,),
        in_specs=[
            pl.BlockSpec((S, Bt, Dq), lambda b: (0, b, 0)),
            pl.BlockSpec((S, Bt, Dqa), lambda b: (0, b, 0)),
            pl.BlockSpec((S, Bt, 1), lambda b: (0, b, 0)),
            pl.BlockSpec((Dq, M), lambda b: (0, 0)),
            pl.BlockSpec((M, Dv), lambda b: (0, 0)),
            pl.BlockSpec((Dqa, 2 * Dv), lambda b: (0, 0)),
            pl.BlockSpec((1, 2 * Dv), lambda b: (0, 0)),
        ],
        out_specs=(
            pl.BlockSpec((S, Bt, Dv), lambda b: (0, b, 0)),
            pl.BlockSpec((Bt, M, Dv), lambda b: (b, 0, 0)),
        ),
        compiler_params=pltpu.CompilerParams(
            dimension_semantics=("parallel",)),
    )(q_bf, qa_bf, wmask_sb1, keyT, init_memory_value, w_ea, b_ea)
    return read_out, mem_out


# ---------------------------------------------------------------------------
# Kernel 2: fused prediction head
#   rce   = tanh(predict_input @ Wr + br)
#   theta = tanh(sum(rce * wt, -1) + bt)       (student ability)
#   beta  = tanh(sum(input_embed * wb, -1) + bb)  (question difficulty)
#   pred_ = 3*theta - beta
#   single (N, 3) output: [theta | beta | pred_]
# ---------------------------------------------------------------------------
def head_kernel(pin_ref, iemb_ref, wr_ref, br_ref, wt_ref, bt_ref, wb_ref, bb_ref,
                out_ref):
    x = pin_ref[...]                                                       # (N, Dv+Df) bf16
    rce = jnp.tanh(
        jnp.dot(x, wr_ref[...], preferred_element_type=jnp.float32) + br_ref[...])   # (N, Df)
    # (Df->1) / (Dq->1) projections as VPU multiply + lane reduction
    # (avoids degenerate (., 1)-shaped MXU matmuls).
    theta = jnp.tanh(jnp.sum(rce * wt_ref[...], axis=-1, keepdims=True) + bt_ref[...])
    beta = jnp.tanh(jnp.sum(iemb_ref[...] * wb_ref[...], axis=-1, keepdims=True) + bb_ref[...])
    pred_ = 3.0 * theta - beta
    out_ref[:, 0:1] = theta
    out_ref[:, 1:2] = beta
    out_ref[:, 2:3] = pred_


def run_head(predict_input, input_embed_flat,
             w_read, b_read, w_theta, b_theta, w_beta, b_beta):
    N, Din = predict_input.shape
    Df = w_read.shape[1]
    Dq = input_embed_flat.shape[1]

    pin_bf = predict_input.astype(jnp.bfloat16)
    wr_bf = w_read.astype(jnp.bfloat16)
    wt_row = w_theta.reshape(1, Df).astype(jnp.float32)
    wb_row = w_beta.reshape(1, Dq).astype(jnp.float32)

    full = lambda *shape: pl.BlockSpec(shape, lambda i: tuple(0 for _ in shape))
    out = pl.pallas_call(
        head_kernel,
        out_shape=jax.ShapeDtypeStruct((N, 3), jnp.float32),
        grid=(1,),
        in_specs=[
            full(N, Din), full(N, Dq),
            full(Din, Df), full(1, Df),
            full(1, Df), full(1, 1),
            full(1, Dq), full(1, 1),
        ],
        out_specs=full(N, 3),
    )(pin_bf, input_embed_flat, wr_bf, b_read, wt_row, b_theta, wb_row, b_beta)
    theta = out[:, 0:1]
    beta = out[:, 1:2]
    pred_ = out[:, 2:3]
    return theta, beta, pred_


# ---------------------------------------------------------------------------
# Full model forward (glue in plain JAX + host-side masked_select)
# ---------------------------------------------------------------------------
def kaiming(key, shape, fan_in):
    return jax.random.normal(key, shape, jnp.float32) * np.sqrt(2.0 / fan_in)


def init_params(n_question, q_dim, qa_dim, mem_size, key_dim, val_dim, fc_dim):
    keys = jax.random.split(jax.random.PRNGKey(0), 16)
    p = {}
    # embedding tables (padding_idx=0 -> zero row)
    q_tab = kaiming(keys[0], (n_question + 1, q_dim), q_dim).at[0].set(0.0)
    qa_tab = kaiming(keys[1], (2 * n_question + 1, qa_dim), qa_dim).at[0].set(0.0)
    p["q_embed"] = q_tab
    p["qa_embed"] = qa_tab
    p["memory_key"] = kaiming(keys[2], (mem_size, key_dim), key_dim)
    p["init_memory_value"] = kaiming(keys[3], (mem_size, val_dim), val_dim)
    # DKVMN write head (erase / add linears: qa_dim -> val_dim)
    p["w_erase"] = kaiming(keys[4], (qa_dim, val_dim), qa_dim)
    p["b_erase"] = jnp.zeros((1, val_dim), jnp.float32)
    p["w_add"] = kaiming(keys[5], (qa_dim, val_dim), qa_dim)
    p["b_add"] = jnp.zeros((1, val_dim), jnp.float32)
    # read_embed_linear: (val_dim + fc_dim) -> fc_dim
    p["w_read"] = kaiming(keys[6], (val_dim + fc_dim, fc_dim), val_dim + fc_dim)
    p["b_read"] = jnp.zeros((1, fc_dim), jnp.float32)
    # predict_linear_theta / _beta: fc_dim -> 1 (stored as columns)
    p["w_theta"] = kaiming(keys[7], (fc_dim, 1), fc_dim)
    p["b_theta"] = jnp.zeros((1, 1), jnp.float32)
    p["w_beta"] = kaiming(keys[8], (fc_dim, 1), fc_dim)
    p["b_beta"] = jnp.zeros((1, 1), jnp.float32)
    return p


@jax.jit
def model_forward_device(params, q_data, qa_data, target):
    B, S = q_data.shape
    Dq = params["q_embed"].shape[1]
    Dv = params["init_memory_value"].shape[1]

    # embedding lookups (glue)
    q_embed = params["q_embed"][q_data]          # (B, S, Dq)
    qa_embed = params["qa_embed"][qa_data]       # (B, S, Dqa)
    wmask = (q_data >= 1).astype(jnp.float32)    # if_memory_write

    # sequence-major layout for the recurrent kernel
    q_sbd = jnp.transpose(q_embed, (1, 0, 2))
    qa_sbd = jnp.transpose(qa_embed, (1, 0, 2))
    wm_sb1 = jnp.transpose(wmask, (1, 0))[:, :, None]

    read_sbd, memory_value = run_dkvmn(
        q_sbd, qa_sbd, wm_sb1,
        params["memory_key"], params["init_memory_value"],
        params["w_erase"], params["b_erase"], params["w_add"], params["b_add"])

    all_read = jnp.transpose(read_sbd, (1, 0, 2))                 # (B, S, Dv)
    predict_input = jnp.concatenate([all_read, q_embed], axis=2)  # (B, S, Dv+Dq)
    predict_input = predict_input.reshape(B * S, Dv + Dq)
    # NOTE: torch source hardcodes reshape(-1, 50); here q_embed_dim plays that role.
    input_embed_flat = q_embed.reshape(B * S, Dq)

    student_ability, question_difficulty, pred_ = run_head(
        predict_input, input_embed_flat,
        params["w_read"], params["b_read"],
        params["w_theta"], params["b_theta"],
        params["w_beta"], params["b_beta"])

    # masked BCE-with-logits (mean over valid entries) == torch BCE on masked_select
    mask = target >= 0.0                                          # (B*S, 1)
    x = pred_
    t = target
    bce = jnp.maximum(x, 0.0) - x * t + jnp.log1p(jnp.exp(-jnp.abs(x)))
    mf = mask.astype(jnp.float32)
    loss = jnp.sum(bce * mf) / jnp.maximum(jnp.sum(mf), 1.0)

    return (loss, jax.nn.sigmoid(pred_), pred_, student_ability,
            question_difficulty, memory_value, mask)


def model_forward(params, q_data, qa_data, target):
    (loss, sig_pred, pred_, theta, beta, memory, mask) = jax.tree_util.tree_map(
        jax.block_until_ready, model_forward_device(params, q_data, qa_data, target))

    # torch.masked_select -> dynamic-shape output: done on host with numpy.
    mask_np = np.asarray(mask).reshape(-1)
    q_flat = np.asarray(q_data).reshape(-1)
    q_test = q_flat[mask_np]
    filtered_pred = np.asarray(sig_pred).reshape(-1)[mask_np]
    filtered_target = np.asarray(target).reshape(-1)[mask_np]
    filtered_theta = np.asarray(theta).reshape(-1)[mask_np]
    filtered_beta = np.asarray(beta).reshape(-1)[mask_np]
    # TODO(synk): the torch forward also masked_selects memory[:,0,:] against a
    # shape-mismatched mask into an unused local (and never uses predict_linear /
    # input_embed_linear outputs); that dead / ill-defined code is skipped.
    return (q_test, loss, filtered_pred, filtered_target,
            filtered_theta, filtered_beta, memory, mask)


if __name__ == "__main__":
    # small, consistent shapes (B*Dv = 128 keeps the value memory lane-friendly)
    n_question = 50
    B, S = 4, 8
    Dq = Dqa = 32          # q_embed_dim == final_fc_dim (required by predict_input dims)
    M = 16                 # memory_size
    Dk = 32                # memory_key_state_dim (== q_embed_dim for attention)
    Dv = 32                # memory_value_state_dim
    Df = 32                # final_fc_dim

    params = init_params(n_question, Dq, Dqa, M, Dk, Dv, Df)

    key = jax.random.PRNGKey(0)
    k1, k2, k3 = jax.random.split(key, 3)
    q_data = jax.random.randint(k1, (B, S), 0, n_question + 1, dtype=jnp.int32)
    answers = jax.random.randint(k2, (B, S), 0, 2, dtype=jnp.int32)
    qa_data = jnp.where(q_data > 0, q_data + answers * n_question, 0).astype(jnp.int32)
    target = jnp.where(
        q_data.reshape(-1, 1) > 0,
        jax.random.bernoulli(k3, 0.5, (B * S, 1)).astype(jnp.float32),
        -1.0).astype(jnp.float32)

    outs = model_forward(params, q_data, qa_data, target)
    (q_test, loss, filtered_pred, filtered_target,
     filtered_theta, filtered_beta, memory, mask) = outs

    assert np.isfinite(float(loss))
    assert memory.shape == (B, M, Dv)
    assert filtered_pred.shape == filtered_target.shape
    print("KERNEL_OK")
</pallas_src>

<mosaic_0001>
module attributes {stable_mosaic.version = 11 : i64} {
  func.func @head_kernel(%arg0: i32, %arg1: memref<32x64xbf16, #tpu.memory_space<vmem>>, %arg2: memref<32x32xf32, #tpu.memory_space<vmem>>, %arg3: memref<64x32xbf16, #tpu.memory_space<vmem>>, %arg4: memref<1x32xf32, #tpu.memory_space<vmem>>, %arg5: memref<1x32xf32, #tpu.memory_space<vmem>>, %arg6: memref<1x1xf32, #tpu.memory_space<vmem>>, %arg7: memref<1x32xf32, #tpu.memory_space<vmem>>, %arg8: memref<1x1xf32, #tpu.memory_space<vmem>>, %arg9: memref<32x3xf32, #tpu.memory_space<vmem>>) attributes {dimension_semantics = [#tpu.dimension_semantics<arbitrary>], iteration_bounds = array<i64: 1>, scalar_prefetch = 0 : i64, scratch_operands = 0 : i64, tpu.core_type = #tpu.core_type<tc>, window_params = [{pipeline_mode = #tpu.pipeline_mode<synchronous>, transform_indices = @transform_0, window_bounds = array<i64: 32, 64>}, {pipeline_mode = #tpu.pipeline_mode<synchronous>, transform_indices = @transform_1, window_bounds = array<i64: 32, 32>}, {pipeline_mode = #tpu.pipeline_mode<synchronous>, transform_indices = @transform_2, window_bounds = array<i64: 64, 32>}, {pipeline_mode = #tpu.pipeline_mode<synchronous>, transform_indices = @transform_3, window_bounds = array<i64: 1, 32>}, {pipeline_mode = #tpu.pipeline_mode<synchronous>, transform_indices = @transform_4, window_bounds = array<i64: 1, 32>}, {pipeline_mode = #tpu.pipeline_mode<synchronous>, transform_indices = @transform_5, window_bounds = array<i64: 1, 1>}, {pipeline_mode = #tpu.pipeline_mode<synchronous>, transform_indices = @transform_6, window_bounds = array<i64: 1, 32>}, {pipeline_mode = #tpu.pipeline_mode<synchronous>, transform_indices = @transform_7, window_bounds = array<i64: 1, 1>}, {pipeline_mode = #tpu.pipeline_mode<synchronous>, transform_indices = @transform_8, window_bounds = array<i64: 32, 3>}]} {
    %c0 = arith.constant 0 : index
    %c0_0 = arith.constant 0 : index
    %0 = vector.load %arg1[%c0, %c0_0] : memref<32x64xbf16, #tpu.memory_space<vmem>>, vector<32x64xbf16>
    %c0_1 = arith.constant 0 : index
    %c0_2 = arith.constant 0 : index
    %1 = vector.load %arg3[%c0_1, %c0_2] : memref<64x32xbf16, #tpu.memory_space<vmem>>, vector<64x32xbf16>
    %cst = arith.constant dense<0.000000e+00> : vector<32x32xf32>
    %2 = tpu.matmul %0, %1, %cst {dimension_numbers = #tpu.dot_dimension_numbers<[1], [0], [0], [1], [0, 0, 1, 1], [], []>} : vector<32x64xbf16>, vector<64x32xbf16>, vector<32x32xf32> -> vector<32x32xf32>
    %c0_3 = arith.constant 0 : index
    %c0_4 = arith.constant 0 : index
    %3 = vector.load %arg4[%c0_3, %c0_4] : memref<1x32xf32, #tpu.memory_space<vmem>>, vector<1x32xf32>
    %4 = vector.broadcast %3 : vector<1x32xf32> to vector<32x32xf32>
    %5 = arith.addf %2, %4 : vector<32x32xf32>
    %6 = math.tanh %5 : vector<32x32xf32>
    %c0_5 = arith.constant 0 : index
    %c0_6 = arith.constant 0 : index
    %7 = vector.load %arg5[%c0_5, %c0_6] : memref<1x32xf32, #tpu.memory_space<vmem>>, vector<1x32xf32>
    %8 = vector.broadcast %7 : vector<1x32xf32> to vector<32x32xf32>
    %9 = arith.mulf %6, %8 : vector<32x32xf32>
    %cst_7 = arith.constant dense<0.000000e+00> : vector<32xf32>
    %10 = vector.multi_reduction <add>, %9, %cst_7 [1] : vector<32x32xf32> to vector<32xf32>
    %11 = vector.shape_cast %10 : vector<32xf32> to vector<32x1xf32>
    %c0_8 = arith.constant 0 : index
    %c0_9 = arith.constant 0 : index
    %12 = vector.load %arg6[%c0_8, %c0_9] : memref<1x1xf32, #tpu.memory_space<vmem>>, vector<1x1xf32>
    %13 = vector.broadcast %12 : vector<1x1xf32> to vector<32x1xf32>
    %14 = arith.addf %11, %13 : vector<32x1xf32>
    %15 = math.tanh %14 : vector<32x1xf32>
    %c0_10 = arith.constant 0 : index
    %c0_11 = arith.constant 0 : index
    %16 = vector.load %arg2[%c0_10, %c0_11] : memref<32x32xf32, #tpu.memory_space<vmem>>, vector<32x32xf32>
    %c0_12 = arith.constant 0 : index
    %c0_13 = arith.constant 0 : index
    %17 = vector.load %arg7[%c0_12, %c0_13] : memref<1x32xf32, #tpu.memory_space<vmem>>, vector<1x32xf32>
    %18 = vector.broadcast %17 : vector<1x32xf32> to vector<32x32xf32>
    %19 = arith.mulf %16, %18 : vector<32x32xf32>
    %cst_14 = arith.constant dense<0.000000e+00> : vector<32xf32>
    %20 = vector.multi_reduction <add>, %19, %cst_14 [1] : vector<32x32xf32> to vector<32xf32>
    %21 = vector.shape_cast %20 : vector<32xf32> to vector<32x1xf32>
    %c0_15 = arith.constant 0 : index
    %c0_16 = arith.constant 0 : index
    %22 = vector.load %arg8[%c0_15, %c0_16] : memref<1x1xf32, #tpu.memory_space<vmem>>, vector<1x1xf32>
    %23 = vector.broadcast %22 : vector<1x1xf32> to vector<32x1xf32>
    %24 = arith.addf %21, %23 : vector<32x1xf32>
    %25 = math.tanh %24 : vector<32x1xf32>
    %cst_17 = arith.constant 3.000000e+00 : f32
    %26 = vector.broadcast %cst_17 : f32 to vector<32x1xf32>
    %27 = arith.mulf %26, %15 : vector<32x1xf32>
    %28 = arith.subf %27, %25 : vector<32x1xf32>
    %c0_18 = arith.constant 0 : index
    %c0_19 = arith.constant 0 : index
    %29 = vector.load %arg9[%c0_18, %c0_19] : memref<32x3xf32, #tpu.memory_space<vmem>>, vector<32x1xf32>
    tpu.vector_store %arg9[%c0_18, %c0_19], %15 {strides = array<i32>} : memref<32x3xf32, #tpu.memory_space<vmem>>, vector<32x1xf32>,
    %c0_20 = arith.constant 0 : index
    %c1 = arith.constant 1 : index
    %30 = vector.load %arg9[%c0_20, %c1] : memref<32x3xf32, #tpu.memory_space<vmem>>, vector<32x1xf32>
    tpu.vector_store %arg9[%c0_20, %c1], %25 {strides = array<i32>} : memref<32x3xf32, #tpu.memory_space<vmem>>, vector<32x1xf32>,
    %c0_21 = arith.constant 0 : index
    %c2 = arith.constant 2 : index
    %31 = vector.load %arg9[%c0_21, %c2] : memref<32x3xf32, #tpu.memory_space<vmem>>, vector<32x1xf32>
    tpu.vector_store %arg9[%c0_21, %c2], %28 {strides = array<i32>} : memref<32x3xf32, #tpu.memory_space<vmem>>, vector<32x1xf32>,
    return
  }
  func.func @transform_0(%arg0: i32) -> (i32, i32) {
    %c0_i32 = arith.constant 0 : i32
    %c0_i32_0 = arith.constant 0 : i32
    %c0_i32_1 = arith.constant 0 : i32
    return %c0_i32, %c0_i32_0 : i32, i32
  }
  func.func @transform_1(%arg0: i32) -> (i32, i32) {
    %c0_i32 = arith.constant 0 : i32
    %c0_i32_0 = arith.constant 0 : i32
    %c0_i32_1 = arith.constant 0 : i32
    return %c0_i32, %c0_i32_0 : i32, i32
  }
  func.func @transform_2(%arg0: i32) -> (i32, i32) {
    %c0_i32 = arith.constant 0 : i32
    %c0_i32_0 = arith.constant 0 : i32
    %c0_i32_1 = arith.constant 0 : i32
    return %c0_i32, %c0_i32_0 : i32, i32
  }
  func.func @transform_3(%arg0: i32) -> (i32, i32) {
    %c0_i32 = arith.constant 0 : i32
    %c0_i32_0 = arith.constant 0 : i32
    %c0_i32_1 = arith.constant 0 : i32
    return %c0_i32, %c0_i32_0 : i32, i32
  }
  func.func @transform_4(%arg0: i32) -> (i32, i32) {
    %c0_i32 = arith.constant 0 : i32
    %c0_i32_0 = arith.constant 0 : i32
    %c0_i32_1 = arith.constant 0 : i32
    return %c0_i32, %c0_i32_0 : i32, i32
  }
  func.func @transform_5(%arg0: i32) -> (i32, i32) {
    %c0_i32 = arith.constant 0 : i32
    %c0_i32_0 = arith.constant 0 : i32
    %c0_i32_1 = arith.constant 0 : i32
    return %c0_i32, %c0_i32_0 : i32, i32
  }
  func.func @transform_6(%arg0: i32) -> (i32, i32) {
    %c0_i32 = arith.constant 0 : i32
    %c0_i32_0 = arith.constant 0 : i32
    %c0_i32_1 = arith.constant 0 : i32
    return %c0_i32, %c0_i32_0 : i32, i32
  }
  func.func @transform_7(%arg0: i32) -> (i32, i32) {
    %c0_i32 = arith.constant 0 : i32
    %c0_i32_0 = arith.constant 0 : i32
    %c0_i32_1 = arith.constant 0 : i32
    return %c0_i32, %c0_i32_0 : i32, i32
  }
  func.func @transform_8(%arg0: i32) -> (i32, i32) {
    %c0_i32 = arith.constant 0 : i32
    %c0_i32_0 = arith.constant 0 : i32
    %c0_i32_1 = arith.constant 0 : i32
    return %c0_i32, %c0_i32_0 : i32, i32
  }
}

module attributes {stable_mosaic.version = 11 : i64} {
  func.func @dkvmn_kernel(%arg0: i32, %arg1: memref<8x4x32xbf16, #tpu.memory_space<vmem>>, %arg2: memref<8x4x32xbf16, #tpu.memory_space<vmem>>, %arg3: memref<8x4x1xf32, #tpu.memory_space<vmem>>, %arg4: memref<32x16xbf16, #tpu.memory_space<vmem>>, %arg5: memref<16x32xf32, #tpu.memory_space<vmem>>, %arg6: memref<32x64xbf16, #tpu.memory_space<vmem>>, %arg7: memref<1x64xf32, #tpu.memory_space<vmem>>, %arg8: memref<8x4x32xf32, #tpu.memory_space<vmem>>, %arg9: memref<4x16x32xf32, #tpu.memory_space<vmem>>) attributes {dimension_semantics = [#tpu.dimension_semantics<parallel>], iteration_bounds = array<i64: 1>, scalar_prefetch = 0 : i64, scratch_operands = 0 : i64, tpu.core_type = #tpu.core_type<tc>, window_params = [{transform_indices = @transform_0, window_bounds = array<i64: 8, 4, 32>}, {transform_indices = @transform_1, window_bounds = array<i64: 8, 4, 32>}, {transform_indices = @transform_2, window_bounds = array<i64: 8, 4, 1>}, {pipeline_mode = #tpu.pipeline_mode<synchronous>, transform_indices = @transform_3, window_bounds = array<i64: 32, 16>}, {pipeline_mode = #tpu.pipeline_mode<synchronous>, transform_indices = @transform_4, window_bounds = array<i64: 16, 32>}, {pipeline_mode = #tpu.pipeline_mode<synchronous>, transform_indices = @transform_5, window_bounds = array<i64: 32, 64>}, {pipeline_mode = #tpu.pipeline_mode<synchronous>, transform_indices = @transform_6, window_bounds = array<i64: 1, 64>}, {transform_indices = @transform_7, window_bounds = array<i64: 8, 4, 32>}, {transform_indices = @transform_8, window_bounds = array<i64: 4, 16, 32>}]} {
    %c0 = arith.constant 0 : index
    %c0_0 = arith.constant 0 : index
    %0 = vector.load %arg5[%c0, %c0_0] : memref<16x32xf32, #tpu.memory_space<vmem>>, vector<16x32xf32>
    %1 = vector.shape_cast %0 : vector<16x32xf32> to vector<1x16x32xf32>
    %2 = vector.shape_cast %1 : vector<1x16x32xf32> to vector<1x16x32xf32>
    %3 = vector.broadcast %2 : vector<1x16x32xf32> to vector<4x16x32xf32>
    %c0_1 = arith.constant 0 : index
    %c0_2 = arith.constant 0 : index
    %c0_3 = arith.constant 0 : index
    %4 = vector.load %arg9[%c0_1, %c0_2, %c0_3] : memref<4x16x32xf32, #tpu.memory_space<vmem>>, vector<4x16x32xf32>
    tpu.vector_store %arg9[%c0_1, %c0_2, %c0_3], %3 {strides = array<i32>} : memref<4x16x32xf32, #tpu.memory_space<vmem>>, vector<4x16x32xf32>,
    %c0_4 = arith.constant 0 : index
    %c0_5 = arith.constant 0 : index
    %5 = vector.load %arg4[%c0_4, %c0_5] : memref<32x16xbf16, #tpu.memory_space<vmem>>, vector<32x16xbf16>
    %c0_6 = arith.constant 0 : index
    %c0_7 = arith.constant 0 : index
    %6 = vector.load %arg6[%c0_6, %c0_7] : memref<32x64xbf16, #tpu.memory_space<vmem>>, vector<32x64xbf16>
    %c0_8 = arith.constant 0 : index
    %c0_9 = arith.constant 0 : index
    %7 = vector.load %arg7[%c0_8, %c0_9] : memref<1x64xf32, #tpu.memory_space<vmem>>, vector<1x64xf32>
    %c0_10 = arith.constant 0 : index
    %c0_11 = arith.constant 0 : index
    %c0_12 = arith.constant 0 : index
    %8 = vector.load %arg1[%c0_10, %c0_11, %c0_12] : memref<8x4x32xbf16, #tpu.memory_space<vmem>>, vector<1x4x32xbf16>
    %9 = vector.shape_cast %8 : vector<1x4x32xbf16> to vector<4x32xbf16>
    %c0_13 = arith.constant 0 : index
    %c0_14 = arith.constant 0 : index
    %c0_15 = arith.constant 0 : index
    %10 = vector.load %arg2[%c0_13, %c0_14, %c0_15] : memref<8x4x32xbf16, #tpu.memory_space<vmem>>, vector<1x4x32xbf16>
    %11 = vector.shape_cast %10 : vector<1x4x32xbf16> to vector<4x32xbf16>
    %c0_16 = arith.constant 0 : index
    %c0_17 = arith.constant 0 : index
    %c0_18 = arith.constant 0 : index
    %12 = vector.load %arg3[%c0_16, %c0_17, %c0_18] : memref<8x4x1xf32, #tpu.memory_space<vmem>>, vector<1x4x1xf32>
    %13 = vector.shape_cast %12 : vector<1x4x1xf32> to vector<4x1xf32>
    %cst = arith.constant dense<0.000000e+00> : vector<4x16xf32>
    %14 = tpu.matmul %9, %5, %cst {dimension_numbers = #tpu.dot_dimension_numbers<[1], [0], [0], [1], [0, 0, 1, 1], [], []>} : vector<4x32xbf16>, vector<32x16xbf16>, vector<4x16xf32> -> vector<4x16xf32>
    %cst_19 = arith.constant dense<0xFF800000> : vector<4xf32>
    %15 = vector.multi_reduction <maximumf>, %14, %cst_19 [1] : vector<4x16xf32> to vector<4xf32>
    %16 = vector.shape_cast %15 : vector<4xf32> to vector<4x1xf32>
    %17 = vector.broadcast %16 : vector<4x1xf32> to vector<4x16xf32>
    %18 = arith.subf %14, %17 : vector<4x16xf32>
    %19 = math.exp %18 : vector<4x16xf32>
    %cst_20 = arith.constant dense<0.000000e+00> : vector<4xf32>
    %20 = vector.multi_reduction <add>, %19, %cst_20 [1] : vector<4x16xf32> to vector<4xf32>
    %21 = vector.shape_cast %20 : vector<4xf32> to vector<4x1xf32>
    %22 = tpu.reciprocal %21 {approx = true} : vector<4x1xf32> -> vector<4x1xf32>
    %23 = vector.broadcast %22 : vector<4x1xf32> to vector<4x16xf32>
    %24 = arith.mulf %19, %23 : vector<4x16xf32>
    %c0_21 = arith.constant 0 : index
    %c0_22 = arith.constant 0 : index
    %c0_23 = arith.constant 0 : index
    %25 = vector.load %arg9[%c0_21, %c0_22, %c0_23] : memref<4x16x32xf32, #tpu.memory_space<vmem>>, vector<4x16x32xf32>
    %26 = vector.shape_cast %24 : vector<4x16xf32> to vector<4x16x1xf32>
    %27 = vector.broadcast %26 : vector<4x16x1xf32> to vector<4x16x32xf32>
    %28 = arith.mulf %27, %25 : vector<4x16x32xf32>
    %cst_24 = arith.constant dense<0.000000e+00> : vector<4x32xf32>
    %29 = vector.multi_reduction <add>, %28, %cst_24 [1] : vector<4x16x32xf32> to vector<4x32xf32>
    %c0_25 = arith.constant 0 : index
    %c0_26 = arith.constant 0 : index
    %c0_27 = arith.constant 0 : index
    %30 = vector.load %arg8[%c0_25, %c0_26, %c0_27] : memref<8x4x32xf32, #tpu.memory_space<vmem>>, vector<1x4x32xf32>
    %31 = vector.shape_cast %30 : vector<1x4x32xf32> to vector<4x32xf32>
    %32 = vector.shape_cast %29 : vector<4x32xf32> to vector<1x4x32xf32>
    tpu.vector_store %arg8[%c0_25, %c0_26, %c0_27], %32 {strides = array<i32>} : memref<8x4x32xf32, #tpu.memory_space<vmem>>, vector<1x4x32xf32>,
    %cst_28 = arith.constant dense<0.000000e+00> : vector<4x64xf32>
    %33 = tpu.matmul %11, %6, %cst_28 {dimension_numbers = #tpu.dot_dimension_numbers<[1], [0], [0], [1], [0, 0, 1, 1], [], []>} : vector<4x32xbf16>, vector<32x64xbf16>, vector<4x64xf32> -> vector<4x64xf32>
    %34 = vector.broadcast %7 : vector<1x64xf32> to vector<4x64xf32>
    %35 = arith.addf %33, %34 : vector<4x64xf32>
    %36 = vector.extract_strided_slice %35 {offsets = [0, 0], sizes = [4, 32], strides = [1, 1]} : vector<4x64xf32> to vector<4x32xf32>
    %37 = arith.negf %36 : vector<4x32xf32>
    %38 = math.exp %37 : vector<4x32xf32>
    %cst_29 = arith.constant 1.000000e+00 : f32
    %39 = vector.broadcast %cst_29 : f32 to vector<4x32xf32>
    %40 = arith.addf %39, %38 : vector<4x32xf32>
    %41 = arith.divf %39, %40 : vector<4x32xf32>
    %42 = vector.extract_strided_slice %35 {offsets = [0, 32], sizes = [4, 32], strides = [1, 1]} : vector<4x64xf32> to vector<4x32xf32>
    %43 = math.tanh %42 : vector<4x32xf32>
    %44 = vector.broadcast %13 : vector<4x1xf32> to vector<4x16xf32>
    %45 = arith.mulf %24, %44 : vector<4x16xf32>
    %46 = vector.shape_cast %45 : vector<4x16xf32> to vector<4x16x1xf32>
    %47 = vector.shape_cast %41 : vector<4x32xf32> to vector<4x1x32xf32>
    %48 = vector.broadcast %46 : vector<4x16x1xf32> to vector<4x16x32xf32>
    %49 = vector.broadcast %47 : vector<4x1x32xf32> to vector<4x16x32xf32>
    %50 = arith.mulf %48, %49 : vector<4x16x32xf32>
    %cst_30 = arith.constant 1.000000e+00 : f32
    %51 = vector.broadcast %cst_30 : f32 to vector<4x16x32xf32>
    %52 = arith.subf %51, %50 : vector<4x16x32xf32>
    %53 = arith.mulf %25, %52 : vector<4x16x32xf32>
    %54 = vector.shape_cast %43 : vector<4x32xf32> to vector<4x1x32xf32>
    %55 = vector.broadcast %46 : vector<4x16x1xf32> to vector<4x16x32xf32>
    %56 = vector.broadcast %54 : vector<4x1x32xf32> to vector<4x16x32xf32>
    %57 = arith.mulf %55, %56 : vector<4x16x32xf32>
    %58 = arith.addf %53, %57 : vector<4x16x32xf32>
    %c0_31 = arith.constant 0 : index
    %c0_32 = arith.constant 0 : index
    %c0_33 = arith.constant 0 : index
    %59 = vector.load %arg9[%c0_31, %c0_32, %c0_33] : memref<4x16x32xf32, #tpu.memory_space<vmem>>, vector<4x16x32xf32>
    tpu.vector_store %arg9[%c0_31, %c0_32, %c0_33], %58 {strides = array<i32>} : memref<4x16x32xf32, #tpu.memory_space<vmem>>, vector<4x16x32xf32>,
    %c1 = arith.constant 1 : index
    %c0_34 = arith.constant 0 : index
    %c0_35 = arith.constant 0 : index
    %60 = vector.load %arg1[%c1, %c0_34, %c0_35] : memref<8x4x32xbf16, #tpu.memory_space<vmem>>, vector<1x4x32xbf16>
    %61 = vector.shape_cast %60 : vector<1x4x32xbf16> to vector<4x32xbf16>
    %c1_36 = arith.constant 1 : index
    %c0_37 = arith.constant 0 : index
    %c0_38 = arith.constant 0 : index
    %62 = vector.load %arg2[%c1_36, %c0_37, %c0_38] : memref<8x4x32xbf16, #tpu.memory_space<vmem>>, vector<1x4x32xbf16>
    %63 = vector.shape_cast %62 : vector<1x4x32xbf16> to vector<4x32xbf16>
    %c1_39 = arith.constant 1 : index
    %c0_40 = arith.constant 0 : index
    %c0_41 = arith.constant 0 : index
    %64 = vector.load %arg3[%c1_39, %c0_40, %c0_41] : memref<8x4x1xf32, #tpu.memory_space<vmem>>, vector<1x4x1xf32>
    %65 = vector.shape_cast %64 : vector<1x4x1xf32> to vector<4x1xf32>
    %cst_42 = arith.constant dense<0.000000e+00> : vector<4x16xf32>
    %66 = tpu.matmul %61, %5, %cst_42 {dimension_numbers = #tpu.dot_dimension_numbers<[1], [0], [0], [1], [0, 0, 1, 1], [], []>} : vector<4x32xbf16>, vector<32x16xbf16>, vector<4x16xf32> -> vector<4x16xf32>
    %cst_43 = arith.constant dense<0xFF800000> : vector<4xf32>
    %67 = vector.multi_reduction <maximumf>, %66, %cst_43 [1] : vector<4x16xf32> to vector<4xf32>
    %68 = vector.shape_cast %67 : vector<4xf32> to vector<4x1xf32>
    %69 = vector.broadcast %68 : vector<4x1xf32> to vector<4x16xf32>
    %70 = arith.subf %66, %69 : vector<4x16xf32>
    %71 = math.exp %70 : vector<4x16xf32>
    %cst_44 = arith.constant dense<0.000000e+00> : vector<4xf32>
    %72 = vector.multi_reduction <add>, %71, %cst_44 [1] : vector<4x16xf32> to vector<4xf32>
    %73 = vector.shape_cast %72 : vector<4xf32> to vector<4x1xf32>
    %74 = tpu.reciprocal %73 {approx = true} : vector<4x1xf32> -> vector<4x1xf32>
    %75 = vector.broadcast %74 : vector<4x1xf32> to vector<4x16xf32>
    %76 = arith.mulf %71, %75 : vector<4x16xf32>
    %c0_45 = arith.constant 0 : index
    %c0_46 = arith.constant 0 : index
    %c0_47 = arith.constant 0 : index
    %77 = vector.load %arg9[%c0_45, %c0_46, %c0_47] : memref<4x16x32xf32, #tpu.memory_space<vmem>>, vector<4x16x32xf32>
    %78 = vector.shape_cast %76 : vector<4x16xf32> to vector<4x16x1xf32>
    %79 = vector.broadcast %78 : vector<4x16x1xf32> to vector<4x16x32xf32>
    %80 = arith.mulf %79, %77 : vector<4x16x32xf32>
    %cst_48 = arith.constant dense<0.000000e+00> : vector<4x32xf32>
    %81 = vector.multi_reduction <add>, %80, %cst_48 [1] : vector<4x16x32xf32> to vector<4x32xf32>
    %c1_49 = arith.constant 1 : index
    %c0_50 = arith.constant 0 : index
    %c0_51 = arith.constant 0 : index
    %82 = vector.load %arg8[%c1_49, %c0_50, %c0_51] : memref<8x4x32xf32, #tpu.memory_space<vmem>>, vector<1x4x32xf32>
    %83 = vector.shape_cast %82 : vector<1x4x32xf32> to vector<4x32xf32>
    %84 = vector.shape_cast %81 : vector<4x32xf32> to vector<1x4x32xf32>
    tpu.vector_store %arg8[%c1_49, %c0_50, %c0_51], %84 {strides = array<i32>} : memref<8x4x32xf32, #tpu.memory_space<vmem>>, vector<1x4x32xf32>,
    %cst_52 = arith.constant dense<0.000000e+00> : vector<4x64xf32>
    %85 = tpu.matmul %63, %6, %cst_52 {dimension_numbers = #tpu.dot_dimension_numbers<[1], [0], [0], [1], [0, 0, 1, 1], [], []>} : vector<4x32xbf16>, vector<32x64xbf16>, vector<4x64xf32> -> vector<4x64xf32>
    %86 = vector.broadcast %7 : vector<1x64xf32> to vector<4x64xf32>
    %87 = arith.addf %85, %86 : vector<4x64xf32>
    %88 = vector.extract_strided_slice %87 {offsets = [0, 0], sizes = [4, 32], strides = [1, 1]} : vector<4x64xf32> to vector<4x32xf32>
    %89 = arith.negf %88 : vector<4x32xf32>
    %90 = math.exp %89 : vector<4x32xf32>
    %cst_53 = arith.constant 1.000000e+00 : f32
    %91 = vector.broadcast %cst_53 : f32 to vector<4x32xf32>
    %92 = arith.addf %91, %90 : vector<4x32xf32>
    %93 = arith.divf %91, %92 : vector<4x32xf32>
    %94 = vector.extract_strided_slice %87 {offsets = [0, 32], sizes = [4, 32], strides = [1, 1]} : vector<4x64xf32> to vector<4x32xf32>
    %95 = math.tanh %94 : vector<4x32xf32>
    %96 = vector.broadcast %65 : vector<4x1xf32> to vector<4x16xf32>
    %97 = arith.mulf %76, %96 : vector<4x16xf32>
    %98 = vector.shape_cast %97 : vector<4x16xf32> to vector<4x16x1xf32>
    %99 = vector.shape_cast %93 : vector<4x32xf32> to vector<4x1x32xf32>
    %100 = vector.broadcast %98 : vector<4x16x1xf32> to vector<4x16x32xf32>
    %101 = vector.broadcast %99 : vector<4x1x32xf32> to vector<4x16x32xf32>
    %102 = arith.mulf %100, %101 : vector<4x16x32xf32>
    %cst_54 = arith.constant 1.000000e+00 : f32
    %103 = vector.broadcast %cst_54 : f32 to vector<4x16x32xf32>
    %104 = arith.subf %103, %102 : vector<4x16x32xf32>
    %105 = arith.mulf %77, %104 : vector<4x16x32xf32>
    %106 = vector.shape_cast %95 : vector<4x32xf32> to vector<4x1x32xf32>
    %107 = vector.broadcast %98 : vector<4x16x1xf32> to vector<4x16x32xf32>
    %108 = vector.broadcast %106 : vector<4x1x32xf32> to vector<4x16x32xf32>
    %109 = arith.mulf %107, %108 : vector<4x16x32xf32>
    %110 = arith.addf %105, %109 : vector<4x16x32xf32>
    %c0_55 = arith.constant 0 : index
    %c0_56 = arith.constant 0 : index
    %c0_57 = arith.constant 0 : index
    %111 = vector.load %arg9[%c0_55, %c0_56, %c0_57] : memref<4x16x32xf32, #tpu.memory_space<vmem>>, vector<4x16x32xf32>
    tpu.vector_store %arg9[%c0_55, %c0_56, %c0_57], %110 {strides = array<i32>} : memref<4x16x32xf32, #tpu.memory_space<vmem>>, vector<4x16x32xf32>,
    %c2 = arith.constant 2 : index
    %c0_58 = arith.constant 0 : index
    %c0_59 = arith.constant 0 : index
    %112 = vector.load %arg1[%c2, %c0_58, %c0_59] : memref<8x4x32xbf16, #tpu.memory_space<vmem>>, vector<1x4x32xbf16>
    %113 = vector.shape_cast %112 : vector<1x4x32xbf16> to vector<4x32xbf16>
    %c2_60 = arith.constant 2 : index
    %c0_61 = arith.constant 0 : index
    %c0_62 = arith.constant 0 : index
    %114 = vector.load %arg2[%c2_60, %c0_61, %c0_62] : memref<8x4x32xbf16, #tpu.memory_space<vmem>>, vector<1x4x32xbf16>
    %115 = vector.shape_cast %114 : vector<1x4x32xbf16> to vector<4x32xbf16>
    %c2_63 = arith.constant 2 : index
    %c0_64 = arith.constant 0 : index
    %c0_65 = arith.constant 0 : index
    %116 = vector.load %arg3[%c2_63, %c0_64, %c0_65] : memref<8x4x1xf32, #tpu.memory_space<vmem>>, vector<1x4x1xf32>
    %117 = vector.shape_cast %116 : vector<1x4x1xf32> to vector<4x1xf32>
    %cst_66 = arith.constant dense<0.000000e+00> : vector<4x16xf32>
    %118 = tpu.matmul %113, %5, %cst_66 {dimension_numbers = #tpu.dot_dimension_numbers<[1], [0], [0], [1], [0, 0, 1, 1], [], []>} : vector<4x32xbf16>, vector<32x16xbf16>, vector<4x16xf32> -> vector<4x16xf32>
    %cst_67 = arith.constant dense<0xFF800000> : vector<4xf32>
    %119 = vector.multi_reduction <maximumf>, %118, %cst_67 [1] : vector<4x16xf32> to vector<4xf32>
    %120 = vector.shape_cast %119 : vector<4xf32> to vector<4x1xf32>
    %121 = vector.broadcast %120 : vector<4x1xf32> to vector<4x16xf32>
    %122 = arith.subf %118, %121 : vector<4x16xf32>
    %123 = math.exp %122 : vector<4x16xf32>
    %cst_68 = arith.constant dense<0.000000e+00> : vector<4xf32>
    %124 = vector.multi_reduction <add>, %123, %cst_68 [1] : vector<4x16xf32> to vector<4xf32>
    %125 = vector.shape_cast %124 : vector<4xf32> to vector<4x1xf32>
    %126 = tpu.reciprocal %125 {approx = true} : vector<4x1xf32> -> vector<4x1xf32>
    %127 = vector.broadcast %126 : vector<4x1xf32> to vector<4x16xf32>
    %128 = arith.mulf %123, %127 : vector<4x16xf32>
    %c0_69 = arith.constant 0 : index
    %c0_70 = arith.constant 0 : index
    %c0_71 = arith.constant 0 : index
    %129 = vector.load %arg9[%c0_69, %c0_70, %c0_71] : memref<4x16x32xf32, #tpu.memory_space<vmem>>, vector<4x16x32xf32>
    %130 = vector.shape_cast %128 : vector<4x16xf32> to vector<4x16x1xf32>
    %131 = vector.broadcast %130 : vector<4x16x1xf32> to vector<4x16x32xf32>
    %132 = arith.mulf %131, %129 : vector<4x16x32xf32>
    %cst_72 = arith.constant dense<0.000000e+00> : vector<4x32xf32>
    %133 = vector.multi_reduction <add>, %132, %cst_72 [1] : vector<4x16x32xf32> to vector<4x32xf32>
    %c2_73 = arith.constant 2 : index
    %c0_74 = arith.constant 0 : index
    %c0_75 = arith.constant 0 : index
    %134 = vector.load %arg8[%c2_73, %c0_74, %c0_75] : memref<8x4x32xf32, #tpu.memory_space<vmem>>, vector<1x4x32xf32>
    %135 = vector.shape_cast %134 : vector<1x4x32xf32> to vector<4x32xf32>
    %136 = vector.shape_cast %133 : vector<4x32xf32> to vector<1x4x32xf32>
    tpu.vector_store %arg8[%c2_73, %c0_74, %c0_75], %136 {strides = array<i32>} : memref<8x4x32xf32, #tpu.memory_space<vmem>>, vector<1x4x32xf32>,
    %cst_76 = arith.constant dense<0.000000e+00> : vector<4x64xf32>
    %137 = tpu.matmul %115, %6, %cst_76 {dimension_numbers = #tpu.dot_dimension_numbers<[1], [0], [0], [1], [0, 0, 1, 1], [], []>} : vector<4x32xbf16>, vector<32x64xbf16>, vector<4x64xf32> -> vector<4x64xf32>
    %138 = vector.broadcast %7 : vector<1x64xf32> to vector<4x64xf32>
    %139 = arith.addf %137, %138 : vector<4x64xf32>
    %140 = vector.extract_strided_slice %139 {offsets = [0, 0], sizes = [4, 32], strides = [1, 1]} : vector<4x64xf32> to vector<4x32xf32>
    %141 = arith.negf %140 : vector<4x32xf32>
    %142 = math.exp %141 : vector<4x32xf32>
    %cst_77 = arith.constant 1.000000e+00 : f32
    %143 = vector.broadcast %cst_77 : f32 to vector<4x32xf32>
    %144 = arith.addf %143, %142 : vector<4x32xf32>
    %145 = arith.divf %143, %144 : vector<4x32xf32>
    %146 = vector.extract_strided_slice %139 {offsets = [0, 32], sizes = [4, 32], strides = [1, 1]} : vector<4x64xf32> to vector<4x32xf32>
    %147 = math.tanh %146 : vector<4x32xf32>
    %148 = vector.broadcast %117 : vector<4x1xf32> to vector<4x16xf32>
    %149 = arith.mulf %128, %148 : vector<4x16xf32>
    %150 = vector.shape_cast %149 : vector<4x16xf32> to vector<4x16x1xf32>
    %151 = vector.shape_cast %145 : vector<4x32xf32> to vector<4x1x32xf32>
    %152 = vector.broadcast %150 : vector<4x16x1xf32> to vector<4x16x32xf32>
    %153 = vector.broadcast %151 : vector<4x1x32xf32> to vector<4x16x32xf32>
    %154 = arith.mulf %152, %153 : vector<4x16x32xf32>
    %cst_78 = arith.constant 1.000000e+00 : f32
    %155 = vector.broadcast %cst_78 : f32 to vector<4x16x32xf32>
    %156 = arith.subf %155, %154 : vector<4x16x32xf32>
    %157 = arith.mulf %129, %156 : vector<4x16x32xf32>
    %158 = vector.shape_cast %147 : vector<4x32xf32> to vector<4x1x32xf32>
    %159 = vector.broadcast %150 : vector<4x16x1xf32> to vector<4x16x32xf32>
    %160 = vector.broadcast %158 : vector<4x1x32xf32> to vector<4x16x32xf32>
    %161 = arith.mulf %159, %160 : vector<4x16x32xf32>
    %162 = arith.addf %157, %161 : vector<4x16x32xf32>
    %c0_79 = arith.constant 0 : index
    %c0_80 = arith.constant 0 : index
    %c0_81 = arith.constant 0 : index
    %163 = vector.load %arg9[%c0_79, %c0_80, %c0_81] : memref<4x16x32xf32, #tpu.memory_space<vmem>>, vector<4x16x32xf32>
    tpu.vector_store %arg9[%c0_79, %c0_80, %c0_81], %162 {strides = array<i32>} : memref<4x16x32xf32, #tpu.memory_space<vmem>>, vector<4x16x32xf32>,
    %c3 = arith.constant 3 : index
    %c0_82 = arith.constant 0 : index
    %c0_83 = arith.constant 0 : index
    %164 = vector.load %arg1[%c3, %c0_82, %c0_83] : memref<8x4x32xbf16, #tpu.memory_space<vmem>>, vector<1x4x32xbf16>
    %165 = vector.shape_cast %164 : vector<1x4x32xbf16> to vector<4x32xbf16>
    %c3_84 = arith.constant 3 : index
    %c0_85 = arith.constant 0 : index
    %c0_86 = arith.constant 0 : index
    %166 = vector.load %arg2[%c3_84, %c0_85, %c0_86] : memref<8x4x32xbf16, #tpu.memory_space<vmem>>, vector<1x4x32xbf16>
    %167 = vector.shape_cast %166 : vector<1x4x32xbf16> to vector<4x32xbf16>
    %c3_87 = arith.constant 3 : index
    %c0_88 = arith.constant 0 : index
    %c0_89 = arith.constant 0 : index
    %168 = vector.load %arg3[%c3_87, %c0_88, %c0_89] : memref<8x4x1xf32, #tpu.memory_space<vmem>>, vector<1x4x1xf32>
    %169 = vector.shape_cast %168 : vector<1x4x1xf32> to vector<4x1xf32>
    %cst_90 = arith.constant dense<0.000000e+00> : vector<4x16xf32>
    %170 = tpu.matmul %165, %5, %cst_90 {dimension_numbers = #tpu.dot_dimension_numbers<[1], [0], [0], [1], [0, 0, 1, 1], [], []>} : vector<4x32xbf16>, vector<32x16xbf16>, vector<4x16xf32> -> vector<4x16xf32>
    %cst_91 = arith.constant dense<0xFF800000> : vector<4xf32>
    %171 = vector.multi_reduction <maximumf>, %170, %cst_91 [1] : vector<4x16xf32> to vector<4xf32>
    %172 = vector.shape_cast %171 : vector<4xf32> to vector<4x1xf32>
    %173 = vector.broadcast %172 : vector<4x1xf32> to vector<4x16xf32>
    %174 = arith.subf %170, %173 : vector<4x16xf32>
    %175 = math.exp %174 : vector<4x16xf32>
    %cst_92 = arith.constant dense<0.000000e+00> : vector<4xf32>
    %176 = vector.multi_reduction <add>, %175, %cst_92 [1] : vector<4x16xf32> to vector<4xf32>
    %177 = vector.shape_cast %176 : vector<4xf32> to vector<4x1xf32>
    %178 = tpu.reciprocal %177 {approx = true} : vector<4x1xf32> -> vector<4x1xf32>
    %179 = vector.broadcast %178 : vector<4x1xf32> to vector<4x16xf32>
    %180 = arith.mulf %175, %179 : vector<4x16xf32>
    %c0_93 = arith.constant 0 : index
    %c0_94 = arith.constant 0 : index
    %c0_95 = arith.constant 0 : index
    %181 = vector.load %arg9[%c0_93, %c0_94, %c0_95] : memref<4x16x32xf32, #tpu.memory_space<vmem>>, vector<4x16x32xf32>
    %182 = vector.shape_cast %180 : vector<4x16xf32> to vector<4x16x1xf32>
    %183 = vector.broadcast %182 : vector<4x16x1xf32> to vector<4x16x32xf32>
    %184 = arith.mulf %183, %181 : vector<4x16x32xf32>
    %cst_96 = arith.constant dense<0.000000e+00> : vector<4x32xf32>
    %185 = vector.multi_reduction <add>, %184, %cst_96 [1] : vector<4x16x32xf32> to vector<4x32xf32>
    %c3_97 = arith.constant 3 : index
    %c0_98 = arith.constant 0 : index
    %c0_99 = arith.constant 0 : index
    %186 = vector.load %arg8[%c3_97, %c0_98, %c0_99] : memref<8x4x32xf32, #tpu.memory_space<vmem>>, vector<1x4x32xf32>
    %187 = vector.shape_cast %186 : vector<1x4x32xf32> to vector<4x32xf32>
    %188 = vector.shape_cast %185 : vector<4x32xf32> to vector<1x4x32xf32>
    tpu.vector_store %arg8[%c3_97, %c0_98, %c0_99], %188 {strides = array<i32>} : memref<8x4x32xf32, #tpu.memory_space<vmem>>, vector<1x4x32xf32>,
    %cst_100 = arith.constant dense<0.000000e+00> : vector<4x64xf32>
    %189 = tpu.matmul %167, %6, %cst_100 {dimension_numbers = #tpu.dot_dimension_numbers<[1], [0], [0], [1], [0, 0, 1, 1], [], []>} : vector<4x32xbf16>, vector<32x64xbf16>, vector<4x64xf32> -> vector<4x64xf32>
    %190 = vector.broadcast %7 : vector<1x64xf32> to vector<4x64xf32>
    %191 = arith.addf %189, %190 : vector<4x64xf32>
    %192 = vector.extract_strided_slice %191 {offsets = [0, 0], sizes = [4, 32], strides = [1, 1]} : vector<4x64xf32> to vector<4x32xf32>
    %193 = arith.negf %192 : vector<4x32xf32>
    %194 = math.exp %193 : vector<4x32xf32>
    %cst_101 = arith.constant 1.000000e+00 : f32
    %195 = vector.broadcast %cst_101 : f32 to vector<4x32xf32>
    %196 = arith.addf %195, %194 : vector<4x32xf32>
    %197 = arith.divf %195, %196 : vector<4x32xf32>
    %198 = vector.extract_strided_slice %191 {offsets = [0, 32], sizes = [4, 32], strides = [1, 1]} : vector<4x64xf32> to vector<4x32xf32>
    %199 = math.tanh %198 : vector<4x32xf32>
    %200 = vector.broadcast %169 : vector<4x1xf32> to vector<4x16xf32>
    %201 = arith.mulf %180, %200 : vector<4x16xf32>
    %202 = vector.shape_cast %201 : vector<4x16xf32> to vector<4x16x1xf32>
    %203 = vector.shape_cast %197 : vector<4x32xf32> to vector<4x1x32xf32>
    %204 = vector.broadcast %202 : vector<4x16x1xf32> to vector<4x16x32xf32>
    %205 = vector.broadcast %203 : vector<4x1x32xf32> to vector<4x16x32xf32>
    %206 = arith.mulf %204, %205 : vector<4x16x32xf32>
    %cst_102 = arith.constant 1.000000e+00 : f32
    %207 = vector.broadcast %cst_102 : f32 to vector<4x16x32xf32>
    %208 = arith.subf %207, %206 : vector<4x16x32xf32>
    %209 = arith.mulf %181, %208 : vector<4x16x32xf32>
    %210 = vector.shape_cast %199 : vector<4x32xf32> to vector<4x1x32xf32>
    %211 = vector.broadcast %202 : vector<4x16x1xf32> to vector<4x16x32xf32>
    %212 = vector.broadcast %210 : vector<4x1x32xf32> to vector<4x16x32xf32>
    %213 = arith.mulf %211, %212 : vector<4x16x32xf32>
    %214 = arith.addf %209, %213 : vector<4x16x32xf32>
    %c0_103 = arith.constant 0 : index
    %c0_104 = arith.constant 0 : index
    %c0_105 = arith.constant 0 : index
    %215 = vector.load %arg9[%c0_103, %c0_104, %c0_105] : memref<4x16x32xf32, #tpu.memory_space<vmem>>, vector<4x16x32xf32>
    tpu.vector_store %arg9[%c0_103, %c0_104, %c0_105], %214 {strides = array<i32>} : memref<4x16x32xf32, #tpu.memory_space<vmem>>, vector<4x16x32xf32>,
    %c4 = arith.constant 4 : index
    %c0_106 = arith.constant 0 : index
    %c0_107 = arith.constant 0 : index
    %216 = vector.load %arg1[%c4, %c0_106, %c0_107] : memref<8x4x32xbf16, #tpu.memory_space<vmem>>, vector<1x4x32xbf16>
    %217 = vector.shape_cast %216 : vector<1x4x32xbf16> to vector<4x32xbf16>
    %c4_108 = arith.constant 4 : index
    %c0_109 = arith.constant 0 : index
    %c0_110 = arith.constant 0 : index
    %218 = vector.load %arg2[%c4_108, %c0_109, %c0_110] : memref<8x4x32xbf16, #tpu.memory_space<vmem>>, vector<1x4x32xbf16>
    %219 = vector.shape_cast %218 : vector<1x4x32xbf16> to vector<4x32xbf16>
    %c4_111 = arith.constant 4 : index
    %c0_112 = arith.constant 0 : index
    %c0_113 = arith.constant 0 : index
    %220 = vector.load %arg3[%c4_111, %c0_112, %c0_113] : memref<8x4x1xf32, #tpu.memory_space<vmem>>, vector<1x4x1xf32>
    %221 = vector.shape_cast %220 : vector<1x4x1xf32> to vector<4x1xf32>
    %cst_114 = arith.constant dense<0.000000e+00> : vector<4x16xf32>
    %222 = tpu.matmul %217, %5, %cst_114 {dimension_numbers = #tpu.dot_dimension_numbers<[1], [0], [0], [1], [0, 0, 1, 1], [], []>} : vector<4x32xbf16>, vector<32x16xbf16>, vector<4x16xf32> -> vector<4x16xf32>
    %cst_115 = arith.constant dense<0xFF800000> : vector<4xf32>
    %223 = vector.multi_reduction <maximumf>, %222, %cst_115 [1] : vector<4x16xf32> to vector<4xf32>
    %224 = vector.shape_cast %223 : vector<4xf32> to vector<4x1xf32>
    %225 = vector.broadcast %224 : vector<4x1xf32> to vector<4x16xf32>
    %226 = arith.subf %222, %225 : vector<4x16xf32>
    %227 = math.exp %226 : vector<4x16xf32>
    %cst_116 = arith.constant dense<0.000000e+00> : vector<4xf32>
    %228 = vector.multi_reduction <add>, %227, %cst_116 [1] : vector<4x16xf32> to vector<4xf32>
    %229 = vector.shape_cast %228 : vector<4xf32> to vector<4x1xf32>
    %230 = tpu.reciprocal %229 {approx = true} : vector<4x1xf32> -> vector<4x1xf32>
    %231 = vector.broadcast %230 : vector<4x1xf32> to vector<4x16xf32>
    %232 = arith.mulf %227, %231 : vector<4x16xf32>
    %c0_117 = arith.constant 0 : index
    %c0_118 = arith.constant 0 : index
    %c0_119 = arith.constant 0 : index
    %233 = vector.load %arg9[%c0_117, %c0_118, %c0_119] : memref<4x16x32xf32, #tpu.memory_space<vmem>>, vector<4x16x32xf32>
    %234 = vector.shape_cast %232 : vector<4x16xf32> to vector<4x16x1xf32>
    %235 = vector.broadcast %234 : vector<4x16x1xf32> to vector<4x16x32xf32>
    %236 = arith.mulf %235, %233 : vector<4x16x32xf32>
    %cst_120 = arith.constant dense<0.000000e+00> : vector<4x32xf32>
    %237 = vector.multi_reduction <add>, %236, %cst_120 [1] : vector<4x16x32xf32> to vector<4x32xf32>
    %c4_121 = arith.constant 4 : index
    %c0_122 = arith.constant 0 : index
    %c0_123 = arith.constant 0 : index
    %238 = vector.load %arg8[%c4_121, %c0_122, %c0_123] : memref<8x4x32xf32, #tpu.memory_space<vmem>>, vector<1x4x32xf32>
    %239 = vector.shape_cast %238 : vector<1x4x32xf32> to vector<4x32xf32>
    %240 = vector.shape_cast %237 : vector<4x32xf32> to vector<1x4x32xf32>
    tpu.vector_store %arg8[%c4_121, %c0_122, %c0_123], %240 {strides = array<i32>} : memref<8x4x32xf32, #tpu.memory_space<vmem>>, vector<1x4x32xf32>,
    %cst_124 = arith.constant dense<0.000000e+00> : vector<4x64xf32>
    %241 = tpu.matmul %219, %6, %cst_124 {dimension_numbers = #tpu.dot_dimension_numbers<[1], [0], [0], [1], [0, 0, 1, 1], [], []>} : vector<4x32xbf16>, vector<32x64xbf16>, vector<4x64xf32> -> vector<4x64xf32>
    %242 = vector.broadcast %7 : vector<1x64xf32> to vector<4x64xf32>
    %243 = arith.addf %241, %242 : vector<4x64xf32>
    %244 = vector.extract_strided_slice %243 {offsets = [0, 0], sizes = [4, 32], strides = [1, 1]} : vector<4x64xf32> to vector<4x32xf32>
    %245 = arith.negf %244 : vector<4x32xf32>
    %246 = math.exp %245 : vector<4x32xf32>
    %cst_125 = arith.constant 1.000000e+00 : f32
    %247 = vector.broadcast %cst_125 : f32 to vector<4x32xf32>
    %248 = arith.addf %247, %246 : vector<4x32xf32>
    %249 = arith.divf %247, %248 : vector<4x32xf32>
    %250 = vector.extract_strided_slice %243 {offsets = [0, 32], sizes = [4, 32], strides = [1, 1]} : vector<4x64xf32> to vector<4x32xf32>
    %251 = math.tanh %250 : vector<4x32xf32>
    %252 = vector.broadcast %221 : vector<4x1xf32> to vector<4x16xf32>
    %253 = arith.mulf %232, %252 : vector<4x16xf32>
    %254 = vector.shape_cast %253 : vector<4x16xf32> to vector<4x16x1xf32>
    %255 = vector.shape_cast %249 : vector<4x32xf32> to vector<4x1x32xf32>
    %256 = vector.broadcast %254 : vector<4x16x1xf32> to vector<4x16x32xf32>
    %257 = vector.broadcast %255 : vector<4x1x32xf32> to vector<4x16x32xf32>
    %258 = arith.mulf %256, %257 : vector<4x16x32xf32>
    %cst_126 = arith.constant 1.000000e+00 : f32
    %259 = vector.broadcast %cst_126 : f32 to vector<4x16x32xf32>
    %260 = arith.subf %259, %258 : vector<4x16x32xf32>
    %261 = arith.mulf %233, %260 : vector<4x16x32xf32>
    %262 = vector.shape_cast %251 : vector<4x32xf32> to vector<4x1x32xf32>
    %263 = vector.broadcast %254 : vector<4x16x1xf32> to vector<4x16x32xf32>
    %264 = vector.broadcast %262 : vector<4x1x32xf32> to vector<4x16x32xf32>
    %265 = arith.mulf %263, %264 : vector<4x16x32xf32>
    %266 = arith.addf %261, %265 : vector<4x16x32xf32>
    %c0_127 = arith.constant 0 : index
    %c0_128 = arith.constant 0 : index
    %c0_129 = arith.constant 0 : index
    %267 = vector.load %arg9[%c0_127, %c0_128, %c0_129] : memref<4x16x32xf32, #tpu.memory_space<vmem>>, vector<4x16x32xf32>
    tpu.vector_store %arg9[%c0_127, %c0_128, %c0_129], %266 {strides = array<i32>} : memref<4x16x32xf32, #tpu.memory_space<vmem>>, vector<4x16x32xf32>,
    %c5 = arith.constant 5 : index
    %c0_130 = arith.constant 0 : index
    %c0_131 = arith.constant 0 : index
    %268 = vector.load %arg1[%c5, %c0_130, %c0_131] : memref<8x4x32xbf16, #tpu.memory_space<vmem>>, vector<1x4x32xbf16>
    %269 = vector.shape_cast %268 : vector<1x4x32xbf16> to vector<4x32xbf16>
    %c5_132 = arith.constant 5 : index
    %c0_133 = arith.constant 0 : index
    %c0_134 = arith.constant 0 : index
    %270 = vector.load %arg2[%c5_132, %c0_133, %c0_134] : memref<8x4x32xbf16, #tpu.memory_space<vmem>>, vector<1x4x32xbf16>
    %271 = vector.shape_cast %270 : vector<1x4x32xbf16> to vector<4x32xbf16>
    %c5_135 = arith.constant 5 : index
    %c0_136 = arith.constant 0 : index
    %c0_137 = arith.constant 0 : index
    %272 = vector.load %arg3[%c5_135, %c0_136, %c0_137] : memref<8x4x1xf32, #tpu.memory_space<vmem>>, vector<1x4x1xf32>
    %273 = vector.shape_cast %272 : vector<1x4x1xf32> to vector<4x1xf32>
    %cst_138 = arith.constant dense<0.000000e+00> : vector<4x16xf32>
    %274 = tpu.matmul %269, %5, %cst_138 {dimension_numbers = #tpu.dot_dimension_numbers<[1], [0], [0], [1], [0, 0, 1, 1], [], []>} : vector<4x32xbf16>, vector<32x16xbf16>, vector<4x16xf32> -> vector<4x16xf32>
    %cst_139 = arith.constant dense<0xFF800000> : vector<4xf32>
    %275 = vector.multi_reduction <maximumf>, %274, %cst_139 [1] : vector<4x16xf32> to vector<4xf32>
    %276 = vector.shape_cast %275 : vector<4xf32> to vector<4x1xf32>
    %277 = vector.broadcast %276 : vector<4x1xf32> to vector<4x16xf32>
    %278 = arith.subf %274, %277 : vector<4x16xf32>
    %279 = math.exp %278 : vector<4x16xf32>
    %cst_140 = arith.constant dense<0.000000e+00> : vector<4xf32>
    %280 = vector.multi_reduction <add>, %279, %cst_140 [1] : vector<4x16xf32> to vector<4xf32>
    %281 = vector.shape_cast %280 : vector<4xf32> to vector<4x1xf32>
    %282 = tpu.reciprocal %281 {approx = true} : vector<4x1xf32> -> vector<4x1xf32>
    %283 = vector.broadcast %282 : vector<4x1xf32> to vector<4x16xf32>
    %284 = arith.mulf %279, %283 : vector<4x16xf32>
    %c0_141 = arith.constant 0 : index
    %c0_142 = arith.constant 0 : index
    %c0_143 = arith.constant 0 : index
    %285 = vector.load %arg9[%c0_141, %c0_142, %c0_143] : memref<4x16x32xf32, #tpu.memory_space<vmem>>, vector<4x16x32xf32>
    %286 = vector.shape_cast %284 : vector<4x16xf32> to vector<4x16x1xf32>
    %287 = vector.broadcast %286 : vector<4x16x1xf32> to vector<4x16x32xf32>
    %288 = arith.mulf %287, %285 : vector<4x16x32xf32>
    %cst_144 = arith.constant dense<0.000000e+00> : vector<4x32xf32>
    %289 = vector.multi_reduction <add>, %288, %cst_144 [1] : vector<4x16x32xf32> to vector<4x32xf32>
    %c5_145 = arith.constant 5 : index
    %c0_146 = arith.constant 0 : index
    %c0_147 = arith.constant 0 : index
    %290 = vector.load %arg8[%c5_145, %c0_146, %c0_147] : memref<8x4x32xf32, #tpu.memory_space<vmem>>, vector<1x4x32xf32>
    %291 = vector.shape_cast %290 : vector<1x4x32xf32> to vector<4x32xf32>
    %292 = vector.shape_cast %289 : vector<4x32xf32> to vector<1x4x32xf32>
    tpu.vector_store %arg8[%c5_145, %c0_146, %c0_147], %292 {strides = array<i32>} : memref<8x4x32xf32, #tpu.memory_space<vmem>>, vector<1x4x32xf32>,
    %cst_148 = arith.constant dense<0.000000e+00> : vector<4x64xf32>
    %293 = tpu.matmul %271, %6, %cst_148 {dimension_numbers = #tpu.dot_dimension_numbers<[1], [0], [0], [1], [0, 0, 1, 1], [], []>} : vector<4x32xbf16>, vector<32x64xbf16>, vector<4x64xf32> -> vector<4x64xf32>
    %294 = vector.broadcast %7 : vector<1x64xf32> to vector<4x64xf32>
    %295 = arith.addf %293, %294 : vector<4x64xf32>
    %296 = vector.extract_strided_slice %295 {offsets = [0, 0], sizes = [4, 32], strides = [1, 1]} : vector<4x64xf32> to vector<4x32xf32>
    %297 = arith.negf %296 : vector<4x32xf32>
    %298 = math.exp %297 : vector<4x32xf32>
    %cst_149 = arith.constant 1.000000e+00 : f32
    %299 = vector.broadcast %cst_149 : f32 to vector<4x32xf32>
    %300 = arith.addf %299, %298 : vector<4x32xf32>
    %301 = arith.divf %299, %300 : vector<4x32xf32>
    %302 = vector.extract_strided_slice %295 {offsets = [0, 32], sizes = [4, 32], strides = [1, 1]} : vector<4x64xf32> to vector<4x32xf32>
    %303 = math.tanh %302 : vector<4x32xf32>
    %304 = vector.broadcast %273 : vector<4x1xf32> to vector<4x16xf32>
    %305 = arith.mulf %284, %304 : vector<4x16xf32>
    %306 = vector.shape_cast %305 : vector<4x16xf32> to vector<4x16x1xf32>
    %307 = vector.shape_cast %301 : vector<4x32xf32> to vector<4x1x32xf32>
    %308 = vector.broadcast %306 : vector<4x16x1xf32> to vector<4x16x32xf32>
    %309 = vector.broadcast %307 : vector<4x1x32xf32> to vector<4x16x32xf32>
    %310 = arith.mulf %308, %309 : vector<4x16x32xf32>
    %cst_150 = arith.constant 1.000000e+00 : f32
    %311 = vector.broadcast %cst_150 : f32 to vector<4x16x32xf32>
    %312 = arith.subf %311, %310 : vector<4x16x32xf32>
    %313 = arith.mulf %285, %312 : vector<4x16x32xf32>
    %314 = vector.shape_cast %303 : vector<4x32xf32> to vector<4x1x32xf32>
    %315 = vector.broadcast %306 : vector<4x16x1xf32> to vector<4x16x32xf32>
    %316 = vector.broadcast %314 : vector<4x1x32xf32> to vector<4x16x32xf32>
    %317 = arith.mulf %315, %316 : vector<4x16x32xf32>
    %318 = arith.addf %313, %317 : vector<4x16x32xf32>
    %c0_151 = arith.constant 0 : index
    %c0_152 = arith.constant 0 : index
    %c0_153 = arith.constant 0 : index
    %319 = vector.load %arg9[%c0_151, %c0_152, %c0_153] : memref<4x16x32xf32, #tpu.memory_space<vmem>>, vector<4x16x32xf32>
    tpu.vector_store %arg9[%c0_151, %c0_152, %c0_153], %318 {strides = array<i32>} : memref<4x16x32xf32, #tpu.memory_space<vmem>>, vector<4x16x32xf32>,
    %c6 = arith.constant 6 : index
    %c0_154 = arith.constant 0 : index
    %c0_155 = arith.constant 0 : index
    %320 = vector.load %arg1[%c6, %c0_154, %c0_155] : memref<8x4x32xbf16, #tpu.memory_space<vmem>>, vector<1x4x32xbf16>
    %321 = vector.shape_cast %320 : vector<1x4x32xbf16> to vector<4x32xbf16>
    %c6_156 = arith.constant 6 : index
    %c0_157 = arith.constant 0 : index
    %c0_158 = arith.constant 0 : index
    %322 = vector.load %arg2[%c6_156, %c0_157, %c0_158] : memref<8x4x32xbf16, #tpu.memory_space<vmem>>, vector<1x4x32xbf16>
    %323 = vector.shape_cast %322 : vector<1x4x32xbf16> to vector<4x32xbf16>
    %c6_159 = arith.constant 6 : index
    %c0_160 = arith.constant 0 : index
    %c0_161 = arith.constant 0 : index
    %324 = vector.load %arg3[%c6_159, %c0_160, %c0_161] : memref<8x4x1xf32, #tpu.memory_space<vmem>>, vector<1x4x1xf32>
    %325 = vector.shape_cast %324 : vector<1x4x1xf32> to vector<4x1xf32>
    %cst_162 = arith.constant dense<0.000000e+00> : vector<4x16xf32>
    %326 = tpu.matmul %321, %5, %cst_162 {dimension_numbers = #tpu.dot_dimension_numbers<[1], [0], [0], [1], [0, 0, 1, 1], [], []>} : vector<4x32xbf16>, vector<32x16xbf16>, vector<4x16xf32> -> vector<4x16xf32>
    %cst_163 = arith.constant dense<0xFF800000> : vector<4xf32>
    %327 = vector.multi_reduction <maximumf>, %326, %cst_163 [1] : vector<4x16xf32> to vector<4xf32>
    %328 = vector.shape_cast %327 : vector<4xf32> to vector<4x1xf32>
    %329 = vector.broadcast %328 : vector<4x1xf32> to vector<4x16xf32>
    %330 = arith.subf %326, %329 : vector<4x16xf32>
    %331 = math.exp %330 : vector<4x16xf32>
    %cst_164 = arith.constant dense<0.000000e+00> : vector<4xf32>
    %332 = vector.multi_reduction <add>, %331, %cst_164 [1] : vector<4x16xf32> to vector<4xf32>
    %333 = vector.shape_cast %332 : vector<4xf32> to vector<4x1xf32>
    %334 = tpu.reciprocal %333 {approx = true} : vector<4x1xf32> -> vector<4x1xf32>
    %335 = vector.broadcast %334 : vector<4x1xf32> to vector<4x16xf32>
    %336 = arith.mulf %331, %335 : vector<4x16xf32>
    %c0_165 = arith.constant 0 : index
    %c0_166 = arith.constant 0 : index
    %c0_167 = arith.constant 0 : index
    %337 = vector.load %arg9[%c0_165, %c0_166, %c0_167] : memref<4x16x32xf32, #tpu.memory_space<vmem>>, vector<4x16x32xf32>
    %338 = vector.shape_cast %336 : vector<4x16xf32> to vector<4x16x1xf32>
    %339 = vector.broadcast %338 : vector<4x16x1xf32> to vector<4x16x32xf32>
    %340 = arith.mulf %339, %337 : vector<4x16x32xf32>
    %cst_168 = arith.constant dense<0.000000e+00> : vector<4x32xf32>
    %341 = vector.multi_reduction <add>, %340, %cst_168 [1] : vector<4x16x32xf32> to vector<4x32xf32>
    %c6_169 = arith.constant 6 : index
    %c0_170 = arith.constant 0 : index
    %c0_171 = arith.constant 0 : index
    %342 = vector.load %arg8[%c6_169, %c0_170, %c0_171] : memref<8x4x32xf32, #tpu.memory_space<vmem>>, vector<1x4x32xf32>
    %343 = vector.shape_cast %342 : vector<1x4x32xf32> to vector<4x32xf32>
    %344 = vector.shape_cast %341 : vector<4x32xf32> to vector<1x4x32xf32>
    tpu.vector_store %arg8[%c6_169, %c0_170, %c0_171], %344 {strides = array<i32>} : memref<8x4x32xf32, #tpu.memory_space<vmem>>, vector<1x4x32xf32>,
    %cst_172 = arith.constant dense<0.000000e+00> : vector<4x64xf32>
    %345 = tpu.matmul %323, %6, %cst_172 {dimension_numbers = #tpu.dot_dimension_numbers<[1], [0], [0], [1], [0, 0, 1, 1], [], []>} : vector<4x32xbf16>, vector<32x64xbf16>, vector<4x64xf32> -> vector<4x64xf32>
    %346 = vector.broadcast %7 : vector<1x64xf32> to vector<4x64xf32>
    %347 = arith.addf %345, %346 : vector<4x64xf32>
    %348 = vector.extract_strided_slice %347 {offsets = [0, 0], sizes = [4, 32], strides = [1, 1]} : vector<4x64xf32> to vector<4x32xf32>
    %349 = arith.negf %348 : vector<4x32xf32>
    %350 = math.exp %349 : vector<4x32xf32>
    %cst_173 = arith.constant 1.000000e+00 : f32
    %351 = vector.broadcast %cst_173 : f32 to vector<4x32xf32>
    %352 = arith.addf %351, %350 : vector<4x32xf32>
    %353 = arith.divf %351, %352 : vector<4x32xf32>
    %354 = vector.extract_strided_slice %347 {offsets = [0, 32], sizes = [4, 32], strides = [1, 1]} : vector<4x64xf32> to vector<4x32xf32>
    %355 = math.tanh %354 : vector<4x32xf32>
    %356 = vector.broadcast %325 : vector<4x1xf32> to vector<4x16xf32>
    %357 = arith.mulf %336, %356 : vector<4x16xf32>
    %358 = vector.shape_cast %357 : vector<4x16xf32> to vector<4x16x1xf32>
    %359 = vector.shape_cast %353 : vector<4x32xf32> to vector<4x1x32xf32>
    %360 = vector.broadcast %358 : vector<4x16x1xf32> to vector<4x16x32xf32>
    %361 = vector.broadcast %359 : vector<4x1x32xf32> to vector<4x16x32xf32>
    %362 = arith.mulf %360, %361 : vector<4x16x32xf32>
    %cst_174 = arith.constant 1.000000e+00 : f32
    %363 = vector.broadcast %cst_174 : f32 to vector<4x16x32xf32>
    %364 = arith.subf %363, %362 : vector<4x16x32xf32>
    %365 = arith.mulf %337, %364 : vector<4x16x32xf32>
    %366 = vector.shape_cast %355 : vector<4x32xf32> to vector<4x1x32xf32>
    %367 = vector.broadcast %358 : vector<4x16x1xf32> to vector<4x16x32xf32>
    %368 = vector.broadcast %366 : vector<4x1x32xf32> to vector<4x16x32xf32>
    %369 = arith.mulf %367, %368 : vector<4x16x32xf32>
    %370 = arith.addf %365, %369 : vector<4x16x32xf32>
    %c0_175 = arith.constant 0 : index
    %c0_176 = arith.constant 0 : index
    %c0_177 = arith.constant 0 : index
    %371 = vector.load %arg9[%c0_175, %c0_176, %c0_177] : memref<4x16x32xf32, #tpu.memory_space<vmem>>, vector<4x16x32xf32>
    tpu.vector_store %arg9[%c0_175, %c0_176, %c0_177], %370 {strides = array<i32>} : memref<4x16x32xf32, #tpu.memory_space<vmem>>, vector<4x16x32xf32>,
    %c7 = arith.constant 7 : index
    %c0_178 = arith.constant 0 : index
    %c0_179 = arith.constant 0 : index
    %372 = vector.load %arg1[%c7, %c0_178, %c0_179] : memref<8x4x32xbf16, #tpu.memory_space<vmem>>, vector<1x4x32xbf16>
    %373 = vector.shape_cast %372 : vector<1x4x32xbf16> to vector<4x32xbf16>
    %c7_180 = arith.constant 7 : index
    %c0_181 = arith.constant 0 : index
    %c0_182 = arith.constant 0 : index
    %374 = vector.load %arg2[%c7_180, %c0_181, %c0_182] : memref<8x4x32xbf16, #tpu.memory_space<vmem>>, vector<1x4x32xbf16>
    %375 = vector.shape_cast %374 : vector<1x4x32xbf16> to vector<4x32xbf16>
    %c7_183 = arith.constant 7 : index
    %c0_184 = arith.constant 0 : index
    %c0_185 = arith.constant 0 : index
    %376 = vector.load %arg3[%c7_183, %c0_184, %c0_185] : memref<8x4x1xf32, #tpu.memory_space<vmem>>, vector<1x4x1xf32>
    %377 = vector.shape_cast %376 : vector<1x4x1xf32> to vector<4x1xf32>
    %cst_186 = arith.constant dense<0.000000e+00> : vector<4x16xf32>
    %378 = tpu.matmul %373, %5, %cst_186 {dimension_numbers = #tpu.dot_dimension_numbers<[1], [0], [0], [1], [0, 0, 1, 1], [], []>} : vector<4x32xbf16>, vector<32x16xbf16>, vector<4x16xf32> -> vector<4x16xf32>
    %cst_187 = arith.constant dense<0xFF800000> : vector<4xf32>
    %379 = vector.multi_reduction <maximumf>, %378, %cst_187 [1] : vector<4x16xf32> to vector<4xf32>
    %380 = vector.shape_cast %379 : vector<4xf32> to vector<4x1xf32>
    %381 = vector.broadcast %380 : vector<4x1xf32> to vector<4x16xf32>
    %382 = arith.subf %378, %381 : vector<4x16xf32>
    %383 = math.exp %382 : vector<4x16xf32>
    %cst_188 = arith.constant dense<0.000000e+00> : vector<4xf32>
    %384 = vector.multi_reduction <add>, %383, %cst_188 [1] : vector<4x16xf32> to vector<4xf32>
    %385 = vector.shape_cast %384 : vector<4xf32> to vector<4x1xf32>
    %386 = tpu.reciprocal %385 {approx = true} : vector<4x1xf32> -> vector<4x1xf32>
    %387 = vector.broadcast %386 : vector<4x1xf32> to vector<4x16xf32>
    %388 = arith.mulf %383, %387 : vector<4x16xf32>
    %c0_189 = arith.constant 0 : index
    %c0_190 = arith.constant 0 : index
    %c0_191 = arith.constant 0 : index
    %389 = vector.load %arg9[%c0_189, %c0_190, %c0_191] : memref<4x16x32xf32, #tpu.memory_space<vmem>>, vector<4x16x32xf32>
    %390 = vector.shape_cast %388 : vector<4x16xf32> to vector<4x16x1xf32>
    %391 = vector.broadcast %390 : vector<4x16x1xf32> to vector<4x16x32xf32>
    %392 = arith.mulf %391, %389 : vector<4x16x32xf32>
    %cst_192 = arith.constant dense<0.000000e+00> : vector<4x32xf32>
    %393 = vector.multi_reduction <add>, %392, %cst_192 [1] : vector<4x16x32xf32> to vector<4x32xf32>
    %c7_193 = arith.constant 7 : index
    %c0_194 = arith.constant 0 : index
    %c0_195 = arith.constant 0 : index
    %394 = vector.load %arg8[%c7_193, %c0_194, %c0_195] : memref<8x4x32xf32, #tpu.memory_space<vmem>>, vector<1x4x32xf32>
    %395 = vector.shape_cast %394 : vector<1x4x32xf32> to vector<4x32xf32>
    %396 = vector.shape_cast %393 : vector<4x32xf32> to vector<1x4x32xf32>
    tpu.vector_store %arg8[%c7_193, %c0_194, %c0_195], %396 {strides = array<i32>} : memref<8x4x32xf32, #tpu.memory_space<vmem>>, vector<1x4x32xf32>,
    %cst_196 = arith.constant dense<0.000000e+00> : vector<4x64xf32>
    %397 = tpu.matmul %375, %6, %cst_196 {dimension_numbers = #tpu.dot_dimension_numbers<[1], [0], [0], [1], [0, 0, 1, 1], [], []>} : vector<4x32xbf16>, vector<32x64xbf16>, vector<4x64xf32> -> vector<4x64xf32>
    %398 = vector.broadcast %7 : vector<1x64xf32> to vector<4x64xf32>
    %399 = arith.addf %397, %398 : vector<4x64xf32>
    %400 = vector.extract_strided_slice %399 {offsets = [0, 0], sizes = [4, 32], strides = [1, 1]} : vector<4x64xf32> to vector<4x32xf32>
    %401 = arith.negf %400 : vector<4x32xf32>
    %402 = math.exp %401 : vector<4x32xf32>
    %cst_197 = arith.constant 1.000000e+00 : f32
    %403 = vector.broadcast %cst_197 : f32 to vector<4x32xf32>
    %404 = arith.addf %403, %402 : vector<4x32xf32>
    %405 = arith.divf %403, %404 : vector<4x32xf32>
    %406 = vector.extract_strided_slice %399 {offsets = [0, 32], sizes = [4, 32], strides = [1, 1]} : vector<4x64xf32> to vector<4x32xf32>
    %407 = math.tanh %406 : vector<4x32xf32>
    %408 = vector.broadcast %377 : vector<4x1xf32> to vector<4x16xf32>
    %409 = arith.mulf %388, %408 : vector<4x16xf32>
    %410 = vector.shape_cast %409 : vector<4x16xf32> to vector<4x16x1xf32>
    %411 = vector.shape_cast %405 : vector<4x32xf32> to vector<4x1x32xf32>
    %412 = vector.broadcast %410 : vector<4x16x1xf32> to vector<4x16x32xf32>
    %413 = vector.broadcast %411 : vector<4x1x32xf32> to vector<4x16x32xf32>
    %414 = arith.mulf %412, %413 : vector<4x16x32xf32>
    %cst_198 = arith.constant 1.000000e+00 : f32
    %415 = vector.broadcast %cst_198 : f32 to vector<4x16x32xf32>
    %416 = arith.subf %415, %414 : vector<4x16x32xf32>
    %417 = arith.mulf %389, %416 : vector<4x16x32xf32>
    %418 = vector.shape_cast %407 : vector<4x32xf32> to vector<4x1x32xf32>
    %419 = vector.broadcast %410 : vector<4x16x1xf32> to vector<4x16x32xf32>
    %420 = vector.broadcast %418 : vector<4x1x32xf32> to vector<4x16x32xf32>
    %421 = arith.mulf %419, %420 : vector<4x16x32xf32>
    %422 = arith.addf %417, %421 : vector<4x16x32xf32>
    %c0_199 = arith.constant 0 : index
    %c0_200 = arith.constant 0 : index
    %c0_201 = arith.constant 0 : index
    %423 = vector.load %arg9[%c0_199, %c0_200, %c0_201] : memref<4x16x32xf32, #tpu.memory_space<vmem>>, vector<4x16x32xf32>
    tpu.vector_store %arg9[%c0_199, %c0_200, %c0_201], %422 {strides = array<i32>} : memref<4x16x32xf32, #tpu.memory_space<vmem>>, vector<4x16x32xf32>,
    return
  }
  func.func @transform_0(%arg0: i32) -> (i32, i32, i32) {
    %c0_i32 = arith.constant 0 : i32
    %c0_i32_0 = arith.constant 0 : i32
    %c0_i32_1 = arith.constant 0 : i32
    return %c0_i32, %arg0, %c0_i32_0 : i32, i32, i32
  }
  func.func @transform_1(%arg0: i32) -> (i32, i32, i32) {
    %c0_i32 = arith.constant 0 : i32
    %c0_i32_0 = arith.constant 0 : i32
    %c0_i32_1 = arith.constant 0 : i32
    return %c0_i32, %arg0, %c0_i32_0 : i32, i32, i32
  }
  func.func @transform_2(%arg0: i32) -> (i32, i32, i32) {
    %c0_i32 = arith.constant 0 : i32
    %c0_i32_0 = arith.constant 0 : i32
    %c0_i32_1 = arith.constant 0 : i32
    return %c0_i32, %arg0, %c0_i32_0 : i32, i32, i32
  }
  func.func @transform_3(%arg0: i32) -> (i32, i32) {
    %c0_i32 = arith.constant 0 : i32
    %c0_i32_0 = arith.constant 0 : i32
    %c0_i32_1 = arith.constant 0 : i32
    return %c0_i32, %c0_i32_0 : i32, i32
  }
  func.func @transform_4(%arg0: i32) -> (i32, i32) {
    %c0_i32 = arith.constant 0 : i32
    %c0_i32_0 = arith.constant 0 : i32
    %c0_i32_1 = arith.constant 0 : i32
    return %c0_i32, %c0_i32_0 : i32, i32
  }
  func.func @transform_5(%arg0: i32) -> (i32, i32) {
    %c0_i32 = arith.constant 0 : i32
    %c0_i32_0 = arith.constant 0 : i32
    %c0_i32_1 = arith.constant 0 : i32
    return %c0_i32, %c0_i32_0 : i32, i32
  }
  func.func @transform_6(%arg0: i32) -> (i32, i32) {
    %c0_i32 = arith.constant 0 : i32
    %c0_i32_0 = arith.constant 0 : i32
    %c0_i32_1 = arith.constant 0 : i32
    return %c0_i32, %c0_i32_0 : i32, i32
  }
  func.func @transform_7(%arg0: i32) -> (i32, i32, i32) {
    %c0_i32 = arith.constant 0 : i32
    %c0_i32_0 = arith.constant 0 : i32
    %c0_i32_1 = arith.constant 0 : i32
    return %c0_i32, %arg0, %c0_i32_0 : i32, i32, i32
  }
  func.func @transform_8(%arg0: i32) -> (i32, i32, i32) {
    %c0_i32 = arith.constant 0 : i32
    %c0_i32_0 = arith.constant 0 : i32
    %c0_i32_1 = arith.constant 0 : i32
    return %arg0, %c0_i32, %c0_i32_0 : i32, i32, i32
  }
}

</mosaic_0001>

<bundles_post_ra>
// kernel: model_forward_device.3
= control target key start
LH: loop header
LB: loop body
LE: loop exit
PB: predicated region body
PF: predicated region fallthrough
CT: control target
= control target key end

     0   :  { %vm87_vm0 = vcmask 523264   ;;  %vm158_vm1 = vcmask 261120   ;;  %vm236_vm2 = vcmask 7168   ;;  %vm257_vm3 = vcmask 15368   ;;  %s351_s14 = smov 2   ;;  %s498_s2 = inlined_call_operand.vmem [shape: bf16[64,32], index: 2, kind: input, shape index: {}]   ;;  %s499_s0 = inlined_call_operand.vmem [shape: bf16[32,64], index: 0, kind: input, shape index: {}]   ;;  %s500_s1 = inlined_call_operand.vmem [shape: f32[32,32], index: 1, kind: input, shape index: {}]   ;;  %s501_s6 = inlined_call_operand.vmem [shape: f32[1,32], index: 6, kind: input, shape index: {}]   ;;  %s502_s7 = inlined_call_operand.<no memory space> [shape: f32[1,1], index: 7, kind: input, shape index: {}]   ;;  %s503_s5 = inlined_call_operand.<no memory space> [shape: f32[1,1], index: 5, kind: input, shape index: {}]   ;;  %s504_s3 = inlined_call_operand.vmem [shape: f32[1,32], index: 3, kind: input, shape index: {}]   ;;  %s505_s4 = inlined_call_operand.vmem [shape: f32[1,32], index: 4, kind: input, shape index: {}]   ;;  %s506_s8 = inlined_call_operand.vmem [shape: f32[32,3], index: 8, kind: output, shape index: {}]  }
   0x1   :  { %v320_v0 = vld [vmem:[%s498_s2 + $0x18] sm:$0xff]   ;;  %v321_v1 = vld [vmem:[%s498_s2 + $0x10] sm:$0xff]   ;;  %v322_v2 = vld [vmem:[%s498_s2 + $0x8] sm:$0xff]   ;;  %v15_v17 = vstv %s502_s7  ;;  %vm278_vm4 = vcmask 23568  }
   0x2   :  { %306 = vmatprep.subr.bf16.mxu0 %v320_v0  ;;  %v324_v3 = vld [vmem:[%s499_s0] sm:$0xff]   ;;  %v325_v5 = vld [vmem:[%s499_s0 + $0x8] sm:$0xff]   ;;  %v189_v13 = vld [vmem:[%s500_s1 + $0x18] sm:$0xff]  ;;  %v13_v18 = vstv %s503_s5  ;;  %16 = vst [vmem:[#allocation3] sm:$0x1] %v15_v17 }
   0x3   :  { %307 = vmatpush3.bf16.msra.mxu0 %v320_v0  ;;  %314 = vmatprep.mubr.msk.bf16.mxu0 %vm87_vm0, %v324_v3  ;;  %v323_v4 = vld [vmem:[%s498_s2] sm:$0xff]   ;;  %v187_v6 = vld [vmem:[%s500_s1 + $0x8] sm:$0xff]  ;;  %v188_v15 = vld [vmem:[%s500_s1 + $0x10] sm:$0xff]  ;;  %14 = vst [vmem:[#allocation2] sm:$0x1] %v13_v18 }
   0x4   :  { %308 = vmatprep.subr.bf16.mxu0 %v321_v1  ;;  %v298_v7 = vld [vmem:[%s501_s6] ss:$0 sm:$0xff] }
   0x5   :  { %v186_v8 = vld [vmem:[%s500_s1] sm:$0xff]  ;;  %v198_v9 = vmul.f32 %v298_v7, %v187_v6  ;;  %v200_v14 = vmul.f32 %v298_v7, %v189_v13  ;;  %v199_v16 = vmul.f32 %v298_v7, %v188_v15 }
   0x6   :  { %v197_v10 = vmul.f32 %v298_v7, %v186_v8  ;;  %v287_v19 = vld [vmem:[%s504_s3] ss:$0 sm:$0xff]  ;;  %s350_s3 = smov 1  }
   0x7   :  { %309 = vmatpush3.bf16.msra.mxu0 %v321_v1  ;;  %v204_v11 = vsel %vm158_vm1, %v198_v9, 0.0  ;;  %v296_v28 = vld [vmem:[%s505_s4] ss:$0 sm:$0xff]  ;;  %v210_v43 = vsel %vm158_vm1, %v200_v14, 0.0  ;;  %v207_v45 = vsel %vm158_vm1, %v199_v16, 0.0 }
   0x8   :  { %310 = vmatprep.subr.bf16.mxu0 %v322_v2  ;;  %v201_v12 = vsel %vm158_vm1, %v197_v10, 0.0  ;;  %205 = vadd.xlane.f32.xlu1 %v204_v11 }
   0x9   :  { %202 = vadd.xlane.f32.xlu0 %v201_v12  ;;  %v299_v40 = vld [vmem:[#allocation3] ss:$0 sm:$0xff] }
   0xa   :  { %v297_v50 = vld [vmem:[#allocation2] ss:$0 sm:$0xff] }
   0xb   :  { %311 = vmatpush3.bf16.msra.mxu0 %v322_v2 }
   0xc   :  { %312 = vmatprep.subr.bf16.mxu0 %v323_v4 }
   0xf   :  { %313 = vmatpush3.bf16.msra.mxu0 %v323_v4 }
  0x12   :  { %315 = vmatmul.mubr.msk.bf16.vlgmr.msra.gmra.mxu0 %vm87_vm0, %v325_v5 }
  0x91   :  { %v206_v41 = vpop.xlane.xlu1 %205 }
  0x92   :  { %v221_v44 = vadd.f32 %v299_v40, %v206_v41  ;;  %v203_v46 = vpop.xlane.xlu0 %202 }
  0x93   :  { %v220_v47 = vadd.f32 %v299_v40, %v203_v46 }
  0xd2   :  { %v316_v20 = vpop.f32.mrf.mxu0 }
  0xd3   :  { %v137_v21 = vadd.f32 %v316_v20, %v287_v19 }
  0xd4   :  { %v128_v22 = vpop.f32.mrf.mxu0 }
  0xd5   :  { %326 = vtanh.f32 %v137_v21  ;;  %v129_v23 = vadd.f32 %v287_v19, %v128_v22 }
  0xd6   :  { %v317_v24 = vpop.f32.mrf.mxu0 }
  0xd7   :  { %328 = vtanh.f32 %v129_v23  ;;  %v140_v25 = vadd.f32 %v317_v24, %v287_v19 }
  0xd8   :  { %v131_v26 = vpop.f32.mrf.mxu0 }
  0xd9   :  { %330 = vtanh.f32 %v140_v25  ;;  %v132_v27 = vadd.f32 %v287_v19, %v131_v26 }
  0xdb   :  { %332 = vtanh.f32 %v132_v27 }
  0xdc   :  { %334 = vtanh.f32 %v221_v44 }
  0xdd   :  { %336 = vtanh.f32 %v220_v47 }
  0xe2   :  { %v327_v29 = vpop.eup %326 }
  0xe3   :  { %v156_v30 = vmul.f32 %v327_v29, %v296_v28 }
  0xe4   :  { %v329_v31 = vpop.eup %328 }
  0xe5   :  { %v165_v32 = vsel %vm158_vm1, %v156_v30, 0.0  ;;  %v154_v33 = vmul.f32 %v329_v31, %v296_v28 }
  0xe6   :  { %v331_v34 = vpop.eup %330  ;;  %166 = vadd.xlane.f32.xlu1 %v165_v32 }
  0xe7   :  { %v159_v35 = vsel %vm158_vm1, %v154_v33, 0.0  ;;  %v157_v36 = vmul.f32 %v331_v34, %v296_v28 }
  0xe8   :  { %v333_v37 = vpop.eup %332  ;;  %160 = vadd.xlane.f32.xlu0 %v159_v35 }
  0xe9   :  { %v168_v38 = vsel %vm158_vm1, %v157_v36, 0.0  ;;  %v155_v39 = vmul.f32 %v333_v37, %v296_v28  ;;  %v335_v48 = vpop.eup %334 }
  0xea   :  { %169 = vadd.xlane.f32.xlu1 %v168_v38  ;;  %v337_v49 = vpop.eup %336 }
  0xeb   :  { %v162_v42 = vsel %vm158_vm1, %v155_v39, 0.0 }
  0xec   :  { %163 = vadd.xlane.f32.xlu0 %v162_v42 }
  0xee   :  { %211 = vadd.xlane.f32.xlu1 %v210_v43 }
  0xf0   :  { %208 = vadd.xlane.f32.xlu0 %v207_v45 }
  0xff   :  { %247 = vrot.lane.b32.xlu1 %v335_v48, %s350_s3 }
 0x106   :  { %245 = vrot.lane.b32.xlu0 %v337_v49, %s350_s3 }
 0x16f   :  { %v167_v51 = vpop.xlane.xlu1 %166 }
 0x170   :  { %v180_v52 = vadd.f32 %v297_v50, %v167_v51 }
 0x171   :  { %v161_v53 = vpop.xlane.xlu0 %160 }
 0x172   :  { %338 = vtanh.f32 %v180_v52  ;;  %v178_v54 = vadd.f32 %v297_v50, %v161_v53 }
 0x173   :  { %v170_v55 = vpop.xlane.xlu1 %169 }
 0x174   :  { %340 = vtanh.f32 %v178_v54  ;;  %v181_v56 = vadd.f32 %v297_v50, %v170_v55 }
 0x175   :  { %v164_v57 = vpop.xlane.xlu0 %163 }
 0x176   :  { %342 = vtanh.f32 %v181_v56  ;;  %v179_v58 = vadd.f32 %v297_v50, %v164_v57 }
 0x177   :  { %v212_v59 = vpop.xlane.xlu1 %211 }
 0x178   :  { %344 = vtanh.f32 %v179_v58  ;;  %v223_v62 = vadd.f32 %v299_v40, %v212_v59 }
 0x179   :  { %v209_v60 = vpop.xlane.xlu0 %208 }
 0x17a   :  { %v222_v61 = vadd.f32 %v299_v40, %v209_v60 }
 0x17b   :  { %v248_v5 = vpop.permute.xlu1 %247 }
 0x17c   :  { %346 = vtanh.f32 %v222_v61 }
 0x17d   :  { %348 = vtanh.f32 %v223_v62  ;;  %v246_v0 = vpop.permute.xlu0 %245 }
 0x17f   :  { %v339_v63 = vpop.eup %338 }
 0x180   :  { %239 = vst.msk [vmem:[%s506_s8 + $0x10] sm:$0xff] %vm236_vm2, %v339_v63  ;;  %v230_v7 = vmul.f32 3.0, %v339_v63 }
 0x181   :  { %v341_v1 = vpop.eup %340 }
 0x182   :  { %v228_v2 = vmul.f32 3.0, %v341_v1  ;;  %237 = vst.msk [vmem:[%s506_s8] sm:$0xff] %vm236_vm2, %v341_v1 }
 0x183   :  { %v343_v3 = vpop.eup %342  ;;  %258 = vst.msk [vmem:[%s506_s8] sm:$0xff] %vm257_vm3, %v246_v0 }
 0x184   :  { %v232_v4 = vsub.f32 %v228_v2, %v337_v49  ;;  %240 = vst.msk [vmem:[%s506_s8 + $0x18] sm:$0xff] %vm236_vm2, %v343_v3  ;;  %v231_v13 = vmul.f32 3.0, %v343_v3 }
 0x185   :  { %v345_v6 = vpop.eup %344 }
 0x186   :  { %266 = vrot.lane.b32.xlu0 %v232_v4, %s351_s14  ;;  %238 = vst.msk [vmem:[%s506_s8 + $0x8] sm:$0xff] %vm236_vm2, %v345_v6  ;;  %v229_v10 = vmul.f32 3.0, %v345_v6 }
 0x187   :  { %259 = vst.msk [vmem:[%s506_s8 + $0x8] sm:$0xff] %vm257_vm3, %v248_v5 }
 0x188   :  { %v233_v12 = vsub.f32 %v229_v10, %v335_v48 }
 0x189   :  { %v347_v8 = vpop.eup %346 }
 0x18a   :  { %249 = vrot.lane.b32.xlu1 %v347_v8, %s350_s3  ;;  %v234_v9 = vsub.f32 %v230_v7, %v347_v8  ;;  %v349_v11 = vpop.eup %348 }
 0x18b   :  { %v235_v14 = vsub.f32 %v231_v13, %v349_v11 }
 0x18c   :  { %270 = vrot.lane.b32.xlu0 %v234_v9, %s351_s14 }
 0x18e   :  { %251 = vrot.lane.b32.xlu1 %v349_v11, %s350_s3 }
 0x192   :  { %268 = vrot.lane.b32.xlu1 %v233_v12, %s351_s14 }
 0x196   :  { %272 = vrot.lane.b32.xlu1 %v235_v14, %s351_s14 }
 0x1f8   :  { %v267_v15 = vpop.permute.xlu0 %266 }
 0x1f9   :  { %279 = vst.msk [vmem:[%s506_s8] sm:$0xff] %vm278_vm4, %v267_v15 }
 0x1fc   :  { %v250_v16 = vpop.permute.xlu1 %249 }
 0x1fd   :  { %260 = vst.msk [vmem:[%s506_s8 + $0x10] sm:$0xff] %vm257_vm3, %v250_v16 }
 0x1fe   :  { %v271_v17 = vpop.permute.xlu0 %270 }
 0x1ff   :  { %281 = vst.msk [vmem:[%s506_s8 + $0x10] sm:$0xff] %vm278_vm4, %v271_v17 }
 0x200   :  { %v252_v18 = vpop.permute.xlu1 %251 }
 0x201   :  { %261 = vst.msk [vmem:[%s506_s8 + $0x18] sm:$0xff] %vm257_vm3, %v252_v18 }
 0x204   :  { %v269_v19 = vpop.permute.xlu1 %268 }
 0x205   :  { %280 = vst.msk [vmem:[%s506_s8 + $0x8] sm:$0xff] %vm278_vm4, %v269_v19 }
 0x208   :  { %v273_v20 = vpop.permute.xlu1 %272 }
 0x209   :  { %282 = vst.msk [vmem:[%s506_s8 + $0x18] sm:$0xff] %vm278_vm4, %v273_v20 }

// kernel: model_forward_device.2
= control target key start
LH: loop header
LB: loop body
LE: loop exit
PB: predicated region body
PF: predicated region fallthrough
CT: control target
= control target key end

     0   :  { %v3946_v1 = vmov 0.0   ;;  %vm3947_vm0 = vmmov 0   ;;  %v3948_v3 = vmov 0   ;;  %vm32_vm1 = vcmask 261120   ;;  %s5938_s0 = inlined_call_operand.vmem [shape: bf16[8,4,32], index: 0, kind: input, shape index: {}]   ;;  %s5939_s1 = inlined_call_operand.vmem [shape: bf16[8,4,32], index: 1, kind: input, shape index: {}]   ;;  %s5940_s2 = inlined_call_operand.vmem [shape: f32[8,4,1], index: 2, kind: input, shape index: {}]   ;;  %s5941_s3 = inlined_call_operand.vmem [shape: bf16[32,16], index: 3, kind: input, shape index: {}]   ;;  %s5942_s4 = inlined_call_operand.vmem [shape: f32[16,32], index: 4, kind: input, shape index: {}]   ;;  %s5943_s5 = inlined_call_operand.vmem [shape: bf16[32,64], index: 5, kind: input, shape index: {}]   ;;  %s5944_s6 = inlined_call_operand.vmem [shape: f32[1,64], index: 6, kind: input, shape index: {}]   ;;  %s5945_s7 = inlined_call_operand.vmem [shape: f32[8,4,32], index: 7, kind: output, shape index: {0}]   ;;  %s5946_s8 = inlined_call_operand.hbm [shape: f32[4,16,32], index: 8, kind: output, shape index: {1}]  }
   0x1   :  { %v4002_v0 = vld [vmem:[%s5941_s3 + $0x8] sm:$0xff]   ;;  %3694 = vmatprep.subr.bf16.mxu0 %v3946_v1  ;;  %3702 = vmatprep.subr.bf16.mxu1 %v3946_v1  ;;  %v4010_v2 = vld [vmem:[%s5941_s3] sm:$0xff]  }
   0x2   :  { %3695 = vmatpush3.bf16.msra.mxu0 %v4002_v0  ;;  %3698 = vmatprep.mubr.msk.bf16.mxu0 %vm3947_vm0, %v3946_v1  ;;  %v3599_v4 = vld [vmem:[%s5940_s2 + $0x4] sm:$0xf]  ;;  %v50_v5 = vld [vmem:[%s5938_s0] sm:$0x3]  ;;  %v3606_v7 = vld [vmem:[%s5940_s2 + $0x8] sm:$0xf] }
   0x3   :  { %3696 = vmatprep.subr.bf16.mxu0 %v3946_v1  ;;  %3831 = vset.pattern.permute.xlu0 %v3948_v3  ;;  %v52_v6 = vld [vmem:[%s5940_s2] sm:$0xf]  ;;  %v3613_v8 = vld [vmem:[%s5940_s2 + $0xc] sm:$0xf] }
   0x4   :  { %3830 = vset.pattern.permute.xlu1 %v3948_v3  ;;  %3706 = vmatprep.mubr.msk.bf16.mxu1 %vm3947_vm0, %v3946_v1 }
   0x5   :  { %735 = vperm.xlu0 %3831, %v3599_v4   ;;  %299 = vperm.xlu1 %3830, %v52_v6  }
   0x6   :  { %3697 = vmatpush3.bf16.msra.mxu0 %v4010_v2 }
   0x7   :  { %3710 = vmatprep.subr.bf16.mxu0 %v3946_v1 }
   0x9   :  { %3699 = vmatmul.mubr.msk.bf16.vlgmr.msra.gmra.mxu0 %vm32_vm1, %v50_v5 }
   0xa   :  { %14 = vsyncpa [#allocation3], 0  ;;  %3711 = vmatpush3.bf16.msra.mxu0 %v4002_v0  ;;  %3714 = vmatprep.mubr.msk.bf16.mxu0 %vm3947_vm0, %v3946_v1  ;;  %v3641_v9 = vld [vmem:[%s5940_s2 + $0x1c] sm:$0xf]  ;;  %v3620_v10 = vld [vmem:[%s5940_s2 + $0x10] sm:$0xf] }
   0xb   :  { %3712 = vmatprep.subr.bf16.mxu0 %v3946_v1  ;;  %1171 = vperm.xlu0 %3831, %v3606_v7   ;;  %v3597_v11 = vld [vmem:[%s5938_s0 + $0x2] sm:$0x3]  ;;  %v3627_v12 = vld [vmem:[%s5940_s2 + $0x14] sm:$0xf]  ;;  %v3634_v13 = vld [vmem:[%s5940_s2 + $0x18] sm:$0xf] }
   0xc   :  { %1607 = vperm.xlu1 %3830, %v3613_v8   ;;  %v3604_v14 = vld [vmem:[%s5938_s0 + $0x4] sm:$0x3]  ;;  %v3611_v15 = vld [vmem:[%s5938_s0 + $0x6] sm:$0x3]  ;;  %v3618_v16 = vld [vmem:[%s5938_s0 + $0x8] sm:$0x3] }
   0xd   :  { %v3625_v17 = vld [vmem:[%s5938_s0 + $0xa] sm:$0x3]  ;;  %v3632_v18 = vld [vmem:[%s5938_s0 + $0xc] sm:$0x3]  ;;  %v3639_v19 = vld [vmem:[%s5938_s0 + $0xe] sm:$0x3] }
   0xe   :  { %3713 = vmatpush3.bf16.msra.mxu0 %v4010_v2  ;;  %vm108_vm2 = vcmask 125952   ;;  %v4151_v60 = vld [vmem:[%s5943_s5 + $0x8] sm:$0xff]   ;;  %v4158_v61 = vld [vmem:[%s5943_s5] sm:$0xff]   ;;  %vm220_vm3 = vcmask 1041409   ;;  %vm222_vm4 = vcmask 1042434   ;;  %vm224_vm5 = vcmask 1043459  }
   0xf   :  { %3726 = vmatprep.subr.bf16.mxu0 %v3946_v1  ;;  %3351 = vperm.xlu0 %3831, %v3641_v9   ;;  %v51_v62 = vld [vmem:[%s5939_s1] sm:$0x3]  ;;  %v3598_v63 = vld [vmem:[%s5939_s1 + $0x2] sm:$0x3]  ;;  %vm227_vm6 = vcmask 257024   ;;  %s3951_s24 = smov [#allocation2]  }
  0x10   :  { %2043 = vperm.xlu1 %3830, %v3620_v10   ;;  %3703 = vmatpush3.bf16.msra.mxu1 %v4151_v60  ;;  %s3576_s25 = sshll.u32 %s3951_s24, 4  ;;  %s3577_s25 = int_to_ptr.vmem [resolvable:$true] %s3576_s25 }
  0x11   :  { %3715 = vmatmul.mubr.msk.bf16.vlgmr.msra.gmra.mxu0 %vm32_vm1, %v3597_v11  ;;  %3704 = vmatprep.subr.bf16.mxu1 %v3946_v1  ;;  %s3924_s2 = scalar_lea.vmem %s3577_s25, 1024  ;;  %p3929_p1 = scmp.lt.s32.totalorder %s3577_s25, %s3577_s25 }
  0x12   :  { %3727 = vmatpush3.bf16.msra.mxu0 %v4002_v0  ;;  %3730 = vmatprep.mubr.msk.bf16.mxu0 %vm3947_vm0, %v3946_v1  ;;  %p3925_p0 = scmp.ne.s32.totalorder %s3577_s25, %s3924_s2  ;;  %p3930_p2 = scmp.lt.s32.totalorder %s3924_s2, %s3924_s2 }
  0x13   :  { %3728 = vmatprep.subr.bf16.mxu0 %v3946_v1 }
  0x14   :  { %2479 = vperm.xlu1 %3830, %v3627_v12   ;;  %3705 = vmatpush3.bf16.msra.mxu1 %v4158_v61  ;;  %p3931_p3 = por %p3930_p2, %p3929_p1 }
  0x15   :  { %3718 = vmatprep.subr.bf16.mxu1 %v3946_v1 }
  0x16   :  { %3729 = vmatpush3.bf16.msra.mxu0 %v4010_v2  ;;  %p3932_p4 = pnand %p3931_p3, %p3925_p0 }
  0x17   :  { %3742 = vmatprep.subr.bf16.mxu0 %v3946_v1  ;;  %3707 = vmatmul.mubr.msk.bf16.vlgmr.msra.gmra.mxu1 %vm32_vm1, %v51_v62 }
  0x18   :  { %2915 = vperm.xlu1 %3830, %v3634_v13   ;;  %3719 = vmatpush3.bf16.msra.mxu1 %v4151_v60 }
  0x19   :  { %3731 = vmatmul.mubr.msk.bf16.vlgmr.msra.gmra.mxu0 %vm32_vm1, %v3604_v14  ;;  %3722 = vmatprep.mubr.msk.bf16.mxu1 %vm3947_vm0, %v3946_v1 }
  0x1a   :  { %3743 = vmatpush3.bf16.msra.mxu0 %v4002_v0  ;;  %3746 = vmatprep.mubr.msk.bf16.mxu0 %vm3947_vm0, %v3946_v1 }
  0x1b   :  { %3744 = vmatprep.subr.bf16.mxu0 %v3946_v1  ;;  %3720 = vmatprep.subr.bf16.mxu1 %v3946_v1 }
  0x1c   :  { %3721 = vmatpush3.bf16.msra.mxu1 %v4158_v61 }
  0x1d   :  { %3734 = vmatprep.subr.bf16.mxu1 %v3946_v1 }
  0x1e   :  { %3745 = vmatpush3.bf16.msra.mxu0 %v4010_v2 }
  0x1f   :  { %3758 = vmatprep.subr.bf16.mxu0 %v3946_v1  ;;  %3723 = vmatmul.mubr.msk.bf16.vlgmr.msra.gmra.mxu1 %vm32_vm1, %v3598_v63 }
  0x20   :  { %3735 = vmatpush3.bf16.msra.mxu1 %v4151_v60  ;;  %3738 = vmatprep.mubr.msk.bf16.mxu1 %vm3947_vm0, %v3946_v1 }
  0x21   :  { %3747 = vmatmul.mubr.msk.bf16.vlgmr.msra.gmra.mxu0 %vm32_vm1, %v3611_v15  ;;  %3736 = vmatprep.subr.bf16.mxu1 %v3946_v1 }
  0x22   :  { %3759 = vmatpush3.bf16.msra.mxu0 %v4002_v0  ;;  %3762 = vmatprep.mubr.msk.bf16.mxu0 %vm3947_vm0, %v3946_v1 }
  0x23   :  { %3760 = vmatprep.subr.bf16.mxu0 %v3946_v1 }
  0x24   :  { %3737 = vmatpush3.bf16.msra.mxu1 %v4158_v61 }
  0x25   :  { %3750 = vmatprep.subr.bf16.mxu1 %v3946_v1 }
  0x26   :  { %3761 = vmatpush3.bf16.msra.mxu0 %v4010_v2 }
  0x27   :  { %3774 = vmatprep.subr.bf16.mxu0 %v3946_v1 }
  0x29   :  { %3763 = vmatmul.mubr.msk.bf16.vlgmr.msra.gmra.mxu0 %vm32_vm1, %v3618_v16 }
  0x2a   :  { %3775 = vmatpush3.bf16.msra.mxu0 %v4002_v0  ;;  %3778 = vmatprep.mubr.msk.bf16.mxu0 %vm3947_vm0, %v3946_v1 }
  0x2b   :  { %3776 = vmatprep.subr.bf16.mxu0 %v3946_v1 }
  0x2e   :  { %3777 = vmatpush3.bf16.msra.mxu0 %v4010_v2 }
  0x2f   :  { %3790 = vmatprep.subr.bf16.mxu0 %v3946_v1 }
  0x31   :  { %3779 = vmatmul.mubr.msk.bf16.vlgmr.msra.gmra.mxu0 %vm32_vm1, %v3625_v17 }
  0x32   :  { %3791 = vmatpush3.bf16.msra.mxu0 %v4002_v0  ;;  %3794 = vmatprep.mubr.msk.bf16.mxu0 %vm3947_vm0, %v3946_v1 }
  0x33   :  { %3792 = vmatprep.subr.bf16.mxu0 %v3946_v1 }
  0x36   :  { %3793 = vmatpush3.bf16.msra.mxu0 %v4010_v2 }
  0x37   :  { %3806 = vmatprep.subr.bf16.mxu0 %v3946_v1 }
  0x39   :  { %3795 = vmatmul.mubr.msk.bf16.vlgmr.msra.gmra.mxu0 %vm32_vm1, %v3632_v18 }
  0x3a   :  { %3807 = vmatpush3.bf16.msra.mxu0 %v4002_v0  ;;  %3810 = vmatprep.mubr.msk.bf16.mxu0 %vm3947_vm0, %v3946_v1  ;;  %v3605_v0 = vld [vmem:[%s5939_s1 + $0x4] sm:$0x3] }
  0x3b   :  { %3808 = vmatprep.subr.bf16.mxu0 %v3946_v1  ;;  %3739 = vmatmul.mubr.msk.bf16.vlgmr.msra.gmra.mxu1 %vm32_vm1, %v3605_v0  ;;  %v31_v0 = vld [vmem:[%s5942_s4 + $0x8] sm:$0xff] }
  0x3c   :  { %3751 = vmatpush3.bf16.msra.mxu1 %v4151_v60  ;;  %3754 = vmatprep.mubr.msk.bf16.mxu1 %vm3947_vm0, %v3946_v1  ;;  %34 = vst.msk [vmem:[#allocation2 + $0x8] sm:$0xff] %vm32_vm1, %v31_v0  ;;  %36 = vst.msk [vmem:[#allocation2 + $0x18] sm:$0xff] %vm32_vm1, %v31_v0 }
  0x3d   :  { %3752 = vmatprep.subr.bf16.mxu1 %v3946_v1  ;;  %38 = vst.msk [vmem:[#allocation2 + $0x28] sm:$0xff] %vm32_vm1, %v31_v0  ;;  %40 = vst.msk [vmem:[#allocation2 + $0x38] sm:$0xff] %vm32_vm1, %v31_v0 }
  0x3e   :  { %3809 = vmatpush3.bf16.msra.mxu0 %v4010_v2  ;;  %v3612_v2 = vld [vmem:[%s5939_s1 + $0x6] sm:$0x3] }
  0x40   :  { %3753 = vmatpush3.bf16.msra.mxu1 %v4158_v61 }
  0x41   :  { %3811 = vmatmul.mubr.msk.bf16.vlgmr.msra.gmra.mxu0 %vm32_vm1, %v3639_v19  ;;  %3766 = vmatprep.subr.bf16.mxu1 %v3946_v1 }
  0x43   :  { %3755 = vmatmul.mubr.msk.bf16.vlgmr.msra.gmra.mxu1 %vm32_vm1, %v3612_v2  ;;  %v128_v2 = vlaneseq }
  0x44   :  { %3767 = vmatpush3.bf16.msra.mxu1 %v4151_v60  ;;  %3770 = vmatprep.mubr.msk.bf16.mxu1 %vm3947_vm0, %v3946_v1 }
  0x45   :  { %3768 = vmatprep.subr.bf16.mxu1 %v3946_v1 }
  0x48   :  { %3769 = vmatpush3.bf16.msra.mxu1 %v4158_v61 }
  0x49   :  { %3782 = vmatprep.subr.bf16.mxu1 %v3946_v1 }
  0x80   :  { %v4202_v3 = vpop.permute.xlu0 %735  ;;  %v4206_v5 = vpop.permute.xlu1 %299 }
  0x86   :  { %v4204_v4 = vpop.permute.xlu0 %1171 }
  0x87   :  { %v4210_v8 = vpop.permute.xlu1 %1607 }
  0x8a   :  { %v4208_v6 = vpop.permute.xlu0 %3351 }
  0x8b   :  { %v4213_v11 = vpop.permute.xlu1 %2043 }
  0x8f   :  { %v4216_v15 = vpop.permute.xlu1 %2479 }
  0x93   :  { %v4221_v19 = vpop.permute.xlu1 %2915 }
  0xc9   :  { %v4116_v20 = vpop.f32.mrf.mxu0 }
  0xca   :  { %v109_v21 = vsel %vm108_vm2, %v4116_v20, -inf }
  0xcb   :  { %110 = vmax.xlane.f32.xlu0 %v109_v21  ;;  %v3700_v22 = vpop.f32.mrf.mxu0 }
  0xcd   :  { %v105_v23 = vpop.f32.mrf.mxu0 }
  0xcf   :  { %v3701_v24 = vpop.f32.mrf.mxu0 }
  0xd1   :  { %v4120_v25 = vpop.f32.mrf.mxu0 }
  0xd2   :  { %v566_v26 = vsel %vm108_vm2, %v4120_v25, -inf }
  0xd3   :  { %567 = vmax.xlane.f32.xlu0 %v566_v26  ;;  %v3716_v27 = vpop.f32.mrf.mxu0 }
  0xd5   :  { %v563_v28 = vpop.f32.mrf.mxu0 }
  0xd7   :  { %v3717_v29 = vpop.f32.mrf.mxu0 }
  0xd9   :  { %v4124_v30 = vpop.f32.mrf.mxu0 }
  0xda   :  { %v1002_v31 = vsel %vm108_vm2, %v4124_v30, -inf }
  0xdb   :  { %1003 = vmax.xlane.f32.xlu0 %v1002_v31  ;;  %v3732_v32 = vpop.f32.mrf.mxu0 }
  0xdd   :  { %v999_v33 = vpop.f32.mrf.mxu0 }
  0xdf   :  { %v3733_v34 = vpop.f32.mrf.mxu0 }
  0xe1   :  { %v4128_v35 = vpop.f32.mrf.mxu0 }
  0xe2   :  { %v1438_v36 = vsel %vm108_vm2, %v4128_v35, -inf }
  0xe3   :  { %1439 = vmax.xlane.f32.xlu1 %v1438_v36  ;;  %v3748_v37 = vpop.f32.mrf.mxu0 }
  0xe5   :  { %v1435_v38 = vpop.f32.mrf.mxu0 }
  0xe7   :  { %v3749_v39 = vpop.f32.mrf.mxu0 }
  0xe9   :  { %v4132_v40 = vpop.f32.mrf.mxu0 }
  0xea   :  { %v1874_v41 = vsel %vm108_vm2, %v4132_v40, -inf }
  0xeb   :  { %1875 = vmax.xlane.f32.xlu0 %v1874_v41  ;;  %v3764_v42 = vpop.f32.mrf.mxu0 }
  0xed   :  { %v1871_v43 = vpop.f32.mrf.mxu0 }
  0xee   :  { %v3619_v43 = vld [vmem:[%s5939_s1 + $0x8] sm:$0x3] }
  0xef   :  { %v3765_v44 = vpop.f32.mrf.mxu0  ;;  %3771 = vmatmul.mubr.msk.bf16.vlgmr.msra.gmra.mxu1 %vm32_vm1, %v3619_v43 }
  0xf0   :  { %3783 = vmatpush3.bf16.msra.mxu1 %v4151_v60  ;;  %3786 = vmatprep.mubr.msk.bf16.mxu1 %vm3947_vm0, %v3946_v1 }
  0xf1   :  { %v4136_v45 = vpop.f32.mrf.mxu0  ;;  %3784 = vmatprep.subr.bf16.mxu1 %v3946_v1 }
  0xf2   :  { %v2310_v46 = vsel %vm108_vm2, %v4136_v45, -inf }
  0xf3   :  { %2311 = vmax.xlane.f32.xlu1 %v2310_v46  ;;  %v3780_v47 = vpop.f32.mrf.mxu0 }
  0xf4   :  { %3785 = vmatpush3.bf16.msra.mxu1 %v4158_v61 }
  0xf5   :  { %v2307_v48 = vpop.f32.mrf.mxu0  ;;  %3798 = vmatprep.subr.bf16.mxu1 %v3946_v1 }
  0xf7   :  { %v3781_v49 = vpop.f32.mrf.mxu0 }
  0xf9   :  { %v4140_v50 = vpop.f32.mrf.mxu0 }
  0xfa   :  { %v2746_v51 = vsel %vm108_vm2, %v4140_v50, -inf }
  0xfb   :  { %2747 = vmax.xlane.f32.xlu1 %v2746_v51  ;;  %v3796_v52 = vpop.f32.mrf.mxu0 }
  0xfc   :  { %v3626_v52 = vld [vmem:[%s5939_s1 + $0xa] sm:$0x3] }
  0xfd   :  { %v2743_v53 = vpop.f32.mrf.mxu0  ;;  %3787 = vmatmul.mubr.msk.bf16.vlgmr.msra.gmra.mxu1 %vm32_vm1, %v3626_v52 }
  0xfe   :  { %3799 = vmatpush3.bf16.msra.mxu1 %v4151_v60  ;;  %3802 = vmatprep.mubr.msk.bf16.mxu1 %vm3947_vm0, %v3946_v1  ;;  %v3633_v53 = vld [vmem:[%s5939_s1 + $0xc] sm:$0x3] }
  0xff   :  { %v3797_v54 = vpop.f32.mrf.mxu0  ;;  %3800 = vmatprep.subr.bf16.mxu1 %v3946_v1 }
 0x100   :  { %v4287_v54 = vpop.f32.mrf.mxu1 }
 0x101   :  { %v4144_v55 = vpop.f32.mrf.mxu0 }
 0x102   :  { %v3182_v56 = vsel %vm108_vm2, %v4144_v55, -inf  ;;  %3801 = vmatpush3.bf16.msra.mxu1 %v4158_v61 }
 0x103   :  { %3183 = vmax.xlane.f32.xlu0 %v3182_v56  ;;  %v3812_v57 = vpop.f32.mrf.mxu0  ;;  %3814 = vmatprep.subr.bf16.mxu1 %v3946_v1 }
 0x105   :  { %v3179_v58 = vpop.f32.mrf.mxu0  ;;  %3803 = vmatmul.mubr.msk.bf16.vlgmr.msra.gmra.mxu1 %vm32_vm1, %v3633_v53 }
 0x106   :  { %3815 = vmatpush3.bf16.msra.mxu1 %v4151_v60  ;;  %3818 = vmatprep.mubr.msk.bf16.mxu1 %vm3947_vm0, %v3946_v1  ;;  %v3640_v58 = vld [vmem:[%s5939_s1 + $0xe] sm:$0x3] }
 0x107   :  { %v3813_v59 = vpop.f32.mrf.mxu0  ;;  %3816 = vmatprep.subr.bf16.mxu1 %v3946_v1  ;;  %v30_v1 = vld [vmem:[%s5942_s4] sm:$0xff] }
 0x108   :  { %33 = vst.msk [vmem:[#allocation2] sm:$0xff] %vm32_vm1, %v30_v1  ;;  %35 = vst.msk [vmem:[#allocation2 + $0x10] sm:$0xff] %vm32_vm1, %v30_v1 }
 0x109   :  { %37 = vst.msk [vmem:[#allocation2 + $0x20] sm:$0xff] %vm32_vm1, %v30_v1  ;;  %39 = vst.msk [vmem:[#allocation2 + $0x30] sm:$0xff] %vm32_vm1, %v30_v1 }
 0x10a   :  { %3817 = vmatpush3.bf16.msra.mxu1 %v4158_v61 }
 0x10d   :  { %3819 = vmatmul.mubr.msk.bf16.vlgmr.msra.gmra.mxu1 %vm32_vm1, %v3640_v58 }
 0x154   :  { %v111_v7 = vpop.xlane.xlu0 %110 }
 0x155   :  { %v112_v9 = vsub.f32 %v4116_v20, %v111_v7  ;;  %v4309_v7 = vshrl.u32 %v128_v2, 7 }
 0x157   :  { %v113_v10 = vmul.f32 1.442695, %v112_v9  ;;  %v4312_v9 = vsub.s32 0, %v4309_v7 }
 0x159   :  { %3836 = vpow2.f32 %v113_v10  ;;  %v4315_v10 = vsub.s32 1, %v4309_v7 }
 0x15c   :  { %v568_v12 = vpop.xlane.xlu0 %567 }
 0x15d   :  { %v569_v13 = vsub.f32 %v4120_v25, %v568_v12 }
 0x15f   :  { %v570_v14 = vmul.f32 1.442695, %v569_v13 }
 0x161   :  { %3838 = vpow2.f32 %v570_v14 }
 0x164   :  { %v1004_v16 = vpop.xlane.xlu0 %1003 }
 0x165   :  { %v1005_v17 = vsub.f32 %v4124_v30, %v1004_v16 }
 0x166   :  { %v4219_v18 = vpop.eup %3836 }
 0x167   :  { %v1006_v21 = vmul.f32 1.442695, %v1005_v17  ;;  %v115_v20 = vsel %vm108_vm2, %v4219_v18, 0.0 }
 0x168   :  { %116 = vadd.xlane.f32.xlu0 %v115_v20 }
 0x169   :  { %3840 = vpow2.f32 %v1006_v21 }
 0x16c   :  { %v1440_v22 = vpop.xlane.xlu1 %1439 }
 0x16d   :  { %v1441_v23 = vsub.f32 %v4128_v35, %v1440_v22 }
 0x16e   :  { %v4226_v24 = vpop.eup %3838 }
 0x16f   :  { %v1442_v25 = vmul.f32 1.442695, %v1441_v23  ;;  %v572_v26 = vsel %vm108_vm2, %v4226_v24, 0.0  ;;  %v4324_v23 = vsub.s32 2, %v4309_v7 }
 0x170   :  { %573 = vadd.xlane.f32.xlu1 %v572_v26 }
 0x171   :  { %3842 = vpow2.f32 %v1442_v25 }
 0x174   :  { %v1876_v27 = vpop.xlane.xlu0 %1875 }
 0x175   :  { %v1877_v28 = vsub.f32 %v4132_v40, %v1876_v27 }
 0x176   :  { %v4231_v29 = vpop.eup %3840 }
 0x177   :  { %v1878_v30 = vmul.f32 1.442695, %v1877_v28  ;;  %v1008_v31 = vsel %vm108_vm2, %v4231_v29, 0.0 }
 0x178   :  { %1009 = vadd.xlane.f32.xlu1 %v1008_v31 }
 0x179   :  { %3844 = vpow2.f32 %v1878_v30 }
 0x17c   :  { %v2312_v32 = vpop.xlane.xlu1 %2311 }
 0x17d   :  { %v2313_v33 = vsub.f32 %v4136_v45, %v2312_v32 }
 0x17e   :  { %v4236_v34 = vpop.eup %3842 }
 0x17f   :  { %v2314_v35 = vmul.f32 1.442695, %v2313_v33  ;;  %v1444_v36 = vsel %vm108_vm2, %v4236_v34, 0.0 }
 0x180   :  { %1445 = vadd.xlane.f32.xlu0 %v1444_v36 }
 0x181   :  { %3846 = vpow2.f32 %v2314_v35 }
 0x184   :  { %v2748_v37 = vpop.xlane.xlu1 %2747 }
 0x185   :  { %v2749_v38 = vsub.f32 %v4140_v50, %v2748_v37 }
 0x186   :  { %v4241_v39 = vpop.eup %3844 }
 0x187   :  { %v2750_v40 = vmul.f32 1.442695, %v2749_v38  ;;  %v1880_v41 = vsel %vm108_vm2, %v4241_v39, 0.0 }
 0x188   :  { %1881 = vadd.xlane.f32.xlu1 %v1880_v41 }
 0x189   :  { %3848 = vpow2.f32 %v2750_v40 }
 0x18c   :  { %v3184_v42 = vpop.xlane.xlu0 %3183 }
 0x18d   :  { %v3185_v44 = vsub.f32 %v4144_v55, %v3184_v42  ;;  %v3708_v55 = vpop.f32.mrf.mxu1 }
 0x18e   :  { %v4250_v45 = vpop.eup %3846 }
 0x18f   :  { %v3186_v46 = vmul.f32 1.442695, %v3185_v44  ;;  %v2316_v47 = vsel %vm108_vm2, %v4250_v45, 0.0  ;;  %v287_v56 = vpop.f32.mrf.mxu1 }
 0x190   :  { %2317 = vadd.xlane.f32.xlu0 %v2316_v47 }
 0x191   :  { %3850 = vpow2.f32 %v3186_v46  ;;  %v3709_v57 = vpop.f32.mrf.mxu1 }
 0x193   :  { %v4293_v59 = vpop.f32.mrf.mxu1 }
 0x195   :  { %v3724_v60 = vpop.f32.mrf.mxu1 }
 0x196   :  { %v4260_v48 = vpop.eup %3848 }
 0x197   :  { %v2752_v49 = vsel %vm108_vm2, %v4260_v48, 0.0  ;;  %v723_v61 = vpop.f32.mrf.mxu1 }
 0x198   :  { %2753 = vadd.xlane.f32.xlu0 %v2752_v49 }
 0x199   :  { %v3725_v63 = vpop.f32.mrf.mxu1 }
 0x19b   :  { %v4328_v27 = vpop.f32.mrf.mxu1 }
 0x19d   :  { %v3740_v28 = vpop.f32.mrf.mxu1 }
 0x19e   :  { %v4264_v50 = vpop.eup %3850 }
 0x19f   :  { %v3188_v51 = vsel %vm108_vm2, %v4264_v50, 0.0  ;;  %v1159_v32 = vpop.f32.mrf.mxu1 }
 0x1a0   :  { %3189 = vadd.xlane.f32.xlu1 %v3188_v51 }
 0x1a1   :  { %v3741_v35 = vpop.f32.mrf.mxu1 }
 0x1a3   :  { %v4352_v56 = vpop.f32.mrf.mxu1 }
 0x1a5   :  { %v3756_v58 = vpop.f32.mrf.mxu1 }
 0x1a6   :  { %v123_v58 = vld [vmem:[#allocation2 + $0x18] sm:$0xff] }
 0x1a7   :  { %v1595_v61 = vpop.f32.mrf.mxu1 }
 0x1a9   :  { %v3757_v63 = vpop.f32.mrf.mxu1 }
 0x1f1   :  { %v117_v62 = vpop.xlane.xlu0 %116 }
 0x1f2   :  { %3852 = vrcp.f32 %v117_v62 }
 0x1f9   :  { %v574_v13 = vpop.xlane.xlu1 %573 }
 0x1fa   :  { %3854 = vrcp.f32 %v574_v13 }
 0x1ff   :  { %v3853_v12 = vpop.eup %3852 }
 0x200   :  { %v119_v14 = vmul.f32 %v3853_v12, %v4219_v18 }
 0x201   :  { %v1010_v41 = vpop.xlane.xlu1 %1009 }
 0x202   :  { %v142_v16 = vrot.slane %v119_v14, %v4315_v10  ;;  %v131_v17 = vrot.slane %v119_v14, %v4312_v9  ;;  %v302_v21 = vmul.f32 %v4206_v5, %v119_v14  ;;  %v153_v25 = vrot.slane %v119_v14, %v4324_v23 }
 0x203   :  { %v4331_v5 = vsub.s32 3, %v4309_v7 }
 0x204   :  { %144 = vbcast.lane.b32.xlu0 %v142_v16, 256  ;;  %133 = vbcast.lane.b32.xlu1 %v131_v17, 256  ;;  %v306_v20 = vrot.slane %v302_v21, %v4312_v9  ;;  %v317_v22 = vrot.slane %v302_v21, %v4315_v10  ;;  %v328_v18 = vrot.slane %v302_v21, %v4324_v23 }
 0x205   :  { %v339_v30 = vrot.slane %v302_v21, %v4331_v5  ;;  %v164_v37 = vrot.slane %v119_v14, %v4331_v5 }
 0x207   :  { %v3855_v26 = vpop.eup %3854 }
 0x208   :  { %308 = vbcast.lane.b32.xlu0 %v306_v20, 256  ;;  %137 = vbcast.lane.b32.xlu1 %v131_v17, 264  ;;  %v576_v31 = vmul.f32 %v3855_v26, %v4226_v24 }
 0x209   :  { %v1446_v33 = vpop.xlane.xlu0 %1445 }
 0x20a   :  { %v588_v36 = vrot.slane %v576_v31, %v4312_v9  ;;  %v599_v40 = vrot.slane %v576_v31, %v4315_v10  ;;  %v610_v24 = vrot.slane %v576_v31, %v4324_v23  ;;  %v621_v43 = vrot.slane %v576_v31, %v4331_v5 }
 0x20b   :  { %v738_v44 = vmul.f32 %v4202_v3, %v576_v31 }
 0x20c   :  { %319 = vbcast.lane.b32.xlu0 %v317_v22, 256  ;;  %148 = vbcast.lane.b32.xlu1 %v142_v16, 264 }
 0x20d   :  { %v753_v47 = vrot.slane %v738_v44, %v4315_v10  ;;  %v764_v53 = vrot.slane %v738_v44, %v4324_v23  ;;  %v775_v57 = vrot.slane %v738_v44, %v4331_v5  ;;  %v742_v16 = vrot.slane %v738_v44, %v4312_v9 }
 0x210   :  { %330 = vbcast.lane.b32.xlu0 %v328_v18, 256  ;;  %155 = vbcast.lane.b32.xlu1 %v153_v25, 256 }
 0x211   :  { %v4341_v46 = vpop.xlane.xlu1 %1881 }
 0x214   :  { %341 = vbcast.lane.b32.xlu0 %v339_v30, 256  ;;  %159 = vbcast.lane.b32.xlu1 %v153_v25, 264 }
 0x218   :  { %590 = vbcast.lane.b32.xlu0 %v588_v36, 256  ;;  %166 = vbcast.lane.b32.xlu1 %v164_v37, 256 }
 0x219   :  { %v2318_v38 = vpop.xlane.xlu0 %2317 }
 0x21a   :  { %3856 = vrcp.f32 %v2318_v38 }
 0x21b   :  { %3858 = vrcp.f32 %v1010_v41 }
 0x21c   :  { %601 = vbcast.lane.b32.xlu0 %v599_v40, 256  ;;  %170 = vbcast.lane.b32.xlu1 %v164_v37, 264 }
 0x220   :  { %612 = vbcast.lane.b32.xlu0 %v610_v24, 256  ;;  %312 = vbcast.lane.b32.xlu1 %v306_v20, 264 }
 0x221   :  { %v2754_v42 = vpop.xlane.xlu0 %2753 }
 0x222   :  { %3860 = vrcp.f32 %v2754_v42 }
 0x224   :  { %623 = vbcast.lane.b32.xlu0 %v621_v43, 256  ;;  %323 = vbcast.lane.b32.xlu1 %v317_v22, 264 }
 0x227   :  { %v3857_v49 = vpop.eup %3856 }
 0x228   :  { %v4345_v51 = vmul.f32 %v3857_v49, %v4250_v45  ;;  %755 = vbcast.lane.b32.xlu0 %v753_v47, 256  ;;  %334 = vbcast.lane.b32.xlu1 %v328_v18, 264  ;;  %v3859_v55 = vpop.eup %3858  ;;  %v4379_v18 = vpop.f32.mrf.mxu1 }
 0x229   :  { %v3190_v52 = vpop.xlane.xlu1 %3189  ;;  %v1012_v45 = vmul.f32 %v3859_v55, %v4231_v29 }
 0x22a   :  { %3862 = vrcp.f32 %v3190_v52  ;;  %v4350_v3 = vrot.slane %v4345_v51, %v4331_v5  ;;  %v3772_v26 = vpop.f32.mrf.mxu1 }
 0x22b   :  { %v1024_v62 = vrot.slane %v1012_v45, %v4312_v9  ;;  %v1035_v2 = vrot.slane %v1012_v45, %v4315_v10  ;;  %3864 = vrcp.f32 %v1446_v33  ;;  %v1057_v14 = vrot.slane %v1012_v45, %v4331_v5 }
 0x22c   :  { %766 = vbcast.lane.b32.xlu0 %v764_v53, 256  ;;  %345 = vbcast.lane.b32.xlu1 %v339_v30, 264  ;;  %v1174_v17 = vmul.f32 %v4204_v4, %v1012_v45  ;;  %v2031_v28 = vpop.f32.mrf.mxu1  ;;  %3866 = vrcp.f32 %v4341_v46 }
 0x22d   :  { %v125_v28 = vld [vmem:[#allocation2 + $0x28] sm:$0xff] }
 0x22e   :  { %v1189_v21 = vrot.slane %v1174_v17, %v4315_v10  ;;  %v1200_v20 = vrot.slane %v1174_v17, %v4324_v23  ;;  %v1211_v25 = vrot.slane %v1174_v17, %v4331_v5  ;;  %v3773_v31 = vpop.f32.mrf.mxu1 }
 0x22f   :  { %v3861_v60 = vpop.eup %3860 }
 0x230   :  { %v4357_v1 = vmul.f32 %v3861_v60, %v4260_v48  ;;  %777 = vbcast.lane.b32.xlu0 %v775_v57, 256  ;;  %594 = vbcast.lane.b32.xlu1 %v588_v36, 264  ;;  %v1046_v48 = vrot.slane %v1012_v45, %v4324_v23  ;;  %v4401_v41 = vpop.f32.mrf.mxu1  ;;  %v120_v45 = vld [vmem:[#allocation2] sm:$0xff] }
 0x232   :  { %v4362_v0 = vrot.slane %v4357_v1, %v4331_v5 }
 0x234   :  { %1026 = vbcast.lane.b32.xlu0 %v1024_v62, 256  ;;  %605 = vbcast.lane.b32.xlu1 %v599_v40, 264 }
 0x237   :  { %v3863_v29 = vpop.eup %3862 }
 0x238   :  { %v4366_v12 = vmul.f32 %v3863_v29, %v4264_v50  ;;  %1037 = vbcast.lane.b32.xlu0 %v1035_v2, 256  ;;  %616 = vbcast.lane.b32.xlu1 %v610_v24, 264  ;;  %v1178_v50 = vrot.slane %v1174_v17, %v4312_v9  ;;  %v3865_v22 = vpop.eup %3864  ;;  %v3788_v24 = vpop.f32.mrf.mxu1 }
 0x239   :  { %v1448_v4 = vmul.f32 %v3865_v22, %v4236_v34  ;;  %v3867_v40 = vpop.eup %3866  ;;  %v124_v22 = vld [vmem:[#allocation2 + $0x20] sm:$0xff] }
 0x23a   :  { %v4371_v13 = vrot.slane %v4366_v12, %v4331_v5 }
 0x23b   :  { %v1460_v30 = vrot.slane %v1448_v4, %v4312_v9  ;;  %v1471_v32 = vrot.slane %v1448_v4, %v4315_v10  ;;  %v1482_v33 = vrot.slane %v1448_v4, %v4324_v23  ;;  %v1493_v34 = vrot.slane %v1448_v4, %v4331_v5 }
 0x23c   :  { %5986 = vst [vmem:[#allocation5_spill] sm:$0xff] %v4371_v13  ;;  %1048 = vbcast.lane.b32.xlu0 %v1046_v48, 256  ;;  %627 = vbcast.lane.b32.xlu1 %v621_v43, 264  ;;  %v4389_v35 = vmul.f32 %v4210_v8, %v1448_v4  ;;  %v1884_v8 = vmul.f32 %v3867_v40, %v4241_v39  ;;  %v2467_v43 = vpop.f32.mrf.mxu1  ;;  %v122_v39 = vld [vmem:[#allocation2 + $0x10] sm:$0xff] }
 0x23e   :  { %v1614_v36 = vrot.slane %v4389_v35, %v4312_v9  ;;  %v4395_v37 = vrot.slane %v4389_v35, %v4324_v23  ;;  %v1647_v38 = vrot.slane %v4389_v35, %v4331_v5  ;;  %v4404_v42 = vrot.slane %v1884_v8, %v4312_v9  ;;  %v3789_v44 = vpop.f32.mrf.mxu1 }
 0x23f   :  { %v4408_v49 = vrot.slane %v1884_v8, %v4315_v10  ;;  %v2046_v29 = vmul.f32 %v4213_v11, %v1884_v8 }
 0x240   :  { %1059 = vbcast.lane.b32.xlu0 %v1057_v14, 256  ;;  %744 = vbcast.lane.b32.xlu1 %v742_v16, 256  ;;  %v4441_v43 = vpop.f32.mrf.mxu1 }
 0x241   :  { %v4430_v4 = vrot.slane %v2046_v29, %v4312_v9 }
 0x244   :  { %1184 = vbcast.lane.b32.xlu0 %v1178_v50, 264  ;;  %748 = vbcast.lane.b32.xlu1 %v742_v16, 264 }
 0x248   :  { %1195 = vbcast.lane.b32.xlu0 %v1189_v21, 264  ;;  %759 = vbcast.lane.b32.xlu1 %v753_v47, 264 }
 0x24c   :  { %1206 = vbcast.lane.b32.xlu0 %v1200_v20, 264  ;;  %770 = vbcast.lane.b32.xlu1 %v764_v53, 264  ;;  %v121_v53 = vld [vmem:[#allocation2 + $0x8] sm:$0xff] }
 0x250   :  { %1217 = vbcast.lane.b32.xlu0 %v1211_v25, 264  ;;  %781 = vbcast.lane.b32.xlu1 %v775_v57, 264  ;;  %v4414_v57 = vrot.slane %v1884_v8, %v4324_v23 }
 0x254   :  { %1030 = vbcast.lane.b32.xlu1 %v1024_v62, 264  ;;  %1462 = vbcast.lane.b32.xlu0 %v1460_v30, 256 }
 0x258   :  { %1041 = vbcast.lane.b32.xlu1 %v1035_v2, 264  ;;  %1477 = vbcast.lane.b32.xlu0 %v1471_v32, 264  ;;  %v4420_v2 = vrot.slane %v1884_v8, %v4331_v5 }
 0x25c   :  { %1052 = vbcast.lane.b32.xlu1 %v1046_v48, 264  ;;  %1488 = vbcast.lane.b32.xlu0 %v1482_v33, 264 }
 0x260   :  { %1063 = vbcast.lane.b32.xlu1 %v1057_v14, 264  ;;  %1499 = vbcast.lane.b32.xlu0 %v1493_v34, 264 }
 0x264   :  { %1180 = vbcast.lane.b32.xlu1 %v1178_v50, 256  ;;  %1616 = vbcast.lane.b32.xlu0 %v1614_v36, 256 }
 0x268   :  { %1191 = vbcast.lane.b32.xlu1 %v1189_v21, 256  ;;  %1642 = vbcast.lane.b32.xlu0 %v4395_v37, 264 }
 0x26c   :  { %1202 = vbcast.lane.b32.xlu1 %v1200_v20, 256  ;;  %1649 = vbcast.lane.b32.xlu0 %v1647_v38, 256 }
 0x270   :  { %1213 = vbcast.lane.b32.xlu1 %v1211_v25, 256  ;;  %1653 = vbcast.lane.b32.xlu0 %v1647_v38, 264  ;;  %v2061_v38 = vrot.slane %v2046_v29, %v4315_v10 }
 0x274   :  { %1466 = vbcast.lane.b32.xlu1 %v1460_v30, 264  ;;  %1898 = vbcast.lane.b32.xlu0 %v4404_v42, 256 }
 0x276   :  { %v134_v46 = vpop.permute.xlu1 %133  ;;  %v145_v47 = vpop.permute.xlu0 %144 }
 0x277   :  { %v174_v60 = vmul.f32 %v145_v47, %v122_v39  ;;  %v172_v48 = vmul.f32 %v134_v46, %v120_v45  ;;  %v126_v39 = vld [vmem:[#allocation2 + $0x30] sm:$0xff] }
 0x278   :  { %1473 = vbcast.lane.b32.xlu1 %v1471_v32, 256  ;;  %1909 = vbcast.lane.b32.xlu0 %v4408_v49, 256 }
 0x279   :  { %v189_v16 = vsel %vm32_vm1, %v174_v60, 0.0  ;;  %v180_v11 = vsel %vm32_vm1, %v172_v48, 0.0 }
 0x27a   :  { %v138_v52 = vpop.permute.xlu1 %137  ;;  %v4411_v55 = vpop.permute.xlu0 %308 }
 0x27b   :  { %v173_v61 = vmul.f32 %v138_v52, %v121_v53  ;;  %v3804_v53 = vpop.f32.mrf.mxu1 }
 0x27c   :  { %1484 = vbcast.lane.b32.xlu1 %v1482_v33, 256  ;;  %1920 = vbcast.lane.b32.xlu0 %v4414_v57, 256 }
 0x27d   :  { %v181_v17 = vsel %vm32_vm1, %v173_v61, 0.0  ;;  %v2903_v61 = vpop.f32.mrf.mxu1 }
 0x27e   :  { %v149_v62 = vpop.permute.xlu1 %148  ;;  %v4417_v63 = vpop.permute.xlu0 %319  ;;  %v182_v26 = vadd.f32 %v181_v17, %v180_v11  ;;  %v4448_v17 = vrot.slane %v2046_v29, %v4324_v23 }
 0x27f   :  { %v175_v14 = vmul.f32 %v149_v62, %v123_v58  ;;  %v127_v58 = vld [vmem:[#allocation2 + $0x38] sm:$0xff] }
 0x280   :  { %1495 = vbcast.lane.b32.xlu1 %v1493_v34, 256  ;;  %1931 = vbcast.lane.b32.xlu0 %v4420_v2, 256  ;;  %v1625_v34 = vrot.slane %v4389_v35, %v4315_v10  ;;  %v183_v8 = vrot.slane %v182_v26, 4 }
 0x281   :  { %v190_v50 = vsel %vm32_vm1, %v175_v14, 0.0 }
 0x282   :  { %v191_v21 = vadd.f32 %v190_v50, %v189_v16  ;;  %v156_v20 = vpop.permute.xlu1 %155  ;;  %v4427_v25 = vpop.permute.xlu0 %330  ;;  %v184_v35 = vadd.f32 %v183_v8, %v182_v26 }
 0x283   :  { %v176_v30 = vmul.f32 %v156_v20, %v124_v22 }
 0x284   :  { %1620 = vbcast.lane.b32.xlu1 %v1614_v36, 264  ;;  %2056 = vbcast.lane.b32.xlu0 %v4430_v4, 264  ;;  %v192_v31 = vrot.slane %v191_v21, 4  ;;  %v185_v20 = vrot.slane %v184_v35, 2 }
 0x285   :  { %v198_v24 = vsel %vm32_vm1, %v176_v30, 0.0 }
 0x286   :  { %v160_v32 = vpop.permute.xlu1 %159  ;;  %v4434_v33 = vpop.permute.xlu0 %341  ;;  %v193_v44 = vadd.f32 %v192_v31, %v191_v21 }
 0x287   :  { %v177_v40 = vmul.f32 %v160_v32, %v125_v28  ;;  %v3805_v21 = vpop.f32.mrf.mxu1 }
 0x288   :  { %1627 = vbcast.lane.b32.xlu1 %v1625_v34, 256  ;;  %2063 = vbcast.lane.b32.xlu0 %v2061_v38, 256  ;;  %v194_v62 = vrot.slane %v193_v44, 2  ;;  %v2354_v21 = vrot.slane %v4345_v51, %v4324_v23 }
 0x289   :  { %v199_v36 = vsel %vm32_vm1, %v177_v40, 0.0  ;;  %v186_v40 = vadd.f32 %v185_v20, %v184_v35  ;;  %v2482_v20 = vmul.f32 %v4216_v15, %v4345_v51  ;;  %v4496_v15 = vpop.f32.mrf.mxu1 }
 0x28a   :  { %v200_v46 = vadd.f32 %v199_v36, %v198_v24  ;;  %v167_v47 = vpop.permute.xlu1 %166  ;;  %v4443_v52 = vpop.permute.xlu0 %590  ;;  %v195_v28 = vadd.f32 %v194_v62, %v193_v44  ;;  %v2332_v44 = vrot.slane %v4345_v51, %v4312_v9 }
 0x28b   :  { %5987 = vst [vmem:[#allocation6_spill] sm:$0xff] %v4443_v52  ;;  %v178_v60 = vmul.f32 %v167_v47, %v126_v39  ;;  %v187_v39 = vrot.slane %v186_v40, 1 }
 0x28c   :  { %v201_v45 = vrot.slane %v200_v46, 4  ;;  %1631 = vbcast.lane.b32.xlu1 %v1625_v34, 264  ;;  %2067 = vbcast.lane.b32.xlu0 %v2061_v38, 264  ;;  %v2083_v34 = vrot.slane %v2046_v29, %v4331_v5 }
 0x28d   :  { %v207_v11 = vsel %vm32_vm1, %v178_v60, 0.0  ;;  %v188_v61 = vadd.f32 %v187_v39, %v186_v40 }
 0x28e   :  { %v202_v48 = vadd.f32 %v201_v45, %v200_v46  ;;  %v171_v14 = vpop.permute.xlu1 %170  ;;  %v4445_v16 = vpop.permute.xlu0 %601 }
 0x28f   :  { %5988 = vst [vmem:[#allocation7_spill] sm:$0xff] %v4445_v16  ;;  %v179_v50 = vmul.f32 %v171_v14, %v127_v58  ;;  %v2343_v58 = vrot.slane %v4345_v51, %v4315_v10 }
 0x290   :  { %v203_v22 = vrot.slane %v202_v48, 2  ;;  %1638 = vbcast.lane.b32.xlu1 %v4395_v37, 256  ;;  %2074 = vbcast.lane.b32.xlu0 %v4448_v17, 256  ;;  %v196_v37 = vrot.slane %v195_v28, 1 }
 0x291   :  { %v208_v26 = vsel %vm32_vm1, %v179_v50, 0.0 }
 0x292   :  { %v209_v30 = vadd.f32 %v208_v26, %v207_v11  ;;  %v4454_v31 = vpop.permute.xlu1 %312  ;;  %v4456_v32 = vpop.permute.xlu0 %612  ;;  %v204_v38 = vadd.f32 %v203_v22, %v202_v48  ;;  %v197_v29 = vadd.f32 %v196_v37, %v195_v28  ;;  %v2486_v28 = vrot.slane %v2482_v20, %v4312_v9 }
 0x293   :  { %5989 = vst [vmem:[#allocation8_spill] sm:$0xff] %v4456_v32 }
 0x294   :  { %v210_v8 = vrot.slane %v209_v30, 4  ;;  %1902 = vbcast.lane.b32.xlu1 %v4404_v42, 264  ;;  %2085 = vbcast.lane.b32.xlu0 %v2083_v34, 256  ;;  %v205_v47 = vrot.slane %v204_v38, 1 }
 0x296   :  { %v211_v24 = vadd.f32 %v210_v8, %v209_v30  ;;  %v4460_v36 = vpop.permute.xlu1 %323  ;;  %v4462_v46 = vpop.permute.xlu0 %623  ;;  %v206_v60 = vadd.f32 %v205_v47, %v204_v38  ;;  %v2497_v30 = vrot.slane %v2482_v20, %v4315_v10 }
 0x297   :  { %5990 = vst [vmem:[#allocation9_spill] sm:$0xff] %v4462_v46  ;;  %v3820_v38 = vpop.f32.mrf.mxu1 }
 0x298   :  { %v212_v53 = vrot.slane %v211_v24, 2  ;;  %1913 = vbcast.lane.b32.xlu1 %v4408_v49, 264  ;;  %2334 = vbcast.lane.b32.xlu0 %v2332_v44, 256  ;;  %v221_v49 = vsel %vm220_vm3, %v197_v29, %v188_v61  ;;  %v2779_v61 = vrot.slane %v4357_v1, %v4315_v10 }
 0x299   :  { %v223_v22 = vsel %vm222_vm4, %v206_v60, %v221_v49  ;;  %v3339_v40 = vpop.f32.mrf.mxu1  ;;  %v2790_v49 = vrot.slane %v4357_v1, %v4324_v23 }
 0x29a   :  { %v213_v35 = vadd.f32 %v212_v53, %v211_v24  ;;  %v4467_v45 = vpop.permute.xlu1 %334  ;;  %v4469_v42 = vpop.permute.xlu0 %755  ;;  %v2519_v53 = vrot.slane %v2482_v20, %v4331_v5 }
 0x29b   :  { %5991 = vst [vmem:[#allocation10_spill] sm:$0xff] %v4469_v42  ;;  %v3821_v24 = vpop.f32.mrf.mxu1 }
 0x29c   :  { %v214_v62 = vrot.slane %v213_v35, 1  ;;  %1924 = vbcast.lane.b32.xlu1 %v4414_v57, 264  ;;  %2345 = vbcast.lane.b32.xlu0 %v2343_v58, 256 }
 0x29e   :  { %v215_v48 = vadd.f32 %v214_v62, %v213_v35  ;;  %v4475_v14 = vpop.permute.xlu1 %345  ;;  %v4477_v50 = vpop.permute.xlu0 %766  ;;  %v2768_v35 = vrot.slane %v4357_v1, %v4312_v9 }
 0x29f   :  { %5992 = vst [vmem:[#allocation11_spill] sm:$0xff] %v4477_v50 }
 0x2a0   :  { %v225_v57 = vsel %vm224_vm5, %v215_v48, %v223_v22  ;;  %1935 = vbcast.lane.b32.xlu1 %v4420_v2, 264  ;;  %2356 = vbcast.lane.b32.xlu0 %v2354_v21, 256 }
 0x2a1   :  { %228 = vst.msk [vmem:[%s5945_s7] sm:$0xf] %vm227_vm6, %v225_v57 }
 0x2a2   :  { %v4490_v11 = vpop.permute.xlu1 %594  ;;  %v4492_v26 = vpop.permute.xlu0 %777 }
 0x2a3   :  { %5993 = vst [vmem:[#allocation12_spill] sm:$0xff] %v4490_v11  ;;  %5994 = vst [vmem:[#allocation13_spill] sm:$0xff] %v4492_v26 }
 0x2a4   :  { %2052 = vbcast.lane.b32.xlu1 %v4430_v4, 256  ;;  %2488 = vbcast.lane.b32.xlu0 %v2486_v28, 256  ;;  %v2508_v4 = vrot.slane %v2482_v20, %v4324_v23 }
 0x2a6   :  { %v4498_v51 = vpop.permute.xlu1 %605  ;;  %v4500_v2 = vpop.permute.xlu0 %1026 }
 0x2a7   :  { %5995 = vst [vmem:[#allocation14_spill] sm:$0xff] %v4498_v51  ;;  %5996 = vst [vmem:[#allocation15_spill] sm:$0xff] %v4500_v2 }
 0x2a8   :  { %2078 = vbcast.lane.b32.xlu1 %v4448_v17, 264  ;;  %2499 = vbcast.lane.b32.xlu0 %v2497_v30, 256 }
 0x2aa   :  { %v4504_v8 = vpop.permute.xlu1 %616  ;;  %v4506_v37 = vpop.permute.xlu0 %1037 }
 0x2ab   :  { %5997 = vst [vmem:[#allocation16_spill] sm:$0xff] %v4504_v8  ;;  %5998 = vst [vmem:[#allocation17_spill] sm:$0xff] %v4506_v37 }
 0x2ac   :  { %2089 = vbcast.lane.b32.xlu1 %v2083_v34, 264  ;;  %2510 = vbcast.lane.b32.xlu0 %v2508_v4, 256 }
 0x2ae   :  { %v4509_v47 = vpop.permute.xlu1 %627  ;;  %v4511_v39 = vpop.permute.xlu0 %1048 }
 0x2af   :  { %5999 = vst [vmem:[#allocation18_spill] sm:$0xff] %v4509_v47  ;;  %6000 = vst [vmem:[#allocation19_spill] sm:$0xff] %v4511_v39  ;;  %v3204_v39 = vrot.slane %v4366_v12, %v4312_v9 }
 0x2b0   :  { %2338 = vbcast.lane.b32.xlu1 %v2332_v44, 264  ;;  %2521 = vbcast.lane.b32.xlu0 %v2519_v53, 256 }
 0x2b2   :  { %v4514_v17 = vpop.permute.xlu1 %744  ;;  %v4516_v29 = vpop.permute.xlu0 %1059 }
 0x2b3   :  { %6001 = vst [vmem:[#allocation20_spill] sm:$0xff] %v4514_v17  ;;  %6002 = vst [vmem:[#allocation21_spill] sm:$0xff] %v4516_v29 }
 0x2b4   :  { %2349 = vbcast.lane.b32.xlu1 %v2343_v58, 264  ;;  %2770 = vbcast.lane.b32.xlu0 %v2768_v35, 256  ;;  %v2918_v58 = vmul.f32 %v4221_v19, %v4357_v1 }
 0x2b6   :  { %v4520_v60 = vpop.permute.xlu1 %748  ;;  %v4522_v34 = vpop.permute.xlu0 %1184  ;;  %v2922_v22 = vrot.slane %v2918_v58, %v4312_v9  ;;  %v2933_v38 = vrot.slane %v2918_v58, %v4315_v10  ;;  %v2944_v1 = vrot.slane %v2918_v58, %v4324_v23 }
 0x2b7   :  { %6003 = vst [vmem:[#allocation22_spill] sm:$0xff] %v4522_v34 }
 0x2b8   :  { %2360 = vbcast.lane.b32.xlu1 %v2354_v21, 264  ;;  %2781 = vbcast.lane.b32.xlu0 %v2779_v61, 256 }
 0x2ba   :  { %v4526_v44 = vpop.permute.xlu1 %759  ;;  %v4528_v62 = vpop.permute.xlu0 %1195 }
 0x2bb   :  { %6004 = vst [vmem:[#allocation23_spill] sm:$0xff] %v4528_v62 }
 0x2bc   :  { %2492 = vbcast.lane.b32.xlu1 %v2486_v28, 264  ;;  %2792 = vbcast.lane.b32.xlu0 %v2790_v49, 256  ;;  %v4552_v28 = vld [vmem:[%s5944_s6] ss:$0 sm:$0xff]  ;;  %s3950_s6 = smov 96  }
 0x2bd   :  { %v4561_v29 = vadd.f32 %v4552_v28, %v4287_v54  ;;  %v3215_v54 = vrot.slane %v4366_v12, %v4315_v10  ;;  %v4594_v2 = vadd.f32 %v4552_v28, %v4293_v59 }
 0x2be   :  { %v4534_v48 = vpop.permute.xlu1 %770  ;;  %v4536_v20 = vpop.permute.xlu0 %1206 }
 0x2bf   :  { %6005 = vst [vmem:[#allocation24_spill] sm:$0xff] %v4536_v20  ;;  %3868 = vtanh.f32 %v4561_v29 }
 0x2c0   :  { %2503 = vbcast.lane.b32.xlu1 %v2497_v30, 264  ;;  %2924 = vbcast.lane.b32.xlu0 %v2922_v22, 256  ;;  %3870 = vtanh.f32 %v4594_v2 }
 0x2c2   :  { %v4539_v21 = vpop.permute.xlu1 %781  ;;  %v4541_v57 = vpop.permute.xlu0 %1217 }
 0x2c3   :  { %6006 = vst [vmem:[#allocation25_spill] sm:$0xff] %v4541_v57 }
 0x2c4   :  { %2514 = vbcast.lane.b32.xlu1 %v2508_v4, 264  ;;  %2935 = vbcast.lane.b32.xlu0 %v2933_v38, 256  ;;  %v2955_v4 = vrot.slane %v2918_v58, %v4331_v5 }
 0x2c6   :  { %v4544_v40 = vpop.permute.xlu1 %1030  ;;  %v4546_v19 = vpop.permute.xlu0 %1462 }
 0x2c7   :  { %6007 = vst [vmem:[#allocation26_spill] sm:$0xff] %v4544_v40  ;;  %6008 = vst [vmem:[#allocation27_spill] sm:$0xff] %v4546_v19 }
 0x2c8   :  { %2525 = vbcast.lane.b32.xlu1 %v2519_v53, 264  ;;  %2946 = vbcast.lane.b32.xlu0 %v2944_v1, 256 }
 0x2ca   :  { %v4554_v30 = vpop.permute.xlu1 %1041  ;;  %v4556_v24 = vpop.permute.xlu0 %1477 }
 0x2cb   :  { %6009 = vst [vmem:[#allocation28_spill] sm:$0xff] %v4554_v30  ;;  %6010 = vst [vmem:[#allocation29_spill] sm:$0xff] %v4556_v24  ;;  %v3949_v24 = vmov 1966171168  }
 0x2cc   :  { %2774 = vbcast.lane.b32.xlu1 %v2768_v35, 264  ;;  %2957 = vbcast.lane.b32.xlu0 %v2955_v4, 256  ;;  %v349_v30 = vunpack.c.l.s4 %v3949_v24  ;;  %v3354_v24 = vmul.f32 %v4208_v6, %v4366_v12  ;;  %v3869_v40 = vpop.eup %3868 }
 0x2cd   :  { %v3871_v11 = vpop.eup %3870 }
 0x2ce   :  { %v4564_v53 = vpop.permute.xlu1 %1052  ;;  %v4566_v19 = vpop.permute.xlu0 %1488  ;;  %v350_v35 = vunpack.c.0.s8 %v349_v30  ;;  %v3358_v30 = vrot.slane %v3354_v24, %v4312_v9 }
 0x2cf   :  { %6011 = vst [vmem:[#allocation30_spill] sm:$0xff] %v4564_v53  ;;  %6012 = vst [vmem:[#allocation31_spill] sm:$0xff] %v4566_v19 }
 0x2d0   :  { %2785 = vbcast.lane.b32.xlu1 %v2779_v61, 264  ;;  %3206 = vbcast.lane.b32.xlu0 %v3204_v39, 256  ;;  %v3226_v61 = vrot.slane %v4366_v12, %v4324_v23 }
 0x2d2   :  { %v4570_v58 = vpop.permute.xlu1 %1063  ;;  %v4572_v37 = vpop.permute.xlu0 %1499 }
 0x2d3   :  { %6013 = vst [vmem:[#allocation32_spill] sm:$0xff] %v4570_v58  ;;  %6014 = vst [vmem:[#allocation33_spill] sm:$0xff] %v4572_v37  ;;  %v4585_v37 = vsub.s32 %v350_v35, %v4309_v7 }
 0x2d4   :  { %2796 = vbcast.lane.b32.xlu1 %v2790_v49, 264  ;;  %3217 = vbcast.lane.b32.xlu0 %v3215_v54, 256 }
 0x2d5   :  { %v423_v6 = vrot.slane %v3869_v40, %v4585_v37 }
 0x2d6   :  { %v4576_v53 = vpop.permute.xlu1 %1180  ;;  %v4578_v19 = vpop.permute.xlu0 %1616 }
 0x2d7   :  { %6015 = vst [vmem:[#allocation34_spill] sm:$0xff] %v4578_v19  ;;  %v431_v35 = vrot.slane %v423_v6, %v4585_v37  ;;  %v424_v47 = vcombine.high %v423_v6, %v423_v6 }
 0x2d8   :  { %2928 = vbcast.lane.b32.xlu1 %v2922_v22, 264  ;;  %3228 = vbcast.lane.b32.xlu0 %v3226_v61, 256  ;;  %v3369_v22 = vrot.slane %v3354_v24, %v4315_v10 }
 0x2d9   :  { %v444_v40 = vrot.slane %v431_v35, %v4312_v9  ;;  %v438_v8 = vrot.slane %v424_v47, %v4585_v37  ;;  %v439_v6 = vcombine.high %v431_v35, %v431_v35  ;;  %v4624_v47 = vadd.f32 %v4552_v28, %v4328_v27 }
 0x2da   :  { %v4587_v58 = vpop.permute.xlu1 %1191  ;;  %v4589_v49 = vpop.permute.xlu0 %1642  ;;  %v859_v35 = vrot.slane %v3871_v11, %v4585_v37 }
 0x2db   :  { %v461_v51 = vmul.f32 %v444_v40, %v4411_v55  ;;  %v448_v16 = vrot.slane %v438_v8, %v4312_v9  ;;  %3872 = vtanh.f32 %v4624_v47 }
 0x2dc   :  { %2939 = vbcast.lane.b32.xlu1 %v2933_v38, 264  ;;  %3360 = vbcast.lane.b32.xlu0 %v3358_v30, 256  ;;  %v3380_v38 = vrot.slane %v3354_v24, %v4324_v23  ;;  %v867_v11 = vrot.slane %v859_v35, %v4585_v37 }
 0x2de   :  { %v4598_v12 = vpop.permute.xlu1 %1202  ;;  %v4600_v7 = vpop.permute.xlu0 %1649 }
 0x2df   :  { %6016 = vst [vmem:[#allocation35_spill] sm:$0xff] %v4598_v12  ;;  %6017 = vst [vmem:[#allocation36_spill] sm:$0xff] %v4600_v7 }
 0x2e0   :  { %2950 = vbcast.lane.b32.xlu1 %v2944_v1, 264  ;;  %3371 = vbcast.lane.b32.xlu0 %v3369_v22, 256  ;;  %v3391_v1 = vrot.slane %v3354_v24, %v4331_v5  ;;  %v4628_v5 = vrot.slane %v439_v6, %v4312_v9  ;;  %v440_v24 = vcombine.high %v438_v8, %v438_v8 }
 0x2e2   :  { %v4604_v46 = vpop.permute.xlu1 %1213  ;;  %v4606_v59 = vpop.permute.xlu0 %1653  ;;  %v465_v27 = vmul.f32 %v4628_v5, %v4427_v25 }
 0x2e3   :  { %6018 = vst [vmem:[#allocation37_spill] sm:$0xff] %v4604_v46  ;;  %6019 = vst [vmem:[#allocation38_spill] sm:$0xff] %v4606_v59 }
 0x2e4   :  { %2961 = vbcast.lane.b32.xlu1 %v2955_v4, 264  ;;  %3382 = vbcast.lane.b32.xlu0 %v3380_v38, 256 }
 0x2e6   :  { %v4611_v32 = vpop.permute.xlu1 %1466  ;;  %v4613_v10 = vpop.permute.xlu0 %1898 }
 0x2e7   :  { %6020 = vst [vmem:[#allocation39_spill] sm:$0xff] %v4611_v32  ;;  %6021 = vst [vmem:[#allocation40_spill] sm:$0xff] %v4613_v10 }
 0x2e8   :  { %3210 = vbcast.lane.b32.xlu1 %v3204_v39, 264  ;;  %3393 = vbcast.lane.b32.xlu0 %v3391_v1, 256  ;;  %v463_v39 = vmul.f32 %v448_v16, %v4417_v63 }
 0x2ea   :  { %v4618_v23 = vpop.permute.xlu1 %1473  ;;  %v4620_v4 = vpop.permute.xlu0 %1909 }
 0x2eb   :  { %6022 = vst [vmem:[#allocation41_spill] sm:$0xff] %v4618_v23  ;;  %6023 = vst [vmem:[#allocation42_spill] sm:$0xff] %v4620_v4  ;;  %v4671_v23 = vadd.f32 %v4552_v28, %v4441_v43 }
 0x2ec   :  { %3221 = vbcast.lane.b32.xlu1 %v3215_v54, 264  ;;  %477 = vrot.lane.b32.xlu0 %v461_v51, %s3950_s6  ;;  %v4641_v51 = vrot.slane %v440_v24, %v4312_v9  ;;  %v860_v54 = vcombine.high %v859_v35, %v859_v35 }
 0x2ee   :  { %v4633_v4 = vpop.permute.xlu1 %1484  ;;  %v4635_v10 = vpop.permute.xlu0 %1920 }
 0x2ef   :  { %6024 = vst [vmem:[#allocation43_spill] sm:$0xff] %v4633_v4  ;;  %6025 = vst [vmem:[#allocation44_spill] sm:$0xff] %v4635_v10  ;;  %v4653_v10 = vrot.slane %v867_v11, %v4312_v9 }
 0x2f0   :  { %3232 = vbcast.lane.b32.xlu1 %v3226_v61, 264  ;;  %481 = vrot.lane.b32.xlu0 %v463_v39, %s3950_s6  ;;  %v467_v61 = vmul.f32 %v4641_v51, %v4434_v33  ;;  %v874_v39 = vrot.slane %v860_v54, %v4585_v37 }
 0x2f2   :  { %v4643_v6 = vpop.permute.xlu1 %1495  ;;  %v4645_v8 = vpop.permute.xlu0 %1931  ;;  %v4661_v35 = vrot.slane %v874_v39, %v4312_v9 }
 0x2f3   :  { %6026 = vst [vmem:[#allocation45_spill] sm:$0xff] %v4643_v6  ;;  %6027 = vst [vmem:[#allocation46_spill] sm:$0xff] %v4645_v8  ;;  %v3873_v6 = vpop.eup %3872 }
 0x2f4   :  { %3364 = vbcast.lane.b32.xlu1 %v3358_v30, 264  ;;  %485 = vrot.lane.b32.xlu0 %v465_v27, %s3950_s6  ;;  %v875_v30 = vcombine.high %v867_v11, %v867_v11  ;;  %v897_v27 = vmul.f32 %v4653_v10, %v4514_v17  ;;  %v876_v11 = vcombine.high %v874_v39, %v874_v39 }
 0x2f5   :  { %v1295_v52 = vrot.slane %v3873_v6, %v4585_v37  ;;  %v462_v39 = vmul.f32 %v444_v40, %v4454_v31 }
 0x2f6   :  { %v4655_v24 = vpop.permute.xlu1 %1620  ;;  %v4657_v4 = vpop.permute.xlu0 %2056  ;;  %v4681_v32 = vrot.slane %v875_v30, %v4312_v9 }
 0x2f7   :  { %6028 = vst [vmem:[#allocation47_spill] sm:$0xff] %v4655_v24  ;;  %6029 = vst [vmem:[#allocation48_spill] sm:$0xff] %v4657_v4  ;;  %v1296_v6 = vcombine.high %v1295_v52, %v1295_v52 }
 0x2f8   :  { %3375 = vbcast.lane.b32.xlu1 %v3369_v22, 264  ;;  %489 = vrot.lane.b32.xlu0 %v467_v61, %s3950_s6  ;;  %v4675_v22 = vadd.f32 %v4552_v28, %v4352_v56  ;;  %v899_v61 = vmul.f32 %v4661_v35, %v4469_v42  ;;  %v3638_v56 = vmul.f32 -1.442695, %v4671_v23  ;;  %v901_v30 = vmul.f32 %v4681_v32, %v4477_v50 }
 0x2fa   :  { %v4665_v8 = vpop.permute.xlu1 %1627  ;;  %v4667_v54 = vpop.permute.xlu0 %2063  ;;  %3874 = vtanh.f32 %v4675_v22 }
 0x2fb   :  { %6030 = vst [vmem:[#allocation49_spill] sm:$0xff] %v4665_v8  ;;  %6031 = vst [vmem:[#allocation50_spill] sm:$0xff] %v4667_v54  ;;  %3876 = vpow2.f32 %v3638_v56 }
 0x2fc   :  { %3386 = vbcast.lane.b32.xlu1 %v3380_v38, 264  ;;  %913 = vrot.lane.b32.xlu0 %v897_v27, %s3950_s6  ;;  %v4692_v38 = vrot.slane %v876_v11, %v4312_v9  ;;  %v1303_v27 = vrot.slane %v1295_v52, %v4585_v37 }
 0x2fe   :  { %v4685_v43 = vpop.permute.xlu1 %1631  ;;  %v4687_v17 = vpop.permute.xlu0 %2067  ;;  %v903_v40 = vmul.f32 %v4692_v38, %v4492_v26  ;;  %v4708_v11 = vrot.slane %v1303_v27, %v4312_v9  ;;  %v1311_v56 = vcombine.high %v1303_v27, %v1303_v27 }
 0x2ff   :  { %6032 = vst [vmem:[#allocation51_spill] sm:$0xff] %v4685_v43  ;;  %6033 = vst [vmem:[#allocation52_spill] sm:$0xff] %v4687_v17 }
 0x300   :  { %3397 = vbcast.lane.b32.xlu1 %v3391_v1, 264  ;;  %917 = vrot.lane.b32.xlu0 %v899_v61, %s3950_s6  ;;  %v464_v1 = vmul.f32 %v448_v16, %v4460_v36  ;;  %v1310_v61 = vrot.slane %v1296_v6, %v4585_v37  ;;  %v466_v16 = vmul.f32 %v4628_v5, %v4467_v45 }
 0x301   :  { %v4731_v27 = vrot.slane %v1311_v56, %v4312_v9  ;;  %v468_v5 = vmul.f32 %v4641_v51, %v4475_v14  ;;  %v898_v51 = vmul.f32 %v4653_v10, %v4520_v60  ;;  %v900_v10 = vmul.f32 %v4661_v35, %v4526_v44 }
 0x302   :  { %v4698_v42 = vpop.permute.xlu1 %1638  ;;  %v4700_v13 = vpop.permute.xlu0 %2074  ;;  %v902_v35 = vmul.f32 %v4681_v32, %v4534_v48 }
 0x303   :  { %6034 = vst [vmem:[#allocation53_spill] sm:$0xff] %v4698_v42  ;;  %6035 = vst [vmem:[#allocation54_spill] sm:$0xff] %v4700_v13 }
 0x304   :  { %479 = vrot.lane.b32.xlu1 %v462_v39, %s3950_s6  ;;  %921 = vrot.lane.b32.xlu0 %v901_v30, %s3950_s6  ;;  %v1334_v39 = vmul.f32 %v4708_v11, %v4522_v34  ;;  %v4722_v30 = vrot.slane %v1310_v61, %v4312_v9 }
 0x306   :  { %v4711_v52 = vpop.permute.xlu1 %1902  ;;  %v4713_v50 = vpop.permute.xlu0 %2085 }
 0x307   :  { %6036 = vst [vmem:[#allocation55_spill] sm:$0xff] %v4711_v52  ;;  %6037 = vst [vmem:[#allocation56_spill] sm:$0xff] %v4713_v50  ;;  %v3875_v52 = vpop.eup %3874 }
 0x308   :  { %483 = vrot.lane.b32.xlu1 %v464_v1, %s3950_s6  ;;  %925 = vrot.lane.b32.xlu0 %v903_v40, %s3950_s6  ;;  %v1312_v1 = vcombine.high %v1310_v61, %v1310_v61  ;;  %v1336_v40 = vmul.f32 %v4722_v30, %v4528_v62 }
 0x30a   :  { %v4724_v26 = vpop.permute.xlu1 %1913  ;;  %v4726_v6 = vpop.permute.xlu0 %2334  ;;  %v4754_v61 = vrot.slane %v1312_v1, %v4312_v9 }
 0x30b   :  { %6038 = vst [vmem:[#allocation57_spill] sm:$0xff] %v4724_v26  ;;  %6039 = vst [vmem:[#allocation58_spill] sm:$0xff] %v4726_v6  ;;  %v4739_v26 = vadd.f32 %v4552_v28, %v4379_v18  ;;  %v1731_v6 = vrot.slane %v3875_v52, %v4585_v37  ;;  %v1338_v18 = vmul.f32 %v4731_v27, %v4536_v20 }
 0x30c   :  { %487 = vrot.lane.b32.xlu1 %v466_v16, %s3950_s6  ;;  %1351 = vrot.lane.b32.xlu0 %v1334_v39, %s3950_s6  ;;  %v3877_v39 = vpop.eup %3876 }
 0x30d   :  { %3878 = vtanh.f32 %v4739_v26  ;;  %v1739_v52 = vrot.slane %v1731_v6, %v4585_v37  ;;  %v1732_v62 = vcombine.high %v1731_v6, %v1731_v6  ;;  %v4776_v6 = vadd.f32 %v4552_v28, %v4496_v15 }
 0x30e   :  { %v4742_v34 = vpop.permute.xlu1 %1924  ;;  %v4744_v16 = vpop.permute.xlu0 %2345 }
 0x30f   :  { %6040 = vst [vmem:[#allocation59_spill] sm:$0xff] %v4742_v34  ;;  %6041 = vst [vmem:[#allocation60_spill] sm:$0xff] %v4744_v16  ;;  %v2909_v34 = vadd.f32 1.0, %v3877_v39  ;;  %v4768_v1 = vrot.slane %v1739_v52, %v4312_v9  ;;  %v1746_v39 = vrot.slane %v1732_v62, %v4585_v37  ;;  %v3645_v15 = vmul.f32 -1.442695, %v4776_v6 }
 0x310   :  { %491 = vrot.lane.b32.xlu1 %v468_v5, %s3950_s6  ;;  %1355 = vrot.lane.b32.xlu0 %v1336_v40, %s3950_s6  ;;  %v1340_v5 = vmul.f32 %v4754_v61, %v4541_v57  ;;  %v1747_v62 = vcombine.high %v1739_v52, %v1739_v52 }
 0x311   :  { %3880 = vrcp.f32 %v2909_v34 }
 0x312   :  { %v4757_v56 = vpop.permute.xlu1 %1935  ;;  %v4759_v16 = vpop.permute.xlu0 %2356 }
 0x313   :  { %6042 = vst [vmem:[#allocation61_spill] sm:$0xff] %v4757_v56  ;;  %6043 = vst [vmem:[#allocation62_spill] sm:$0xff] %v4759_v16 }
 0x314   :  { %915 = vrot.lane.b32.xlu1 %v898_v51, %s3950_s6  ;;  %1359 = vrot.lane.b32.xlu0 %v1338_v18, %s3950_s6  ;;  %v1769_v51 = vmul.f32 %v4768_v1, %v4578_v19  ;;  %v4786_v18 = vrot.slane %v1746_v39, %v4312_v9  ;;  %v1748_v19 = vcombine.high %v1746_v39, %v1746_v39 }
 0x316   :  { %v4770_v40 = vpop.permute.xlu1 %2052  ;;  %v4772_v56 = vpop.permute.xlu0 %2488  ;;  %v1771_v57 = vmul.f32 %v4786_v18, %v4665_v8  ;;  %v4818_v39 = vrot.slane %v1748_v19, %v4312_v9  ;;  %v1335_v19 = vmul.f32 %v4722_v30, %v4587_v58  ;;  %v1337_v30 = vmul.f32 %v4731_v27, %v4598_v12 }
 0x317   :  { %6044 = vst [vmem:[#allocation63_spill] sm:$0xff] %v4770_v40  ;;  %6045 = vst [vmem:[#allocation64_spill] sm:$0xff] %v4772_v56  ;;  %v3617_v27 = vmul.f32 -1.442695, %v4675_v22 }
 0x318   :  { %919 = vrot.lane.b32.xlu1 %v900_v10, %s3950_s6  ;;  %1363 = vrot.lane.b32.xlu0 %v1340_v5, %s3950_s6  ;;  %v4795_v10 = vadd.f32 %v4552_v28, %v4401_v41  ;;  %v904_v5 = vmul.f32 %v4692_v38, %v4539_v21  ;;  %v3596_v41 = vmul.f32 -1.442695, %v4561_v29  ;;  %v4810_v28 = vrot.slane %v1747_v62, %v4312_v9 }
 0x319   :  { %v1333_v38 = vmul.f32 %v4708_v11, %v4576_v53  ;;  %v1775_v11 = vmul.f32 %v4818_v39, %v4600_v7 }
 0x31a   :  { %v4788_v34 = vpop.permute.xlu1 %2078  ;;  %v4790_v16 = vpop.permute.xlu0 %2499  ;;  %3882 = vtanh.f32 %v4795_v10 }
 0x31b   :  { %6046 = vst [vmem:[#allocation65_spill] sm:$0xff] %v4788_v34  ;;  %6047 = vst [vmem:[#allocation66_spill] sm:$0xff] %v4790_v16  ;;  %v3879_v32 = vpop.eup %3878  ;;  %3884 = vpow2.f32 %v3645_v15  ;;  %v1773_v15 = vmul.f32 %v4810_v28, %v4698_v42 }
 0x31c   :  { %923 = vrot.lane.b32.xlu1 %v902_v35, %s3950_s6  ;;  %1785 = vrot.lane.b32.xlu0 %v1769_v51, %s3950_s6  ;;  %v2167_v35 = vrot.slane %v3879_v32, %v4585_v37  ;;  %3886 = vpow2.f32 %v3596_v41 }
 0x31e   :  { %v4804_v20 = vpop.permute.xlu1 %2089  ;;  %v4806_v52 = vpop.permute.xlu0 %2510  ;;  %v2168_v51 = vcombine.high %v2167_v35, %v2167_v35  ;;  %v2175_v32 = vrot.slane %v2167_v35, %v4585_v37 }
 0x31f   :  { %6048 = vst [vmem:[#allocation67_spill] sm:$0xff] %v4804_v20  ;;  %6049 = vst [vmem:[#allocation68_spill] sm:$0xff] %v4806_v52  ;;  %v3881_v8 = vpop.eup %3880 }
 0x320   :  { %927 = vrot.lane.b32.xlu1 %v904_v5, %s3950_s6  ;;  %1789 = vrot.lane.b32.xlu0 %v1771_v57, %s3950_s6  ;;  %v3603_v57 = vmul.f32 -1.442695, %v4594_v2  ;;  %v2182_v5 = vrot.slane %v2168_v51, %v4585_v37  ;;  %v2970_v41 = vrot.slane %v3881_v8, %v4585_v37  ;;  %v4841_v35 = vrot.slane %v2175_v32, %v4312_v9 }
 0x321   :  { %v2183_v2 = vcombine.high %v2175_v32, %v2175_v32  ;;  %v3610_v32 = vmul.f32 -1.442695, %v4624_v47 }
 0x322   :  { %v4822_v29 = vpop.permute.xlu1 %2338  ;;  %v4824_v62 = vpop.permute.xlu0 %2521  ;;  %3888 = vpow2.f32 %v3603_v57  ;;  %v2205_v51 = vmul.f32 %v4841_v35, %v4770_v40  ;;  %v2184_v40 = vcombine.high %v2182_v5, %v2182_v5 }
 0x323   :  { %6050 = vst [vmem:[#allocation69_spill] sm:$0xff] %v4822_v29  ;;  %6051 = vst [vmem:[#allocation70_spill] sm:$0xff] %v4824_v62  ;;  %v4862_v57 = vrot.slane %v2183_v2, %v4312_v9  ;;  %3890 = vtanh.f32 %v4671_v23 }
 0x324   :  { %1349 = vrot.lane.b32.xlu1 %v1333_v38, %s3950_s6  ;;  %1793 = vrot.lane.b32.xlu0 %v1773_v15, %s3950_s6  ;;  %v4848_v38 = vrot.slane %v2182_v5, %v4312_v9  ;;  %3892 = vpow2.f32 %v3610_v32  ;;  %v4881_v23 = vrot.slane %v2184_v40, %v4312_v9 }
 0x325   :  { %3894 = vpow2.f32 %v3617_v27  ;;  %v2209_v2 = vmul.f32 %v4862_v57, %v4700_v13  ;;  %v3624_v27 = vmul.f32 -1.442695, %v4739_v26  ;;  %v1772_v13 = vmul.f32 %v4786_v18, %v4685_v43 }
 0x326   :  { %v4835_v29 = vpop.permute.xlu1 %2349  ;;  %v4837_v42 = vpop.permute.xlu0 %2770 }
 0x327   :  { %6052 = vst [vmem:[#allocation71_spill] sm:$0xff] %v4835_v29  ;;  %6053 = vst [vmem:[#allocation72_spill] sm:$0xff] %v4837_v42  ;;  %v3883_v42 = vpop.eup %3882  ;;  %v2971_v29 = vcombine.high %v2970_v41, %v2970_v41 }
 0x328   :  { %1353 = vrot.lane.b32.xlu1 %v1335_v19, %s3950_s6  ;;  %1797 = vrot.lane.b32.xlu0 %v1775_v11, %s3950_s6  ;;  %v2978_v19 = vrot.slane %v2970_v41, %v4585_v37  ;;  %v3885_v11 = vpop.eup %3884  ;;  %v2603_v47 = vrot.slane %v3883_v42, %v4585_v37  ;;  %v1770_v42 = vmul.f32 %v4768_v1, %v4655_v24 }
 0x329   :  { %v2985_v5 = vrot.slane %v2971_v29, %v4585_v37 }
 0x32a   :  { %v4852_v15 = vpop.permute.xlu1 %2360  ;;  %v4854_v8 = vpop.permute.xlu0 %2781  ;;  %v4875_v22 = vrot.slane %v2978_v19, %v4312_v9 }
 0x32b   :  { %6054 = vst [vmem:[#allocation73_spill] sm:$0xff] %v4852_v15  ;;  %6055 = vst [vmem:[#allocation74_spill] sm:$0xff] %v4854_v8  ;;  %v1339_v8 = vmul.f32 %v4754_v61, %v4604_v46  ;;  %v2207_v15 = vmul.f32 %v4848_v38, %v4667_v54  ;;  %v3887_v61 = vpop.eup %3886  ;;  %v4897_v40 = vrot.slane %v2985_v5, %v4312_v9 }
 0x32c   :  { %1357 = vrot.lane.b32.xlu1 %v1337_v30, %s3950_s6  ;;  %2221 = vrot.lane.b32.xlu0 %v2205_v51, %s3950_s6  ;;  %v3345_v51 = vadd.f32 1.0, %v3885_v11  ;;  %v2611_v11 = vrot.slane %v2603_v47, %v4585_v37  ;;  %v293_v1 = vadd.f32 1.0, %v3887_v61  ;;  %v2987_v18 = vcombine.high %v2985_v5, %v2985_v5 }
 0x32e   :  { %v4870_v41 = vpop.permute.xlu1 %2492  ;;  %v4872_v30 = vpop.permute.xlu0 %2792  ;;  %3896 = vrcp.f32 %v3345_v51  ;;  %v2211_v51 = vmul.f32 %v4881_v23, %v4713_v50 }
 0x32f   :  { %6056 = vst [vmem:[#allocation75_spill] sm:$0xff] %v4870_v41  ;;  %6057 = vst [vmem:[#allocation76_spill] sm:$0xff] %v4872_v30  ;;  %v2604_v30 = vcombine.high %v2603_v47, %v2603_v47  ;;  %v3889_v47 = vpop.eup %3888  ;;  %3898 = vrcp.f32 %v293_v1 }
 0x330   :  { %1361 = vrot.lane.b32.xlu1 %v1339_v8, %s3950_s6  ;;  %2225 = vrot.lane.b32.xlu0 %v2207_v15, %s3950_s6  ;;  %v2986_v8 = vcombine.high %v2978_v19, %v2978_v19  ;;  %3900 = vpow2.f32 %v3624_v27  ;;  %v3891_v1 = vpop.eup %3890  ;;  %v4939_v27 = vrot.slane %v2987_v18, %v4312_v9 }
 0x331   :  { %v2618_v54 = vrot.slane %v2604_v30, %v4585_v37  ;;  %v1774_v30 = vmul.f32 %v4810_v28, %v4589_v49  ;;  %v3893_v28 = vpop.eup %3892  ;;  %v3039_v18 = vrot.slane %v3891_v1, %v4585_v37  ;;  %v2206_v1 = vmul.f32 %v4841_v35, %v4657_v4 }
 0x332   :  { %v4888_v29 = vpop.permute.xlu1 %2503  ;;  %v4890_v32 = vpop.permute.xlu0 %2924  ;;  %v4919_v26 = vrot.slane %v2986_v8, %v4312_v9 }
 0x333   :  { %6058 = vst [vmem:[#allocation77_spill] sm:$0xff] %v4888_v29  ;;  %v4894_v15 = vmul.f32 %v4875_v22, %v4890_v32  ;;  %v4928_v43 = vrot.slane %v2618_v54, %v4312_v9 }
 0x334   :  { %1787 = vrot.lane.b32.xlu1 %v1770_v42, %s3950_s6  ;;  %2229 = vrot.lane.b32.xlu0 %v2209_v2, %s3950_s6  ;;  %v729_v2 = vadd.f32 1.0, %v3889_v47  ;;  %v2620_v47 = vcombine.high %v2618_v54, %v2618_v54 }
 0x335   :  { %6059 = vst [vmem:[#allocation78_spill] sm:$0xff] %v4894_v15  ;;  %v4907_v15 = vrot.slane %v2611_v11, %v4312_v9  ;;  %v2643_v24 = vmul.f32 %v4928_v43, %v4790_v16  ;;  %v3047_v16 = vrot.slane %v3039_v18, %v4585_v37 }
 0x336   :  { %v4910_v19 = vpop.permute.xlu1 %2514  ;;  %v4912_v61 = vpop.permute.xlu0 %2935  ;;  %3902 = vrcp.f32 %v729_v2  ;;  %v1165_v2 = vadd.f32 1.0, %v3893_v28 }
 0x337   :  { %6060 = vst [vmem:[#allocation79_spill] sm:$0xff] %v4910_v19  ;;  %v4916_v42 = vmul.f32 %v4897_v40, %v4912_v61  ;;  %v2641_v50 = vmul.f32 %v4907_v15, %v4772_v56  ;;  %v1776_v56 = vmul.f32 %v4818_v39, %v4606_v59 }
 0x338   :  { %1791 = vrot.lane.b32.xlu1 %v1772_v13, %s3950_s6  ;;  %2233 = vrot.lane.b32.xlu0 %v2211_v51, %s3950_s6  ;;  %v3895_v51 = vpop.eup %3894 }
 0x339   :  { %6061 = vst [vmem:[#allocation80_spill] sm:$0xff] %v4916_v42  ;;  %v2619_v42 = vcombine.high %v2611_v11, %v2611_v11  ;;  %v3631_v11 = vmul.f32 -1.442695, %v4795_v10  ;;  %v1601_v39 = vadd.f32 1.0, %v3895_v51  ;;  %v4982_v51 = vrot.slane %v3047_v16, %v4312_v9 }
 0x33a   :  { %v4930_v8 = vpop.permute.xlu1 %2525  ;;  %v4932_v5 = vpop.permute.xlu0 %2946 }
 0x33b   :  { %6062 = vst [vmem:[#allocation81_spill] sm:$0xff] %v4930_v8  ;;  %v4936_v13 = vmul.f32 %v4919_v26, %v4932_v5  ;;  %v3897_v54 = vpop.eup %3896  ;;  %3904 = vpow2.f32 %v3631_v11  ;;  %v2208_v11 = vmul.f32 %v4848_v38, %v4687_v17 }
 0x33c   :  { %1795 = vrot.lane.b32.xlu1 %v1774_v30, %s3950_s6  ;;  %2657 = vrot.lane.b32.xlu0 %v2641_v50, %s3950_s6  ;;  %3906 = vrcp.f32 %v1165_v2 }
 0x33d   :  { %6063 = vst [vmem:[#allocation82_spill] sm:$0xff] %v4936_v13  ;;  %v4949_v13 = vrot.slane %v2619_v42, %v4312_v9  ;;  %v4963_v42 = vrot.slane %v2620_v47, %v4312_v9  ;;  %3908 = vrcp.f32 %v1601_v39 }
 0x33e   :  { %v4952_v30 = vpop.permute.xlu1 %2774  ;;  %v4954_v50 = vpop.permute.xlu0 %2957  ;;  %3910 = vtanh.f32 %v4776_v6 }
 0x33f   :  { %6064 = vst [vmem:[#allocation83_spill] sm:$0xff] %v4952_v30  ;;  %v4958_v10 = vmul.f32 %v4939_v27, %v4954_v50  ;;  %v2645_v30 = vmul.f32 %v4949_v13, %v4806_v52  ;;  %v2647_v47 = vmul.f32 %v4963_v42, %v4824_v62  ;;  %v2642_v52 = vmul.f32 %v4907_v15, %v4870_v41 }
 0x340   :  { %1799 = vrot.lane.b32.xlu1 %v1776_v56, %s3950_s6  ;;  %2661 = vrot.lane.b32.xlu0 %v2643_v24, %s3950_s6  ;;  %v3406_v24 = vrot.slane %v3897_v54, %v4585_v37  ;;  %v3899_v56 = vpop.eup %3898 }
 0x341   :  { %6065 = vst [vmem:[#allocation84_spill] sm:$0xff] %v4958_v10  ;;  %v3040_v10 = vcombine.high %v3039_v18, %v3039_v18  ;;  %v3901_v35 = vpop.eup %3900  ;;  %v354_v38 = vrot.slane %v3899_v56, %v4585_v37 }
 0x342   :  { %v4970_v59 = vpop.permute.xlu1 %2785  ;;  %v4972_v28 = vpop.permute.xlu0 %3206  ;;  %v2037_v39 = vadd.f32 1.0, %v3901_v35 }
 0x343   :  { %6066 = vst [vmem:[#allocation85_spill] sm:$0xff] %v4970_v59  ;;  %6067 = vst [vmem:[#allocation86_spill] sm:$0xff] %v4972_v28  ;;  %v3054_v18 = vrot.slane %v3040_v10, %v4585_v37  ;;  %v3903_v28 = vpop.eup %3902  ;;  %v2210_v10 = vmul.f32 %v4862_v57, %v4788_v34  ;;  %v355_v35 = vcombine.high %v354_v38, %v354_v38 }
 0x344   :  { %2223 = vrot.lane.b32.xlu1 %v2206_v1, %s3950_s6  ;;  %2665 = vrot.lane.b32.xlu0 %v2645_v30, %s3950_s6  ;;  %v3414_v30 = vrot.slane %v3406_v24, %v4585_v37  ;;  %v3407_v1 = vcombine.high %v3406_v24, %v3406_v24  ;;  %v3055_v24 = vcombine.high %v3047_v16, %v3047_v16  ;;  %3912 = vrcp.f32 %v2037_v39 }
 0x345   :  { %v362_v16 = vrot.slane %v354_v38, %v4585_v37  ;;  %v369_v38 = vrot.slane %v355_v35, %v4585_v37 }
 0x346   :  { %v4985_v54 = vpop.permute.xlu1 %2796  ;;  %v4987_v2 = vpop.permute.xlu0 %3217  ;;  %v5010_v6 = vrot.slane %v3414_v30, %v4312_v9  ;;  %v3421_v57 = vrot.slane %v3407_v1, %v4585_v37  ;;  %v3056_v1 = vcombine.high %v3054_v18, %v3054_v18 }
 0x347   :  { %6068 = vst [vmem:[#allocation87_spill] sm:$0xff] %v4985_v54  ;;  %6069 = vst [vmem:[#allocation88_spill] sm:$0xff] %v4987_v2  ;;  %v3077_v54 = vmul.f32 %v4982_v51, %v4890_v32  ;;  %v4999_v2 = vrot.slane %v3054_v18, %v4312_v9  ;;  %v790_v32 = vrot.slane %v3903_v28, %v4585_v37 }
 0x348   :  { %2227 = vrot.lane.b32.xlu1 %v2208_v11, %s3950_s6  ;;  %2669 = vrot.lane.b32.xlu0 %v2647_v47, %s3950_s6  ;;  %v3905_v47 = vpop.eup %3904  ;;  %v5043_v39 = vrot.slane %v362_v16, %v4312_v9  ;;  %v5053_v35 = vrot.slane %v3056_v1, %v4312_v9  ;;  %v370_v1 = vcombine.high %v362_v16, %v362_v16 }
 0x349   :  { %v3907_v18 = vpop.eup %3906  ;;  %v2644_v16 = vmul.f32 %v4928_v43, %v4888_v29 }
 0x34a   :  { %v5001_v59 = vpop.permute.xlu1 %2928  ;;  %v5003_v11 = vpop.permute.xlu0 %3228 }
 0x34b   :  { %6070 = vst [vmem:[#allocation89_spill] sm:$0xff] %v5003_v11  ;;  %v5007_v56 = vmul.f32 %v4875_v22, %v5001_v59  ;;  %v2212_v22 = vmul.f32 %v4881_v23, %v4804_v20  ;;  %v3079_v11 = vmul.f32 %v4999_v2, %v4912_v61  ;;  %v5037_v23 = vrot.slane %v3421_v57, %v4312_v9 }
 0x34c   :  { %2231 = vrot.lane.b32.xlu1 %v2210_v10, %s3950_s6  ;;  %3093 = vrot.lane.b32.xlu0 %v3077_v54, %s3950_s6  ;;  %v3422_v61 = vcombine.high %v3414_v30, %v3414_v30 }
 0x34d   :  { %6071 = vst [vmem:[#allocation90_spill] sm:$0xff] %v5007_v56  ;;  %v5022_v56 = vrot.slane %v3055_v24, %v4312_v9  ;;  %v5046_v24 = vrot.slane %v790_v32, %v4585_v37 }
 0x34e   :  { %v5024_v62 = vpop.permute.xlu1 %2939  ;;  %v5026_v10 = vpop.permute.xlu0 %3360  ;;  %v5068_v15 = vrot.slane %v3422_v61, %v4312_v9 }
 0x34f   :  { %v5030_v54 = vmul.f32 %v4897_v40, %v5024_v62  ;;  %v5034_v28 = vmul.f32 %v5010_v6, %v5026_v10  ;;  %v791_v40 = vcombine.high %v790_v32, %v790_v32  ;;  %v3081_v30 = vmul.f32 %v5022_v56, %v4932_v5 }
 0x350   :  { %2235 = vrot.lane.b32.xlu1 %v2212_v22, %s3950_s6  ;;  %3097 = vrot.lane.b32.xlu0 %v3079_v11, %s3950_s6  ;;  %v5071_v5 = vrot.slane %v369_v38, %v4312_v9 }
 0x351   :  { %6072 = vst [vmem:[#allocation91_spill] sm:$0xff] %v5030_v54  ;;  %6073 = vst [vmem:[#allocation92_spill] sm:$0xff] %v5034_v28  ;;  %v3909_v54 = vpop.eup %3908  ;;  %v2473_v28 = vadd.f32 1.0, %v3905_v47  ;;  %v3423_v47 = vcombine.high %v3421_v57, %v3421_v57  ;;  %v805_v41 = vrot.slane %v791_v40, %v4585_v37  ;;  %v1226_v57 = vrot.slane %v3907_v18, %v4585_v37 }
 0x352   :  { %v5055_v11 = vpop.permute.xlu1 %2950  ;;  %v5057_v22 = vpop.permute.xlu0 %3371  ;;  %v1662_v34 = vrot.slane %v3909_v54, %v4585_v37 }
 0x353   :  { %v5061_v20 = vmul.f32 %v4919_v26, %v5055_v11  ;;  %v5065_v32 = vmul.f32 %v5037_v23, %v5057_v22  ;;  %v392_v26 = vmul.f32 %v5043_v39, %v4411_v55  ;;  %v3911_v61 = vpop.eup %3910  ;;  %3914 = vrcp.f32 %v2473_v28 }
 0x354   :  { %2659 = vrot.lane.b32.xlu1 %v2642_v52, %s3950_s6  ;;  %3101 = vrot.lane.b32.xlu0 %v3081_v30, %s3950_s6  ;;  %v3083_v52 = vmul.f32 %v5053_v35, %v4954_v50  ;;  %v5099_v54 = vrot.slane %v3423_v47, %v4312_v9  ;;  %v807_v43 = vcombine.high %v805_v41, %v805_v41  ;;  %v3913_v29 = vpop.eup %3912 }
 0x355   :  { %6074 = vst [vmem:[#allocation93_spill] sm:$0xff] %v5061_v20  ;;  %6075 = vst [vmem:[#allocation94_spill] sm:$0xff] %v5065_v32  ;;  %v371_v20 = vcombine.high %v369_v38, %v369_v38  ;;  %v806_v32 = vcombine.high %v5046_v24, %v5046_v24  ;;  %v1663_v40 = vcombine.high %v1662_v34, %v1662_v34  ;;  %v400_v50 = vsub.f32 1.0, %v392_v26 }
 0x356   :  { %v5086_v30 = vpop.permute.xlu1 %2961  ;;  %v5088_v55 = vpop.permute.xlu0 %3382  ;;  %v394_v28 = vmul.f32 %v5071_v5, %v4417_v63  ;;  %v3475_v47 = vrot.slane %v3911_v61, %v4585_v37  ;;  %v5119_v26 = vrot.slane %v805_v41, %v4312_v9  ;;  %v1234_v61 = vrot.slane %v1226_v57, %v4585_v37 }
 0x357   :  { %v5092_v38 = vmul.f32 %v4939_v27, %v5086_v30  ;;  %v5096_v18 = vmul.f32 %v5068_v15, %v5088_v55  ;;  %v5106_v27 = vrot.slane %v370_v1, %v4312_v9  ;;  %v5122_v63 = vrot.slane %v806_v32, %v4312_v9 }
 0x358   :  { %2663 = vrot.lane.b32.xlu1 %v2644_v16, %s3950_s6  ;;  %3105 = vrot.lane.b32.xlu0 %v3083_v52, %s3950_s6  ;;  %v5116_v16 = vrot.slane %v371_v20, %v4312_v9  ;;  %v5133_v52 = vrot.slane %v1663_v40, %v4585_v37  ;;  %v402_v20 = vsub.f32 1.0, %v394_v28  ;;  %v5144_v40 = vrot.slane %v3475_v47, %v4585_v37 }
 0x359   :  { %6076 = vst [vmem:[#allocation95_spill] sm:$0xff] %v5092_v38  ;;  %6077 = vst [vmem:[#allocation96_spill] sm:$0xff] %v5096_v18  ;;  %v1227_v38 = vcombine.high %v1226_v57, %v1226_v57  ;;  %v2646_v18 = vmul.f32 %v4949_v13, %v4910_v19  ;;  %v5129_v13 = vrot.slane %v807_v43, %v4312_v9 }
 0x35a   :  { %v5111_v17 = vpop.permute.xlu1 %3210  ;;  %v5113_v4 = vpop.permute.xlu0 %3393  ;;  %v396_v41 = vmul.f32 %v5106_v27, %v4427_v25  ;;  %v1670_v43 = vrot.slane %v1662_v34, %v4585_v37  ;;  %v2648_v57 = vmul.f32 %v4963_v42, %v4930_v8  ;;  %v3476_v19 = vcombine.high %v3475_v47, %v3475_v47 }
 0x35b   :  { %6078 = vst [vmem:[#allocation97_spill] sm:$0xff] %v5111_v17  ;;  %v5126_v1 = vmul.f32 %v5099_v54, %v5113_v4  ;;  %v1241_v32 = vrot.slane %v1227_v38, %v4585_v37  ;;  %v3916_v17 = vld [vmem:[#allocation2] sm:$0xff]  ;;  %v1242_v28 = vcombine.high %v1234_v61, %v1234_v61  ;;  %v2098_v25 = vrot.slane %v3913_v29, %v4585_v37 }
 0x35c   :  { %2667 = vrot.lane.b32.xlu1 %v2646_v18, %s3950_s6  ;;  %2367 = vbcast.lane.b32.xlu0 %v4350_v3, 256  ;;  %v1678_v34 = vcombine.high %v1670_v43, %v1670_v43  ;;  %v1679_v42 = vcombine.high %v5133_v52, %v5133_v52  ;;  %v404_v38 = vsub.f32 1.0, %v396_v41  ;;  %v5170_v41 = vrot.slane %v3476_v19, %v4585_v37 }
 0x35d   :  { %6079 = vst [vmem:[#allocation98_spill] sm:$0xff] %v5126_v1  ;;  %v408_v1 = vmul.f32 %v3916_v17, %v400_v50  ;;  %v1243_v7 = vcombine.high %v1241_v32, %v1241_v32  ;;  %v5151_v17 = vrot.slane %v5046_v24, %v4312_v9  ;;  %v398_v50 = vmul.f32 %v5116_v16, %v4434_v33 }
 0x35e   :  { %v5146_v18 = vpop.permute.xlu1 %3221  ;;  %v478_v46 = vpop.permute.xlu0 %477  ;;  %v2099_v47 = vcombine.high %v2098_v25, %v2098_v25  ;;  %v5161_v24 = vrot.slane %v1234_v61, %v4312_v9  ;;  %v5187_v19 = vrot.slane %v1678_v34, %v4312_v9  ;;  %v3080_v34 = vmul.f32 %v4999_v2, %v5024_v62 }
 0x35f   :  { %6080 = vst [vmem:[#allocation99_spill] sm:$0xff] %v5146_v18  ;;  %v501_v12 = vadd.f32 %v478_v46, %v408_v1  ;;  %v3917_v46 = vld [vmem:[#allocation2 + $0x10] sm:$0xff]  ;;  %v3078_v1 = vmul.f32 %v4982_v51, %v5001_v59  ;;  %v5181_v61 = vrot.slane %v1243_v7, %v4312_v9  ;;  %v406_v8 = vsub.f32 1.0, %v398_v50 }
 0x360   :  { %2671 = vrot.lane.b32.xlu1 %v2648_v57, %s3950_s6  ;;  %2803 = vbcast.lane.b32.xlu0 %v4362_v0, 256  ;;  %v410_v29 = vmul.f32 %v3917_v46, %v402_v20  ;;  %v5167_v57 = vrot.slane %v5144_v40, %v4312_v9  ;;  %v5178_v20 = vrot.slane %v1242_v28, %v4312_v9  ;;  %v3915_v51 = vpop.eup %3914 }
 0x361   :  { %509 = vst.msk [vmem:[#allocation2] sm:$0xff] %vm32_vm1, %v501_v12  ;;  %v5175_v12 = vrot.slane %v1241_v32, %v4312_v9  ;;  %v5184_v46 = vrot.slane %v1670_v43, %v4312_v9  ;;  %v6082_v32 = vld [vmem:[#allocation5_spill] sm:$0xff]  ;;  %v5193_v28 = vrot.slane %v1679_v42, %v4312_v9  ;;  %v2113_v7 = vrot.slane %v2099_v47, %v4585_v37 }
 0x362   :  { %v5172_v18 = vpop.permute.xlu1 %3232  ;;  %v482_v33 = vpop.permute.xlu0 %481  ;;  %v3491_v42 = vcombine.high %v5144_v40, %v5144_v40  ;;  %v5223_v40 = vrot.slane %v5133_v52, %v4312_v9 }
 0x363   :  { %6081 = vst [vmem:[#allocation100_spill] sm:$0xff] %v5172_v18  ;;  %v503_v59 = vadd.f32 %v482_v33, %v410_v29  ;;  %v2106_v18 = vrot.slane %v2098_v25, %v4585_v37  ;;  %v3918_v29 = vld [vmem:[#allocation2 + $0x20] sm:$0xff]  ;;  %v3513_v25 = vmul.f32 %v5167_v57, %v5026_v10  ;;  %v6084_v33 = vld [vmem:[#allocation20_spill] sm:$0xff]  ;;  %v393_v10 = vmul.f32 %v5043_v39, %v4454_v31 }
 0x364   :  { %3095 = vrot.lane.b32.xlu1 %v3078_v1, %s3950_s6  ;;  %3239 = vbcast.lane.b32.xlu0 %v6082_v32, 256  ;;  %v412_v43 = vmul.f32 %v3918_v29, %v404_v38  ;;  %v5203_v1 = vrot.slane %v5170_v41, %v4312_v9  ;;  %v2534_v38 = vrot.slane %v3915_v51, %v4585_v37 }
 0x365   :  { %511 = vst.msk [vmem:[#allocation2 + $0x10] sm:$0xff] %vm32_vm1, %v503_v59  ;;  %v828_v59 = vmul.f32 %v5151_v17, %v6084_v33  ;;  %v5219_v29 = vrot.slane %v2106_v18, %v4312_v9  ;;  %v5228_v51 = vrot.slane %v2113_v7, %v4312_v9  ;;  %v3082_v39 = vmul.f32 %v5022_v56, %v5055_v11 }
 0x366   :  { %6083 = vst [vmem:[#allocation5_spill] sm:$0xff] %v5203_v1  ;;  %v5207_v50 = vpop.permute.xlu1 %3364  ;;  %v486_v47 = vpop.permute.xlu0 %485  ;;  %v2535_v33 = vcombine.high %v2534_v38, %v2534_v38  ;;  %v3515_v52 = vmul.f32 %v5203_v1, %v5057_v22  ;;  %v401_v22 = vsub.f32 1.0, %v393_v10  ;;  %v2115_v1 = vcombine.high %v2113_v7, %v2113_v7 }
 0x367   :  { %v5214_v62 = vmul.f32 %v5010_v6, %v5207_v50  ;;  %v505_v2 = vadd.f32 %v486_v47, %v412_v43  ;;  %v2114_v6 = vcombine.high %v2106_v18, %v2106_v18  ;;  %v3919_v43 = vld [vmem:[#allocation2 + $0x30] sm:$0xff]  ;;  %v5236_v47 = vrot.slane %v3491_v42, %v4312_v9 }
 0x368   :  { %3099 = vrot.lane.b32.xlu1 %v3080_v34, %s3950_s6  ;;  %3529 = vrot.lane.b32.xlu0 %v3513_v25, %s3950_s6  ;;  %v414_v31 = vmul.f32 %v3919_v43, %v406_v8  ;;  %v3492_v34 = vcombine.high %v5170_v41, %v5170_v41  ;;  %v836_v43 = vsub.f32 1.0, %v828_v59  ;;  %v395_v42 = vmul.f32 %v5071_v5, %v4460_v36  ;;  %v6088_v36 = vld [vmem:[#allocation11_spill] sm:$0xff] }
 0x369   :  { %6085 = vst [vmem:[#allocation20_spill] sm:$0xff] %v5214_v62  ;;  %513 = vst.msk [vmem:[#allocation2 + $0x20] sm:$0xff] %vm32_vm1, %v505_v2  ;;  %v5242_v62 = vld [vmem:[#allocation2] sm:$0xff]  ;;  %v6086_v2 = vld [vmem:[#allocation10_spill] sm:$0xff]  ;;  %v2542_v41 = vrot.slane %v2534_v38, %v4585_v37  ;;  %v399_v59 = vmul.f32 %v5116_v16, %v4475_v14  ;;  %v832_v5 = vmul.f32 %v5122_v63, %v6088_v36 }
 0x36a   :  { %v5240_v25 = vpop.permute.xlu1 %3375  ;;  %v490_v18 = vpop.permute.xlu0 %489  ;;  %v830_v8 = vmul.f32 %v5119_v26, %v6086_v2  ;;  %v397_v2 = vmul.f32 %v5106_v27, %v4467_v45  ;;  %v844_v10 = vmul.f32 %v836_v43, %v5242_v62  ;;  %v3084_v7 = vmul.f32 %v5053_v35, %v5086_v30 }
 0x36b   :  { %v5248_v56 = vmul.f32 %v5037_v23, %v5240_v25  ;;  %v507_v11 = vadd.f32 %v490_v18, %v414_v31  ;;  %v2549_v23 = vrot.slane %v2535_v33, %v4585_v37  ;;  %v3517_v38 = vmul.f32 %v5236_v47, %v5088_v55 }
 0x36c   :  { %3103 = vrot.lane.b32.xlu1 %v3082_v39, %s3950_s6  ;;  %3533 = vrot.lane.b32.xlu0 %v3515_v52, %s3950_s6  ;;  %v5269_v45 = vrot.slane %v3492_v34, %v4312_v9  ;;  %v5273_v37 = vld [vmem:[#allocation2 + $0x10] sm:$0xff]  ;;  %v838_v16 = vsub.f32 1.0, %v830_v8  ;;  %v5276_v33 = vrot.slane %v2114_v6, %v4312_v9  ;;  %v403_v30 = vsub.f32 1.0, %v395_v42  ;;  %v3920_v52 = vld [vmem:[#allocation2 + $0x8] sm:$0xff] }
 0x36d   :  { %6087 = vst [vmem:[#allocation10_spill] sm:$0xff] %v5248_v56  ;;  %515 = vst.msk [vmem:[#allocation2 + $0x30] sm:$0xff] %vm32_vm1, %v507_v11  ;;  %v5283_v55 = vrot.slane %v2115_v1, %v4312_v9  ;;  %v5286_v39 = vrot.slane %v2542_v41, %v4312_v9  ;;  %v409_v34 = vmul.f32 %v3920_v52, %v401_v22  ;;  %v405_v6 = vsub.f32 1.0, %v397_v2  ;;  %v6090_v22 = vld [vmem:[#allocation13_spill] sm:$0xff]  ;;  %v3922_v52 = vld [vmem:[#allocation2 + $0x28] sm:$0xff] }
 0x36e   :  { %v5271_v27 = vpop.permute.xlu1 %3386  ;;  %v914_v14 = vpop.permute.xlu0 %913  ;;  %v5291_v18 = vrot.slane %v2549_v23, %v4312_v9  ;;  %v846_v8 = vmul.f32 %v838_v16, %v5273_v37  ;;  %v407_v1 = vsub.f32 1.0, %v399_v59  ;;  %v840_v43 = vsub.f32 1.0, %v832_v5  ;;  %v6092_v5 = vld [vmem:[#allocation22_spill] sm:$0xff] }
 0x36f   :  { %v5280_v31 = vmul.f32 %v5068_v15, %v5271_v27  ;;  %v937_v35 = vadd.f32 %v914_v14, %v844_v10  ;;  %v2550_v15 = vcombine.high %v2542_v41, %v2542_v41  ;;  %v2551_v11 = vcombine.high %v2549_v23, %v2549_v23  ;;  %v3921_v14 = vld [vmem:[#allocation2 + $0x18] sm:$0xff]  ;;  %v6129_v56 = vld [vmem:[#allocation26_spill] sm:$0xff] }
 0x370   :  { %3107 = vrot.lane.b32.xlu1 %v3084_v7, %s3950_s6  ;;  %3537 = vrot.lane.b32.xlu0 %v3517_v38, %s3950_s6  ;;  %v3519_v42 = vmul.f32 %v5269_v45, %v5113_v4  ;;  %v5299_v7 = vld [vmem:[#allocation2 + $0x20] sm:$0xff]  ;;  %v834_v2 = vmul.f32 %v5129_v13, %v6090_v22  ;;  %v5305_v41 = vmul.f32 %v5151_v17, %v4520_v60  ;;  %v6093_v17 = vld [vmem:[#allocation23_spill] sm:$0xff]  ;;  %v3923_v22 = vld [vmem:[#allocation2 + $0x38] sm:$0xff] }
 0x371   :  { %6089 = vst [vmem:[#allocation11_spill] sm:$0xff] %v5280_v31  ;;  %945 = vst.msk [vmem:[#allocation2] sm:$0xff] %vm32_vm1, %v937_v35  ;;  %v5313_v4 = vmul.f32 %v5161_v24, %v6092_v5  ;;  %v5317_v38 = vmul.f32 %v5119_v26, %v4526_v44  ;;  %v411_v60 = vmul.f32 %v3921_v14, %v403_v30  ;;  %v6094_v26 = vld [vmem:[#allocation24_spill] sm:$0xff] }
 0x372   :  { %v5297_v10 = vpop.permute.xlu1 %3397  ;;  %v918_v36 = vpop.permute.xlu0 %917  ;;  %v5323_v16 = vmul.f32 %v5175_v12, %v6093_v17  ;;  %v848_v35 = vmul.f32 %v840_v43, %v5299_v7  ;;  %v413_v44 = vmul.f32 %v3922_v52, %v405_v6  ;;  %v5336_v30 = vmul.f32 %v5178_v20, %v6094_v26 }
 0x373   :  { %v5309_v59 = vmul.f32 %v5099_v54, %v5297_v10  ;;  %v939_v23 = vadd.f32 %v918_v36, %v846_v8  ;;  %v5326_v54 = vrot.slane %v2550_v15, %v4312_v9  ;;  %v5339_v8 = vrot.slane %v2551_v11, %v4312_v9  ;;  %v6095_v11 = vld [vmem:[#allocation25_spill] sm:$0xff] }
 0x374   :  { %2371 = vbcast.lane.b32.xlu1 %v4350_v3, 264  ;;  %3541 = vrot.lane.b32.xlu0 %v3519_v42, %s3950_s6  ;;  %v5332_v3 = vmul.f32 %v5122_v63, %v4534_v48  ;;  %v5341_v36 = vld [vmem:[#allocation2 + $0x30] sm:$0xff]  ;;  %v842_v43 = vsub.f32 1.0, %v834_v2  ;;  %v837_v6 = vsub.f32 1.0, %v5305_v41  ;;  %v839_v14 = vsub.f32 1.0, %v5317_v38  ;;  %v6096_v2 = vld [vmem:[#allocation34_spill] sm:$0xff] }
 0x375   :  { %6091 = vst [vmem:[#allocation13_spill] sm:$0xff] %v5309_v59  ;;  %947 = vst.msk [vmem:[#allocation2 + $0x10] sm:$0xff] %vm32_vm1, %v939_v23  ;;  %v5343_v23 = vmul.f32 %v3923_v22, %v407_v1  ;;  %v5350_v9 = vmul.f32 %v5129_v13, %v4539_v21  ;;  %v5354_v17 = vmul.f32 %v5181_v61, %v6095_v11  ;;  %v6098_v22 = vld [vmem:[#allocation36_spill] sm:$0xff] }
 0x376   :  { %v480_v42 = vpop.permute.xlu1 %479  ;;  %v922_v15 = vpop.permute.xlu0 %921  ;;  %v850_v21 = vmul.f32 %v842_v43, %v5341_v36  ;;  %v841_v13 = vsub.f32 1.0, %v5332_v3  ;;  %v5373_v52 = vmul.f32 %v5175_v12, %v4587_v58  ;;  %v5385_v43 = vmul.f32 %v5193_v28, %v6098_v22  ;;  %v6099_v12 = vld [vmem:[#allocation37_spill] sm:$0xff]  ;;  %v6113_v63 = vld [vmem:[#allocation56_spill] sm:$0xff] }
 0x377   :  { %v502_v5 = vadd.f32 %v480_v42, %v409_v34  ;;  %v941_v48 = vadd.f32 %v922_v15, %v848_v35  ;;  %v5360_v34 = vmul.f32 %v5161_v24, %v4576_v53  ;;  %v5364_v35 = vmul.f32 %v5184_v46, %v6096_v2  ;;  %v6097_v42 = vld [vmem:[#allocation35_spill] sm:$0xff]  ;;  %v6100_v2 = vld [vmem:[#allocation38_spill] sm:$0xff] }
 0x378   :  { %2807 = vbcast.lane.b32.xlu1 %v4362_v0, 264  ;;  %v5377_v53 = vmul.f32 %v5187_v19, %v4589_v49  ;;  %v5381_v15 = vmul.f32 %v5178_v20, %v6097_v42  ;;  %v5391_v49 = vmul.f32 %v5181_v61, %v6099_v12  ;;  %v5395_v0 = vmul.f32 %v5193_v28, %v6100_v2  ;;  %v6103_v28 = vld [vmem:[#allocation49_spill] sm:$0xff]  ;;  %v6114_v20 = vld [vmem:[#allocation63_spill] sm:$0xff] }
 0x379   :  { %510 = vst.msk [vmem:[#allocation2 + $0x8] sm:$0xff] %vm32_vm1, %v502_v5  ;;  %949 = vst.msk [vmem:[#allocation2 + $0x20] sm:$0xff] %vm32_vm1, %v941_v48  ;;  %v5414_v22 = vmul.f32 %v5223_v40, %v6103_v28  ;;  %v6105_v28 = vld [vmem:[#allocation50_spill] sm:$0xff]  ;;  %v5465_v11 = vmul.f32 %v5283_v55, %v6113_v63  ;;  %v6128_v31 = vsub.f32 1.0, %v5350_v9 }
 0x37a   :  { %v484_v24 = vpop.permute.xlu1 %483  ;;  %v926_v26 = vpop.permute.xlu0 %925  ;;  %v5428_v1 = vmul.f32 %v5228_v51, %v6105_v28 }
 0x37b   :  { %v504_v5 = vadd.f32 %v484_v24, %v411_v60  ;;  %v943_v48 = vadd.f32 %v926_v26, %v850_v21  ;;  %v6101_v60 = vld [vmem:[#allocation47_spill] sm:$0xff]  ;;  %v6102_v24 = vld [vmem:[#allocation48_spill] sm:$0xff] }
 0x37c   :  { %3243 = vbcast.lane.b32.xlu1 %v6082_v32, 264  ;;  %v5402_v21 = vmul.f32 %v5184_v46, %v6101_v60  ;;  %v5406_v26 = vmul.f32 %v5219_v29, %v6102_v24  ;;  %v3514_v46 = vmul.f32 %v5167_v57, %v5207_v50  ;;  %v6106_v57 = vld [vmem:[#allocation51_spill] sm:$0xff]  ;;  %v6109_v32 = vld [vmem:[#allocation53_spill] sm:$0xff] }
 0x37d   :  { %512 = vst.msk [vmem:[#allocation2 + $0x18] sm:$0xff] %vm32_vm1, %v504_v5  ;;  %951 = vst.msk [vmem:[#allocation2 + $0x30] sm:$0xff] %vm32_vm1, %v943_v48  ;;  %v6104_v48 = vld [vmem:[#allocation6_spill] sm:$0xff]  ;;  %v5432_v50 = vmul.f32 %v5223_v40, %v6106_v57  ;;  %v5446_v40 = vmul.f32 %v5187_v19, %v6109_v32  ;;  %v6118_v32 = vld [vmem:[#allocation65_spill] sm:$0xff] }
 0x37e   :  { %v488_v12 = vpop.permute.xlu1 %487  ;;  %v5418_v2 = vpop.permute.xlu0 %1351  ;;  %v629_v24 = vmul.f32 %v6104_v48, %v5242_v62  ;;  %v6108_v48 = vld [vmem:[#allocation12_spill] sm:$0xff]  ;;  %v6111_v62 = vld [vmem:[#allocation5_spill] sm:$0xff] }
 0x37f   :  { %v506_v42 = vadd.f32 %v488_v12, %v413_v44  ;;  %v6107_v44 = vld [vmem:[#allocation52_spill] sm:$0xff]  ;;  %v3516_v5 = vmul.f32 %v6111_v62, %v5240_v25 }
 0x380   :  { %3531 = vrot.lane.b32.xlu1 %v3514_v46, %s3950_s6  ;;  %v578_v60 = vld [vmem:[#allocation2 + $0x8] sm:$0xff]  ;;  %v5439_v12 = vmul.f32 %v5228_v51, %v6107_v44  ;;  %v6112_v44 = vld [vmem:[#allocation7_spill] sm:$0xff] }
 0x381   :  { %514 = vst.msk [vmem:[#allocation2 + $0x28] sm:$0xff] %vm32_vm1, %v506_v42  ;;  %v630_v28 = vmul.f32 %v6108_v48, %v578_v60  ;;  %v6110_v46 = vld [vmem:[#allocation54_spill] sm:$0xff]  ;;  %v637_v42 = vsel %vm32_vm1, %v629_v24, 0.0  ;;  %v631_v48 = vmul.f32 %v6112_v44, %v5273_v37  ;;  %v5471_v37 = vmul.f32 %v5219_v29, %v6114_v20 }
 0x382   :  { %v5450_v57 = vmul.f32 %v5276_v33, %v6110_v46  ;;  %v492_v61 = vpop.permute.xlu1 %491  ;;  %v5454_v51 = vpop.permute.xlu0 %1355  ;;  %v6127_v46 = vsub.f32 1.0, %v5360_v34 }
 0x383   :  { %v508_v58 = vadd.f32 %v492_v61, %v5343_v23  ;;  %v638_v19 = vsel %vm32_vm1, %v630_v28, 0.0  ;;  %v845_v23 = vmul.f32 %v837_v6, %v578_v60  ;;  %v6115_v61 = vld [vmem:[#allocation14_spill] sm:$0xff]  ;;  %v646_v29 = vsel %vm32_vm1, %v631_v48, 0.0 }
 0x384   :  { %3535 = vrot.lane.b32.xlu1 %v3516_v5, %s3950_s6  ;;  %v639_v25 = vadd.f32 %v638_v19, %v637_v42  ;;  %v580_v62 = vld [vmem:[#allocation2 + $0x18] sm:$0xff]  ;;  %v3518_v5 = vmul.f32 %v5236_v47, %v5271_v27  ;;  %v5494_v47 = vmul.f32 %v5276_v33, %v6118_v32  ;;  %v3520_v32 = vmul.f32 %v5269_v45, %v5297_v10 }
 0x385   :  { %516 = vst.msk [vmem:[#allocation2 + $0x38] sm:$0xff] %vm32_vm1, %v508_v58  ;;  %v632_v28 = vmul.f32 %v6115_v61, %v580_v62  ;;  %v6116_v58 = vld [vmem:[#allocation8_spill] sm:$0xff] }
 0x386   :  { %v916_v42 = vpop.permute.xlu1 %915  ;;  %v640_v19 = vrot.slane %v639_v25, 4  ;;  %v5481_v24 = vpop.permute.xlu0 %1359  ;;  %v633_v20 = vmul.f32 %v6116_v58, %v5299_v7  ;;  %v6117_v61 = vld [vmem:[#allocation64_spill] sm:$0xff]  ;;  %6119 = vst [vmem:[#allocation22_spill] sm:$0xff] %v5494_v47  ;;  %v6120_v7 = vld [vmem:[#allocation66_spill] sm:$0xff] }
 0x387   :  { %v938_v41 = vadd.f32 %v916_v42, %v845_v23  ;;  %v647_v6 = vsel %vm32_vm1, %v632_v28, 0.0  ;;  %v5490_v44 = vmul.f32 %v5286_v39, %v6117_v61  ;;  %v5500_v23 = vmul.f32 %v5291_v18, %v6120_v7  ;;  %v6121_v42 = vld [vmem:[#allocation16_spill] sm:$0xff]  ;;  %v6122_v61 = vld [vmem:[#allocation67_spill] sm:$0xff] }
 0x388   :  { %3539 = vrot.lane.b32.xlu1 %v3518_v5, %s3950_s6  ;;  %v648_v27 = vadd.f32 %v647_v6, %v646_v29  ;;  %v582_v48 = vld [vmem:[#allocation2 + $0x28] sm:$0xff]  ;;  %v847_v28 = vmul.f32 %v839_v14, %v580_v62  ;;  %v5508_v33 = vmul.f32 %v5283_v55, %v6122_v61  ;;  %v641_v5 = vadd.f32 %v640_v19, %v639_v25  ;;  %v6124_v19 = vld [vmem:[#allocation68_spill] sm:$0xff]  ;;  %v1015_v61 = vld [vmem:[#allocation2 + $0x10] sm:$0xff] }
 0x389   :  { %946 = vst.msk [vmem:[#allocation2 + $0x8] sm:$0xff] %vm32_vm1, %v938_v41  ;;  %v634_v58 = vmul.f32 %v6121_v42, %v582_v48  ;;  %v655_v7 = vsel %vm32_vm1, %v633_v20, 0.0  ;;  %v6123_v41 = vld [vmem:[#allocation9_spill] sm:$0xff]  ;;  %v5524_v20 = vmul.f32 %v5326_v54, %v6124_v19  ;;  %v6130_v25 = vsub.f32 1.0, %v5313_v4 }
 0x38a   :  { %v920_v29 = vpop.permute.xlu1 %919  ;;  %v649_v6 = vrot.slane %v648_v27, 4  ;;  %v5512_v60 = vpop.permute.xlu0 %1363  ;;  %v635_v38 = vmul.f32 %v6123_v41, %v5341_v36  ;;  %v1013_v42 = vld [vmem:[#allocation2] sm:$0xff]  ;;  %v849_v36 = vmul.f32 %v841_v13, %v582_v48 }
 0x38b   :  { %v940_v14 = vadd.f32 %v920_v29, %v847_v28  ;;  %v656_v62 = vsel %vm32_vm1, %v634_v58, 0.0  ;;  %v6125_v28 = vld [vmem:[#allocation18_spill] sm:$0xff]  ;;  %v642_v29 = vrot.slane %v641_v5, 2  ;;  %v1280_v59 = vmul.f32 %v6127_v46, %v1013_v42  ;;  %v1017_v46 = vld [vmem:[#allocation2 + $0x20] sm:$0xff] }
 0x38c   :  { %v650_v63 = vadd.f32 %v649_v6, %v648_v27  ;;  %3543 = vrot.lane.b32.xlu1 %v3520_v32, %s3950_s6  ;;  %v657_v45 = vadd.f32 %v656_v62, %v655_v7  ;;  %v584_v10 = vld [vmem:[#allocation2 + $0x38] sm:$0xff]  ;;  %v6126_v7 = vld [vmem:[#allocation15_spill] sm:$0xff]  ;;  %v664_v19 = vsel %vm32_vm1, %v635_v38, 0.0 }
 0x38d   :  { %948 = vst.msk [vmem:[#allocation2 + $0x18] sm:$0xff] %vm32_vm1, %v940_v14  ;;  %v636_v58 = vmul.f32 %v6125_v28, %v584_v10  ;;  %v1065_v62 = vmul.f32 %v6126_v7, %v1013_v42  ;;  %v851_v7 = vmul.f32 %v6128_v31, %v584_v10 }
 0x38e   :  { %v651_v41 = vrot.slane %v650_v63, 2  ;;  %v924_v27 = vpop.permute.xlu1 %923  ;;  %v658_v6 = vrot.slane %v657_v45, 4  ;;  %v5530_v32 = vpop.permute.xlu0 %1785 }
 0x38f   :  { %v942_v55 = vadd.f32 %v924_v27, %v849_v36  ;;  %v665_v14 = vsel %vm32_vm1, %v636_v58, 0.0  ;;  %v6131_v36 = vld [vmem:[#allocation17_spill] sm:$0xff]  ;;  %v643_v58 = vadd.f32 %v642_v29, %v641_v5  ;;  %v1073_v34 = vsel %vm32_vm1, %v1065_v62, 0.0 }
 0x390   :  { %v652_v3 = vadd.f32 %v651_v41, %v650_v63  ;;  %v659_v13 = vadd.f32 %v658_v6, %v657_v45  ;;  %v666_v48 = vadd.f32 %v665_v14, %v664_v19  ;;  %v1014_v28 = vld [vmem:[#allocation2 + $0x8] sm:$0xff]  ;;  %v1067_v27 = vmul.f32 %v6131_v36, %v1015_v61  ;;  %v6133_v19 = vld [vmem:[#allocation28_spill] sm:$0xff] }
 0x391   :  { %950 = vst.msk [vmem:[#allocation2 + $0x28] sm:$0xff] %vm32_vm1, %v942_v55  ;;  %v1066_v47 = vmul.f32 %v6129_v56, %v1014_v28  ;;  %v1281_v38 = vmul.f32 %v6130_v25, %v1014_v28  ;;  %v6132_v56 = vsub.f32 1.0, %v5373_v52  ;;  %v644_v52 = vrot.slane %v643_v58, 1 }
 0x392   :  { %v660_v63 = vrot.slane %v659_v13, 2  ;;  %v928_v45 = vpop.permute.xlu1 %927  ;;  %v667_v41 = vrot.slane %v666_v48, 4  ;;  %v5545_v6 = vpop.permute.xlu0 %1789  ;;  %v653_v55 = vrot.slane %v652_v3, 1  ;;  %v1082_v14 = vsel %vm32_vm1, %v1067_v27, 0.0 }
 0x393   :  { %v944_v42 = vadd.f32 %v928_v45, %v851_v7  ;;  %v1074_v9 = vsel %vm32_vm1, %v1066_v47, 0.0  ;;  %v1374_v31 = vadd.f32 %v5418_v2, %v1281_v38  ;;  %v1282_v4 = vmul.f32 %v6132_v56, %v1015_v61  ;;  %v6135_v2 = vld [vmem:[#allocation19_spill] sm:$0xff] }
 0x394   :  { %v661_v10 = vadd.f32 %v660_v63, %v659_v13  ;;  %v668_v25 = vadd.f32 %v667_v41, %v666_v48  ;;  %v1075_v5 = vadd.f32 %v1074_v9, %v1073_v34  ;;  %v1016_v29 = vld [vmem:[#allocation2 + $0x18] sm:$0xff]  ;;  %v6134_v47 = vsub.f32 1.0, %v5323_v16 }
 0x395   :  { %952 = vst.msk [vmem:[#allocation2 + $0x38] sm:$0xff] %vm32_vm1, %v944_v42  ;;  %1382 = vst.msk [vmem:[#allocation2 + $0x8] sm:$0xff] %vm32_vm1, %v1374_v31  ;;  %v1068_v62 = vmul.f32 %v6133_v19, %v1016_v29  ;;  %v1069_v7 = vmul.f32 %v6135_v2, %v1017_v46  ;;  %v6136_v34 = vsub.f32 1.0, %v5381_v15  ;;  %v654_v42 = vadd.f32 %v653_v55, %v652_v3 }
 0x396   :  { %v1283_v28 = vmul.f32 %v6134_v47, %v1016_v29  ;;  %v662_v61 = vrot.slane %v661_v10, 1  ;;  %v669_v38 = vrot.slane %v668_v25, 2  ;;  %v1350_v13 = vpop.permute.xlu1 %1349  ;;  %v1076_v48 = vrot.slane %v1075_v5, 4  ;;  %v5559_v36 = vpop.permute.xlu0 %1793  ;;  %v1019_v29 = vld [vmem:[#allocation2 + $0x30] sm:$0xff]  ;;  %v6137_v47 = vld [vmem:[#allocation30_spill] sm:$0xff] }
 0x397   :  { %v1373_v63 = vadd.f32 %v1350_v13, %v1280_v59  ;;  %v1083_v45 = vsel %vm32_vm1, %v1068_v62, 0.0  ;;  %v1284_v27 = vmul.f32 %v6136_v34, %v1017_v46  ;;  %v1091_v62 = vsel %vm32_vm1, %v1069_v7, 0.0 }
 0x398   :  { %v1376_v41 = vadd.f32 %v5454_v51, %v1283_v28  ;;  %v670_v16 = vadd.f32 %v669_v38, %v668_v25  ;;  %v1077_v9 = vadd.f32 %v1076_v48, %v1075_v5  ;;  %v1084_v31 = vadd.f32 %v1083_v45, %v1082_v14  ;;  %v1018_v56 = vld [vmem:[#allocation2 + $0x28] sm:$0xff] }
 0x399   :  { %v663_v19 = vadd.f32 %v662_v61, %v661_v10  ;;  %1381 = vst.msk [vmem:[#allocation2] sm:$0xff] %vm32_vm1, %v1373_v63  ;;  %v1070_v59 = vmul.f32 %v6137_v47, %v1018_v56  ;;  %v6138_v51 = vsub.f32 1.0, %v5336_v30  ;;  %v645_v15 = vadd.f32 %v644_v52, %v643_v58  ;;  %v6139_v61 = vld [vmem:[#allocation21_spill] sm:$0xff] }
 0x39a   :  { %1384 = vst.msk [vmem:[#allocation2 + $0x18] sm:$0xff] %vm32_vm1, %v1376_v41  ;;  %v671_v46 = vrot.slane %v670_v16, 1  ;;  %v1078_v3 = vrot.slane %v1077_v9, 2  ;;  %v1354_v55 = vpop.permute.xlu1 %1353  ;;  %v1085_v25 = vrot.slane %v1084_v31, 4  ;;  %v5571_v5 = vpop.permute.xlu0 %1797  ;;  %v1071_v38 = vmul.f32 %v6139_v61, %v1019_v29 }
 0x39b   :  { %v1285_v28 = vmul.f32 %v6138_v51, %v1018_v56  ;;  %v1375_v14 = vadd.f32 %v1354_v55, %v1282_v4  ;;  %v1092_v10 = vsel %vm32_vm1, %v1070_v59, 0.0  ;;  %v677_v13 = vsel %vm220_vm3, %v654_v42, %v645_v15  ;;  %v6140_v4 = vld [vmem:[#allocation32_spill] sm:$0xff]  ;;  %v6142_v59 = vld [vmem:[#allocation39_spill] sm:$0xff] }
 0x39c   :  { %v672_v7 = vadd.f32 %v671_v46, %v670_v16  ;;  %v1086_v48 = vadd.f32 %v1085_v25, %v1084_v31  ;;  %v1093_v30 = vadd.f32 %v1092_v10, %v1091_v62  ;;  %v1020_v63 = vld [vmem:[#allocation2 + $0x38] sm:$0xff]  ;;  %v1450_v58 = vld [vmem:[#allocation2 + $0x8] sm:$0xff]  ;;  %v678_v52 = vsel %vm222_vm4, %v663_v19, %v677_v13 }
 0x39d   :  { %v1378_v2 = vadd.f32 %v5481_v24, %v1285_v28  ;;  %v1079_v45 = vadd.f32 %v1078_v3, %v1077_v9  ;;  %1383 = vst.msk [vmem:[#allocation2 + $0x10] sm:$0xff] %vm32_vm1, %v1375_v14  ;;  %v1072_v41 = vmul.f32 %v6140_v4, %v1020_v63  ;;  %v6141_v24 = vsub.f32 1.0, %v5354_v17  ;;  %v6143_v28 = vld [vmem:[#allocation70_spill] sm:$0xff] }
 0x39e   :  { %v679_v56 = vsel %vm224_vm5, %v672_v7, %v678_v52  ;;  %v1087_v42 = vrot.slane %v1086_v48, 2  ;;  %v1358_v16 = vpop.permute.xlu1 %1357  ;;  %v1094_v31 = vrot.slane %v1093_v30, 4  ;;  %v5584_v47 = vpop.permute.xlu0 %2221  ;;  %v1502_v62 = vmul.f32 %v6142_v59, %v1450_v58 }
 0x39f   :  { %1386 = vst.msk [vmem:[#allocation2 + $0x28] sm:$0xff] %vm32_vm1, %v1378_v2  ;;  %v1287_v34 = vmul.f32 %v6141_v24, %v1020_v63  ;;  %v1377_v9 = vadd.f32 %v1358_v16, %v1284_v27  ;;  %v1100_v19 = vsel %vm32_vm1, %v1071_v38, 0.0  ;;  %v1101_v17 = vsel %vm32_vm1, %v1072_v41, 0.0 }
 0x3a0   :  { %3601 = vst.msk [vmem:[%s5945_s7 + $0x4] sm:$0xf] %vm227_vm6, %v679_v56  ;;  %v5596_v15 = vmul.f32 %v5339_v8, %v6143_v28  ;;  %v1088_v46 = vadd.f32 %v1087_v42, %v1086_v48  ;;  %v1095_v3 = vadd.f32 %v1094_v31, %v1093_v30  ;;  %v1449_v55 = vld [vmem:[#allocation2] sm:$0xff]  ;;  %v1102_v25 = vadd.f32 %v1101_v17, %v1100_v19 }
 0x3a1   :  { %v1380_v51 = vadd.f32 %v5512_v60, %v1287_v34  ;;  %v1452_v14 = vld [vmem:[#allocation2 + $0x18] sm:$0xff]  ;;  %v1080_v10 = vrot.slane %v1079_v45, 1  ;;  %1385 = vst.msk [vmem:[#allocation2 + $0x20] sm:$0xff] %vm32_vm1, %v1377_v9  ;;  %v6144_v27 = vsub.f32 1.0, %v5364_v35  ;;  %v6145_v61 = vsub.f32 1.0, %v5391_v49  ;;  %v6146_v60 = vld [vmem:[#allocation27_spill] sm:$0xff] }
 0x3a2   :  { %v1501_v13 = vmul.f32 %v6146_v60, %v1449_v55  ;;  %v1096_v7 = vrot.slane %v1095_v3, 2  ;;  %v1362_v63 = vpop.permute.xlu1 %1361  ;;  %v1103_v48 = vrot.slane %v1102_v25, 4  ;;  %v5605_v30 = vpop.permute.xlu0 %2225  ;;  %v1510_v52 = vsel %vm32_vm1, %v1502_v62, 0.0 }
 0x3a3   :  { %v1716_v2 = vmul.f32 %v6144_v27, %v1449_v55  ;;  %v1286_v38 = vmul.f32 %v6145_v61, %v1019_v29  ;;  %1388 = vst.msk [vmem:[#allocation2 + $0x38] sm:$0xff] %vm32_vm1, %v1380_v51  ;;  %v6147_v4 = vsub.f32 1.0, %v5402_v21  ;;  %v6148_v29 = vld [vmem:[#allocation29_spill] sm:$0xff]  ;;  %v1089_v56 = vrot.slane %v1088_v46, 1 }
 0x3a4   :  { %v1509_v49 = vsel %vm32_vm1, %v1501_v13, 0.0  ;;  %v1504_v34 = vmul.f32 %v6148_v29, %v1452_v14  ;;  %v1097_v42 = vadd.f32 %v1096_v7, %v1095_v3  ;;  %v1104_v16 = vadd.f32 %v1103_v48, %v1102_v25  ;;  %v1451_v31 = vld [vmem:[#allocation2 + $0x10] sm:$0xff] }
 0x3a5   :  { %v1717_v41 = vmul.f32 %v6147_v4, %v1450_v58  ;;  %v1809_v35 = vadd.f32 %v5530_v32, %v1716_v2  ;;  %v1379_v24 = vadd.f32 %v1362_v63, %v1286_v38  ;;  %v1511_v59 = vadd.f32 %v1510_v52, %v1509_v49  ;;  %v6150_v32 = vld [vmem:[#allocation41_spill] sm:$0xff]  ;;  %v6152_v2 = vld [vmem:[#allocation31_spill] sm:$0xff] }
 0x3a6   :  { %v1454_v9 = vld [vmem:[#allocation2 + $0x28] sm:$0xff]  ;;  %v1081_v19 = vadd.f32 %v1080_v10, %v1079_v45  ;;  %v6149_v21 = vsub.f32 1.0, %v5414_v22  ;;  %v1503_v62 = vmul.f32 %v6150_v32, %v1451_v31  ;;  %v6151_v17 = vsub.f32 1.0, %v5432_v50  ;;  %v1788_v3 = vpop.permute.xlu1 %1787  ;;  %v5620_v27 = vpop.permute.xlu0 %2229 }
 0x3a7   :  { %1817 = vst.msk [vmem:[#allocation2] sm:$0xff] %vm32_vm1, %v1809_v35  ;;  %1387 = vst.msk [vmem:[#allocation2 + $0x30] sm:$0xff] %vm32_vm1, %v1379_v24  ;;  %v1098_v28 = vrot.slane %v1097_v42, 1  ;;  %v1105_v55 = vrot.slane %v1104_v16, 2  ;;  %v1512_v25 = vrot.slane %v1511_v59, 4  ;;  %v1506_v45 = vmul.f32 %v6152_v2, %v1454_v9 }
 0x3a8   :  { %v1718_v58 = vmul.f32 %v6149_v21, %v1451_v31  ;;  %v1719_v51 = vmul.f32 %v6151_v17, %v1452_v14  ;;  %v1810_v61 = vadd.f32 %v1788_v3, %v1717_v41  ;;  %v1518_v38 = vsel %vm32_vm1, %v1503_v62, 0.0  ;;  %v1453_v50 = vld [vmem:[#allocation2 + $0x20] sm:$0xff] }
 0x3a9   :  { %v1519_v22 = vsel %vm32_vm1, %v1504_v34, 0.0  ;;  %v1090_v60 = vadd.f32 %v1089_v56, %v1088_v46  ;;  %v1106_v13 = vadd.f32 %v1105_v55, %v1104_v16  ;;  %v1513_v7 = vadd.f32 %v1512_v25, %v1511_v59  ;;  %v6159_v25 = vld [vmem:[#allocation45_spill] sm:$0xff] }
 0x3aa   :  { %v1811_v10 = vadd.f32 %v5545_v6, %v1718_v58  ;;  %v1520_v14 = vadd.f32 %v1519_v22, %v1518_v38  ;;  %v1456_v63 = vld [vmem:[#allocation2 + $0x38] sm:$0xff]  ;;  %v1099_v48 = vadd.f32 %v1098_v28, %v1097_v42  ;;  %1818 = vst.msk [vmem:[#allocation2 + $0x8] sm:$0xff] %vm32_vm1, %v1810_v61  ;;  %v6153_v52 = vsub.f32 1.0, %v5446_v40  ;;  %v6154_v6 = vld [vmem:[#allocation43_spill] sm:$0xff]  ;;  %v1792_v46 = vpop.permute.xlu1 %1791  ;;  %v5633_v34 = vpop.permute.xlu0 %2233  ;;  %v6156_v42 = vld [vmem:[#allocation33_spill] sm:$0xff] }
 0x3ab   :  { %v1505_v41 = vmul.f32 %v6154_v6, %v1453_v50  ;;  %v6155_v35 = vsub.f32 1.0, %v5377_v53  ;;  %v1107_v49 = vrot.slane %v1106_v13, 1  ;;  %v1528_v56 = vsel %vm32_vm1, %v1506_v45, 0.0 }
 0x3ac   :  { %1819 = vst.msk [vmem:[#allocation2 + $0x10] sm:$0xff] %vm32_vm1, %v1811_v10  ;;  %v1720_v4 = vmul.f32 %v6153_v52, %v1453_v50  ;;  %v1521_v29 = vrot.slane %v1520_v14, 4  ;;  %v1508_v16 = vmul.f32 %v6156_v42, %v1456_v63  ;;  %v1514_v31 = vrot.slane %v1513_v7, 2  ;;  %v6160_v50 = vld [vmem:[#allocation40_spill] sm:$0xff]  ;;  %v6164_v42 = vld [vmem:[#allocation75_spill] sm:$0xff] }
 0x3ad   :  { %v1721_v24 = vmul.f32 %v6155_v35, %v1454_v9  ;;  %v1812_v21 = vadd.f32 %v1792_v46, %v1719_v51  ;;  %v1527_v40 = vsel %vm32_vm1, %v1505_v41, 0.0  ;;  %v1113_v58 = vsel %vm220_vm3, %v1090_v60, %v1081_v19 }
 0x3ae   :  { %v1813_v59 = vadd.f32 %v5559_v36, %v1720_v4  ;;  %v1885_v32 = vld [vmem:[#allocation2] sm:$0xff]  ;;  %v1108_v53 = vadd.f32 %v1107_v49, %v1106_v13  ;;  %v1522_v9 = vadd.f32 %v1521_v29, %v1520_v14  ;;  %v1455_v62 = vld [vmem:[#allocation2 + $0x30] sm:$0xff]  ;;  %v1529_v17 = vadd.f32 %v1528_v56, %v1527_v40  ;;  %v1796_v10 = vpop.permute.xlu1 %1795  ;;  %v5649_v38 = vpop.permute.xlu0 %2657 }
 0x3af   :  { %v1114_v28 = vsel %vm222_vm4, %v1099_v48, %v1113_v58  ;;  %v6157_v55 = vsub.f32 1.0, %v5471_v37  ;;  %1820 = vst.msk [vmem:[#allocation2 + $0x18] sm:$0xff] %vm32_vm1, %v1812_v21  ;;  %v6158_v36 = vsub.f32 1.0, %v5385_v43  ;;  %v1507_v2 = vmul.f32 %v6159_v25, %v1455_v62  ;;  %v6163_v49 = vld [vmem:[#allocation55_spill] sm:$0xff]  ;;  %v6167_v25 = vld [vmem:[#allocation77_spill] sm:$0xff] }
 0x3b0   :  { %1821 = vst.msk [vmem:[#allocation2 + $0x20] sm:$0xff] %vm32_vm1, %v1813_v59  ;;  %v1115_v19 = vsel %vm224_vm5, %v1108_v53, %v1114_v28  ;;  %v1523_v45 = vrot.slane %v1522_v9, 2  ;;  %v1530_v61 = vrot.slane %v1529_v17, 4  ;;  %v1537_v22 = vsel %vm32_vm1, %v1508_v16, 0.0  ;;  %v6165_v28 = vld [vmem:[#allocation42_spill] sm:$0xff] }
 0x3b1   :  { %v2152_v3 = vmul.f32 %v6157_v55, %v1885_v32  ;;  %v1722_v51 = vmul.f32 %v6158_v36, %v1455_v62  ;;  %3608 = vst.msk [vmem:[%s5945_s7 + $0x8] sm:$0xf] %vm227_vm6, %v1115_v19  ;;  %v1515_v43 = vadd.f32 %v1514_v31, %v1513_v7  ;;  %v1814_v13 = vadd.f32 %v1796_v10, %v1721_v24  ;;  %v1886_v41 = vld [vmem:[#allocation2 + $0x8] sm:$0xff] }
 0x3b2   :  { %v1937_v14 = vmul.f32 %v6160_v50, %v1885_v32  ;;  %v1524_v52 = vadd.f32 %v1523_v45, %v1522_v9  ;;  %v1531_v4 = vadd.f32 %v1530_v61, %v1529_v17  ;;  %v1536_v6 = vsel %vm32_vm1, %v1507_v2, 0.0  ;;  %v1800_v31 = vpop.permute.xlu1 %1799  ;;  %v5674_v59 = vpop.permute.xlu0 %2661 }
 0x3b3   :  { %v2245_v37 = vadd.f32 %v5584_v47, %v2152_v3  ;;  %v1815_v60 = vadd.f32 %v5571_v5, %v1722_v51  ;;  %v1887_v48 = vld [vmem:[#allocation2 + $0x10] sm:$0xff]  ;;  %v6161_v47 = vsub.f32 1.0, %v5428_v1  ;;  %1822 = vst.msk [vmem:[#allocation2 + $0x28] sm:$0xff] %vm32_vm1, %v1814_v13  ;;  %v1538_v7 = vadd.f32 %v1537_v22, %v1536_v6  ;;  %v6169_v22 = vld [vmem:[#allocation57_spill] sm:$0xff] }
 0x3b4   :  { %v6162_v5 = vsub.f32 1.0, %v5395_v0  ;;  %v1938_v46 = vmul.f32 %v6163_v49, %v1886_v41  ;;  %v2584_v29 = vsub.f32 1.0, %v5524_v20  ;;  %v2586_v56 = vsub.f32 1.0, %v5596_v15  ;;  %v6186_v15 = vld [vmem:[#allocation58_spill] sm:$0xff] }
 0x3b5   :  { %2253 = vst.msk [vmem:[#allocation2] sm:$0xff] %vm32_vm1, %v2245_v37  ;;  %v2154_v35 = vmul.f32 %v6161_v47, %v1887_v48  ;;  %1823 = vst.msk [vmem:[#allocation2 + $0x30] sm:$0xff] %vm32_vm1, %v1815_v60  ;;  %v5672_v16 = vmul.f32 %v5286_v39, %v6164_v42  ;;  %v1532_v1 = vrot.slane %v1531_v4, 2  ;;  %v1525_v40 = vrot.slane %v1524_v52, 1 }
 0x3b6   :  { %v1723_v24 = vmul.f32 %v6162_v5, %v1456_v63  ;;  %v1539_v58 = vrot.slane %v1538_v7, 4  ;;  %v1945_v63 = vsel %vm32_vm1, %v1937_v14, 0.0  ;;  %v1516_v32 = vrot.slane %v1515_v43, 1  ;;  %v1888_v17 = vld [vmem:[#allocation2 + $0x18] sm:$0xff]  ;;  %v2224_v19 = vpop.permute.xlu1 %2223  ;;  %v5691_v61 = vpop.permute.xlu0 %2665  ;;  %v6170_v14 = vld [vmem:[#allocation79_spill] sm:$0xff] }
 0x3b7   :  { %v2247_v21 = vadd.f32 %v5605_v30, %v2154_v35  ;;  %v1889_v53 = vld [vmem:[#allocation2 + $0x20] sm:$0xff]  ;;  %v1533_v9 = vadd.f32 %v1532_v1, %v1531_v4  ;;  %v1946_v62 = vsel %vm32_vm1, %v1938_v46, 0.0  ;;  %v1939_v39 = vmul.f32 %v6165_v28, %v1887_v48  ;;  %v6173_v5 = vld [vmem:[#allocation44_spill] sm:$0xff] }
 0x3b8   :  { %v1816_v0 = vadd.f32 %v1800_v31, %v1723_v24  ;;  %v6166_v55 = vsub.f32 1.0, %v5450_v57  ;;  %v1540_v36 = vadd.f32 %v1539_v58, %v1538_v7  ;;  %v1947_v30 = vadd.f32 %v1946_v62, %v1945_v63 }
 0x3b9   :  { %2255 = vst.msk [vmem:[#allocation2 + $0x10] sm:$0xff] %vm32_vm1, %v2247_v21  ;;  %v2581_v51 = vsub.f32 1.0, %v5672_v16  ;;  %v5687_v2 = vmul.f32 %v5291_v18, %v6167_v25  ;;  %v6168_v45 = vsub.f32 1.0, %v5406_v26  ;;  %v1940_v37 = vmul.f32 %v6169_v22, %v1888_v17  ;;  %v6180_v22 = vld [vmem:[#allocation61_spill] sm:$0xff] }
 0x3ba   :  { %v2156_v3 = vmul.f32 %v6166_v55, %v1889_v53  ;;  %1824 = vst.msk [vmem:[#allocation2 + $0x38] sm:$0xff] %vm32_vm1, %v1816_v0  ;;  %v1526_v60 = vadd.f32 %v1525_v40, %v1524_v52  ;;  %v1534_v13 = vrot.slane %v1533_v9, 1  ;;  %v1541_v50 = vrot.slane %v1540_v36, 2  ;;  %v2228_v46 = vpop.permute.xlu1 %2227  ;;  %v1890_v21 = vld [vmem:[#allocation2 + $0x28] sm:$0xff] }
 0x3bb   :  { %v2153_v10 = vmul.f32 %v6168_v45, %v1886_v41  ;;  %v5697_v48 = vmul.f32 %v5326_v54, %v6170_v14  ;;  %v1948_v6 = vrot.slane %v1947_v30, 4  ;;  %v1955_v26 = vsel %vm32_vm1, %v1940_v37, 0.0 }
 0x3bc   :  { %v2249_v57 = vadd.f32 %v5620_v27, %v2156_v3  ;;  %v1891_v4 = vld [vmem:[#allocation2 + $0x30] sm:$0xff]  ;;  %v5699_v18 = vld [vmem:[#allocation2] sm:$0xff]  ;;  %v1954_v41 = vsel %vm32_vm1, %v1939_v39, 0.0  ;;  %v1517_v35 = vadd.f32 %v1516_v32, %v1515_v43  ;;  %v6171_v27 = vsub.f32 1.0, %v5465_v11  ;;  %v5713_v43 = vpop.permute.xlu0 %2669  ;;  %v6175_v39 = vld [vmem:[#allocation46_spill] sm:$0xff] }
 0x3bd   :  { %v2246_v47 = vadd.f32 %v2224_v19, %v2153_v10  ;;  %v6172_v7 = vsub.f32 1.0, %v5490_v44  ;;  %v1941_v24 = vmul.f32 %v6173_v5, %v1889_v53  ;;  %v1542_v49 = vadd.f32 %v1541_v50, %v1540_v36 }
 0x3be   :  { %2257 = vst.msk [vmem:[#allocation2 + $0x20] sm:$0xff] %vm32_vm1, %v2249_v57  ;;  %v2158_v52 = vmul.f32 %v6171_v27, %v1891_v4  ;;  %v1956_v42 = vadd.f32 %v1955_v26, %v1954_v41  ;;  %v6174_v1 = vsub.f32 1.0, %v5439_v12  ;;  %v1549_v11 = vsel %vm220_vm3, %v1526_v60, %v1517_v35  ;;  %v2232_v45 = vpop.permute.xlu1 %2231 }
 0x3bf   :  { %v2588_v54 = vmul.f32 %v6172_v7, %v5699_v18  ;;  %2254 = vst.msk [vmem:[#allocation2 + $0x8] sm:$0xff] %vm32_vm1, %v2246_v47  ;;  %v1535_v58 = vadd.f32 %v1534_v13, %v1533_v9  ;;  %v1543_v0 = vrot.slane %v1542_v49, 1  ;;  %v1949_v32 = vadd.f32 %v1948_v6, %v1947_v30  ;;  %v6177_v9 = vld [vmem:[#allocation59_spill] sm:$0xff] }
 0x3c0   :  { %v2155_v31 = vmul.f32 %v6174_v1, %v1888_v17  ;;  %v2251_v40 = vadd.f32 %v5633_v34, %v2158_v52  ;;  %v5718_v63 = vld [vmem:[#allocation2 + $0x10] sm:$0xff]  ;;  %v1957_v53 = vrot.slane %v1956_v42, 4  ;;  %v1943_v12 = vmul.f32 %v6175_v39, %v1891_v4  ;;  %v3094_v10 = vpop.permute.xlu0 %3093 }
 0x3c1   :  { %v2681_v44 = vadd.f32 %v5649_v38, %v2588_v54  ;;  %v1892_v28 = vld [vmem:[#allocation2 + $0x38] sm:$0xff]  ;;  %v6176_v17 = vsub.f32 1.0, %v5500_v23  ;;  %v1942_v55 = vmul.f32 %v6177_v9, %v1890_v21  ;;  %v6178_v38 = vld [vmem:[#allocation22_spill] sm:$0xff]  ;;  %v1963_v30 = vsel %vm32_vm1, %v1941_v24, 0.0 }
 0x3c2   :  { %v2248_v62 = vadd.f32 %v2228_v46, %v2155_v31  ;;  %2259 = vst.msk [vmem:[#allocation2 + $0x30] sm:$0xff] %vm32_vm1, %v2251_v40  ;;  %v6179_v3 = vsub.f32 1.0, %v6178_v38  ;;  %v1544_v25 = vadd.f32 %v1543_v0, %v1542_v49  ;;  %v1958_v19 = vadd.f32 %v1957_v53, %v1956_v42  ;;  %v2236_v5 = vpop.permute.xlu1 %2235  ;;  %v6182_v42 = vld [vmem:[#allocation78_spill] sm:$0xff]  ;;  %v6184_v0 = vld [vmem:[#allocation69_spill] sm:$0xff]  ;;  %v6185_v53 = vld [vmem:[#allocation80_spill] sm:$0xff] }
 0x3c3   :  { %2689 = vst.msk [vmem:[#allocation2] sm:$0xff] %vm32_vm1, %v2681_v44  ;;  %v2590_v34 = vmul.f32 %v6176_v17, %v5718_v63  ;;  %v1944_v37 = vmul.f32 %v6180_v22, %v1892_v28  ;;  %v1550_v57 = vsel %vm222_vm4, %v1535_v58, %v1549_v11  ;;  %v1964_v60 = vsel %vm32_vm1, %v1942_v55, 0.0  ;;  %v6188_v22 = vld [vmem:[#allocation60_spill] sm:$0xff] }
 0x3c4   :  { %v2157_v36 = vmul.f32 %v6179_v3, %v1890_v21  ;;  %2256 = vst.msk [vmem:[#allocation2 + $0x18] sm:$0xff] %vm32_vm1, %v2248_v62  ;;  %v1551_v50 = vsel %vm224_vm5, %v1544_v25, %v1550_v57  ;;  %v1950_v14 = vrot.slane %v1949_v32, 2  ;;  %v1959_v6 = vrot.slane %v1958_v19, 2  ;;  %v3098_v49 = vpop.permute.xlu0 %3097  ;;  %v6183_v21 = vld [vmem:[#allocation81_spill] sm:$0xff] }
 0x3c5   :  { %v2683_v23 = vadd.f32 %v5674_v59, %v2590_v34  ;;  %v5736_v4 = vld [vmem:[#allocation2 + $0x20] sm:$0xff]  ;;  %v1965_v47 = vadd.f32 %v1964_v60, %v1963_v30  ;;  %v1972_v26 = vsel %vm32_vm1, %v1943_v12, 0.0  ;;  %3615 = vst.msk [vmem:[%s5945_s7 + $0xc] sm:$0xf] %vm227_vm6, %v1551_v50  ;;  %v1973_v41 = vsel %vm32_vm1, %v1944_v37, 0.0 }
 0x3c6   :  { %v2250_v13 = vadd.f32 %v2232_v45, %v2157_v36  ;;  %v2592_v59 = vmul.f32 %v2584_v29, %v5736_v4  ;;  %v6181_v35 = vsub.f32 1.0, %v5508_v33  ;;  %v2583_v52 = vsub.f32 1.0, %v5687_v2  ;;  %v2322_v46 = vld [vmem:[#allocation2 + $0x8] sm:$0xff]  ;;  %v2660_v17 = vpop.permute.xlu1 %2659 }
 0x3c7   :  { %2691 = vst.msk [vmem:[#allocation2 + $0x10] sm:$0xff] %vm32_vm1, %v2683_v23  ;;  %v1960_v7 = vadd.f32 %v1959_v6, %v1958_v19  ;;  %v1966_v54 = vrot.slane %v1965_v47, 4  ;;  %v1974_v24 = vadd.f32 %v1973_v41, %v1972_v26  ;;  %v3016_v1 = vsub.f32 1.0, %v6182_v42  ;;  %v6189_v6 = vld [vmem:[#allocation82_spill] sm:$0xff] }
 0x3c8   :  { %2258 = vst.msk [vmem:[#allocation2 + $0x28] sm:$0xff] %vm32_vm1, %v2250_v13  ;;  %v2159_v27 = vmul.f32 %v6181_v35, %v1892_v28  ;;  %v2585_v20 = vsub.f32 1.0, %v5697_v48  ;;  %v2685_v29 = vadd.f32 %v5691_v61, %v2592_v59  ;;  %v5757_v11 = vmul.f32 %v5339_v8, %v6183_v21  ;;  %v3102_v34 = vpop.permute.xlu0 %3101 }
 0x3c9   :  { %v1951_v33 = vadd.f32 %v1950_v14, %v1949_v32  ;;  %v5759_v40 = vld [vmem:[#allocation2 + $0x30] sm:$0xff]  ;;  %v1967_v2 = vadd.f32 %v1966_v54, %v1965_v47  ;;  %v1975_v44 = vrot.slane %v1974_v24, 4  ;;  %v2374_v8 = vmul.f32 %v6184_v0, %v2322_v46 }
 0x3ca   :  { %v2252_v31 = vadd.f32 %v2236_v5, %v2159_v27  ;;  %v5761_v58 = vld [vmem:[#allocation2] sm:$0xff]  ;;  %2693 = vst.msk [vmem:[#allocation2 + $0x20] sm:$0xff] %vm32_vm1, %v2685_v29  ;;  %v2594_v48 = vmul.f32 %v2586_v56, %v5759_v40  ;;  %v2589_v32 = vmul.f32 %v2581_v51, %v2322_v46  ;;  %v3018_v62 = vsub.f32 1.0, %v6185_v53  ;;  %v2664_v13 = vpop.permute.xlu1 %2663 }
 0x3cb   :  { %v3024_v61 = vmul.f32 %v3016_v1, %v5761_v58  ;;  %v1961_v28 = vrot.slane %v1960_v7, 1  ;;  %v1968_v39 = vrot.slane %v1967_v2, 2  ;;  %v1976_v12 = vadd.f32 %v1975_v44, %v1974_v24  ;;  %v2324_v9 = vld [vmem:[#allocation2 + $0x18] sm:$0xff]  ;;  %v6190_v24 = vld [vmem:[#allocation73_spill] sm:$0xff]  ;;  %v6192_v44 = vld [vmem:[#allocation62_spill] sm:$0xff] }
 0x3cc   :  { %2260 = vst.msk [vmem:[#allocation2 + $0x38] sm:$0xff] %vm32_vm1, %v2252_v31  ;;  %v2373_v56 = vmul.f32 %v6186_v15, %v5699_v18  ;;  %v2687_v55 = vadd.f32 %v5713_v43, %v2594_v48  ;;  %v2682_v3 = vadd.f32 %v2660_v17, %v2589_v32  ;;  %v2587_v36 = vsub.f32 1.0, %v5757_v11  ;;  %v6187_v18 = vld [vmem:[#allocation71_spill] sm:$0xff]  ;;  %v3106_v50 = vpop.permute.xlu0 %3105  ;;  %v6191_v1 = vld [vmem:[#allocation84_spill] sm:$0xff] }
 0x3cd   :  { %v3117_v38 = vadd.f32 %v3094_v10, %v3024_v61  ;;  %v1952_v30 = vrot.slane %v1951_v33, 1  ;;  %v1969_v16 = vadd.f32 %v1968_v39, %v1967_v2  ;;  %v1977_v51 = vrot.slane %v1976_v12, 2 }
 0x3ce   :  { %v5777_v25 = vld [vmem:[#allocation2 + $0x10] sm:$0xff]  ;;  %2695 = vst.msk [vmem:[#allocation2 + $0x30] sm:$0xff] %vm32_vm1, %v2687_v55  ;;  %v2382_v45 = vsel %vm32_vm1, %v2374_v8, 0.0  ;;  %2690 = vst.msk [vmem:[#allocation2 + $0x8] sm:$0xff] %vm32_vm1, %v2682_v3  ;;  %v2376_v43 = vmul.f32 %v6187_v18, %v2324_v9  ;;  %v2591_v10 = vmul.f32 %v2583_v52, %v2324_v9  ;;  %v2375_v37 = vmul.f32 %v6188_v22, %v5718_v63  ;;  %v2668_v11 = vpop.permute.xlu1 %2667  ;;  %v6193_v9 = vld [vmem:[#allocation90_spill] sm:$0xff] }
 0x3cf   :  { %3125 = vst.msk [vmem:[#allocation2] sm:$0xff] %vm32_vm1, %v3117_v38  ;;  %v3026_v19 = vmul.f32 %v3018_v62, %v5777_v25  ;;  %v1962_v57 = vadd.f32 %v1961_v28, %v1960_v7  ;;  %v1970_v23 = vrot.slane %v1969_v16, 1  ;;  %v1978_v60 = vadd.f32 %v1977_v51, %v1976_v12  ;;  %v2326_v14 = vld [vmem:[#allocation2 + $0x28] sm:$0xff]  ;;  %v6195_v18 = vld [vmem:[#allocation92_spill] sm:$0xff] }
 0x3d0   :  { %v3020_v47 = vsub.f32 1.0, %v6189_v6  ;;  %v2381_v26 = vsel %vm32_vm1, %v2373_v56, 0.0  ;;  %v2684_v41 = vadd.f32 %v2664_v13, %v2591_v10  ;;  %v1953_v35 = vadd.f32 %v1952_v30, %v1951_v33  ;;  %v5799_v33 = vpop.permute.xlu0 %2367  ;;  %v6199_v6 = vld [vmem:[#allocation83_spill] sm:$0xff] }
 0x3d1   :  { %v3119_v59 = vadd.f32 %v3098_v49, %v3026_v19  ;;  %v1971_v27 = vadd.f32 %v1970_v23, %v1969_v16  ;;  %v1979_v54 = vrot.slane %v1978_v60, 1  ;;  %v2383_v5 = vadd.f32 %v2382_v45, %v2381_v26  ;;  %v5789_v52 = vld [vmem:[#allocation2 + $0x20] sm:$0xff] }
 0x3d2   :  { %v3028_v63 = vmul.f32 %v3020_v47, %v5789_v52  ;;  %v2391_v7 = vsel %vm32_vm1, %v2376_v43, 0.0  ;;  %2692 = vst.msk [vmem:[#allocation2 + $0x18] sm:$0xff] %vm32_vm1, %v2684_v41  ;;  %v2378_v46 = vmul.f32 %v6190_v24, %v2326_v14  ;;  %v2593_v42 = vmul.f32 %v2585_v20, %v2326_v14  ;;  %v2672_v12 = vpop.permute.xlu1 %2671 }
 0x3d3   :  { %3127 = vst.msk [vmem:[#allocation2 + $0x10] sm:$0xff] %vm32_vm1, %v3119_v59  ;;  %v3022_v49 = vsub.f32 1.0, %v6191_v1  ;;  %v2390_v29 = vsel %vm32_vm1, %v2375_v37, 0.0  ;;  %v1985_v31 = vsel %vm220_vm3, %v1962_v57, %v1953_v35  ;;  %v1980_v21 = vadd.f32 %v1979_v54, %v1978_v60  ;;  %v5801_v2 = vld [vmem:[#allocation2 + $0x38] sm:$0xff]  ;;  %v6196_v37 = vld [vmem:[#allocation85_spill] sm:$0xff]  ;;  %v6200_v59 = vld [vmem:[#allocation94_spill] sm:$0xff] }
 0x3d4   :  { %v2377_v48 = vmul.f32 %v6192_v44, %v5736_v4  ;;  %v1986_v61 = vsel %vm222_vm4, %v1971_v27, %v1985_v31  ;;  %v3121_v0 = vadd.f32 %v3102_v34, %v3028_v63  ;;  %v2686_v8 = vadd.f32 %v2668_v11, %v2593_v42  ;;  %v5818_v17 = vpop.permute.xlu0 %2803  ;;  %v6197_v60 = vld [vmem:[#allocation93_spill] sm:$0xff]  ;;  %v6201_v63 = vld [vmem:[#allocation72_spill] sm:$0xff]  ;;  %v6202_v42 = vld [vmem:[#allocation87_spill] sm:$0xff] }
 0x3d5   :  { %v1987_v20 = vsel %vm224_vm5, %v1980_v21, %v1986_v61  ;;  %v2384_v32 = vrot.slane %v2383_v5, 4  ;;  %v2392_v53 = vadd.f32 %v2391_v7, %v2390_v29  ;;  %v5807_v62 = vld [vmem:[#allocation2 + $0x30] sm:$0xff]  ;;  %v2400_v4 = vsel %vm32_vm1, %v2378_v46, 0.0  ;;  %v2758_v34 = vld [vmem:[#allocation2 + $0x8] sm:$0xff]  ;;  %v6204_v29 = vld [vmem:[#allocation96_spill] sm:$0xff] }
 0x3d6   :  { %3622 = vst.msk [vmem:[%s5945_s7 + $0x10] sm:$0xf] %vm227_vm6, %v1987_v20  ;;  %v3030_v28 = vmul.f32 %v3022_v49, %v5807_v62  ;;  %v2595_v39 = vmul.f32 %v2587_v36, %v5801_v2  ;;  %v3017_v15 = vsub.f32 1.0, %v6193_v9  ;;  %v2399_v56 = vsel %vm32_vm1, %v2377_v48, 0.0  ;;  %v6194_v36 = vld [vmem:[#allocation91_spill] sm:$0xff]  ;;  %v3096_v10 = vpop.permute.xlu1 %3095  ;;  %v3193_v23 = vld [vmem:[#allocation2] sm:$0xff] }
 0x3d7   :  { %3129 = vst.msk [vmem:[#allocation2 + $0x20] sm:$0xff] %vm32_vm1, %v3121_v0  ;;  %2694 = vst.msk [vmem:[#allocation2 + $0x28] sm:$0xff] %vm32_vm1, %v2686_v8  ;;  %v2385_v3 = vadd.f32 %v2384_v32, %v2383_v5  ;;  %v2393_v30 = vrot.slane %v2392_v53, 4  ;;  %v2401_v16 = vadd.f32 %v2400_v4, %v2399_v56  ;;  %v3019_v45 = vsub.f32 1.0, %v6194_v36  ;;  %v6203_v49 = vld [vmem:[#allocation95_spill] sm:$0xff]  ;;  %v6205_v21 = vld [vmem:[#allocation76_spill] sm:$0xff] }
 0x3d8   :  { %v3123_v55 = vadd.f32 %v3106_v50, %v3030_v28  ;;  %v2688_v38 = vadd.f32 %v2672_v12, %v2595_v39  ;;  %v3025_v19 = vmul.f32 %v3017_v15, %v2758_v34  ;;  %v3452_v43 = vsub.f32 1.0, %v6195_v18  ;;  %v5826_v22 = vpop.permute.xlu0 %3239  ;;  %v6198_v50 = vld [vmem:[#allocation74_spill] sm:$0xff] }
 0x3d9   :  { %v2760_v51 = vld [vmem:[#allocation2 + $0x18] sm:$0xff]  ;;  %v3021_v13 = vsub.f32 1.0, %v6197_v60  ;;  %v2811_v14 = vmul.f32 %v6198_v50, %v5777_v25  ;;  %v2810_v47 = vmul.f32 %v6199_v6, %v2758_v34  ;;  %v3454_v41 = vsub.f32 1.0, %v6200_v59  ;;  %v6206_v12 = vld [vmem:[#allocation98_spill] sm:$0xff]  ;;  %v6210_v59 = vld [vmem:[#allocation97_spill] sm:$0xff] }
 0x3da   :  { %3131 = vst.msk [vmem:[#allocation2 + $0x30] sm:$0xff] %vm32_vm1, %v3123_v55  ;;  %2696 = vst.msk [vmem:[#allocation2 + $0x38] sm:$0xff] %vm32_vm1, %v2688_v38  ;;  %v2812_v57 = vmul.f32 %v6196_v37, %v2760_v51  ;;  %v3118_v26 = vadd.f32 %v3096_v10, %v3025_v19  ;;  %v2386_v35 = vrot.slane %v2385_v3, 2  ;;  %v2394_v27 = vadd.f32 %v2393_v30, %v2392_v53  ;;  %v3100_v44 = vpop.permute.xlu1 %3099  ;;  %v3195_v32 = vld [vmem:[#allocation2 + $0x10] sm:$0xff]  ;;  %v6207_v38 = vld [vmem:[#allocation86_spill] sm:$0xff] }
 0x3db   :  { %v2402_v54 = vrot.slane %v2401_v16, 4  ;;  %v2809_v7 = vmul.f32 %v6201_v63, %v5761_v58  ;;  %v3027_v24 = vmul.f32 %v3019_v45, %v2760_v51  ;;  %v3460_v46 = vmul.f32 %v3452_v43, %v3193_v23  ;;  %v6208_v45 = vld [vmem:[#allocation20_spill] sm:$0xff]  ;;  %v6209_v43 = vld [vmem:[#allocation10_spill] sm:$0xff] }
 0x3dc   :  { %3126 = vst.msk [vmem:[#allocation2 + $0x8] sm:$0xff] %vm32_vm1, %v3118_v26  ;;  %v3023_v25 = vsub.f32 1.0, %v6203_v49  ;;  %v3456_v31 = vsub.f32 1.0, %v6204_v29  ;;  %v2813_v11 = vmul.f32 %v6205_v21, %v5789_v52  ;;  %v2827_v48 = vsel %vm32_vm1, %v2812_v57, 0.0  ;;  %v3530_v61 = vpop.permute.xlu0 %3529  ;;  %v6211_v63 = vld [vmem:[#allocation88_spill] sm:$0xff]  ;;  %v6212_v29 = vld [vmem:[#allocation11_spill] sm:$0xff] }
 0x3dd   :  { %v2826_v0 = vsel %vm32_vm1, %v2811_v14, 0.0  ;;  %v2818_v58 = vsel %vm32_vm1, %v2810_v47, 0.0  ;;  %v3120_v8 = vadd.f32 %v3100_v44, %v3027_v24  ;;  %v3553_v20 = vadd.f32 %v3530_v61, %v3460_v46 }
 0x3de   :  { %v2762_v5 = vld [vmem:[#allocation2 + $0x28] sm:$0xff]  ;;  %v2387_v53 = vadd.f32 %v2386_v35, %v2385_v3  ;;  %v2395_v28 = vrot.slane %v2394_v27, 2  ;;  %v2403_v4 = vadd.f32 %v2402_v54, %v2401_v16  ;;  %v3458_v34 = vsub.f32 1.0, %v6206_v12  ;;  %v3104_v3 = vpop.permute.xlu1 %3103  ;;  %v3197_v36 = vld [vmem:[#allocation2 + $0x20] sm:$0xff] }
 0x3df   :  { %v2814_v1 = vmul.f32 %v6202_v42, %v2762_v5  ;;  %v2817_v52 = vsel %vm32_vm1, %v2809_v7, 0.0  ;;  %v2828_v9 = vadd.f32 %v2827_v48, %v2826_v0  ;;  %3128 = vst.msk [vmem:[#allocation2 + $0x18] sm:$0xff] %vm32_vm1, %v3120_v8  ;;  %3561 = vst.msk [vmem:[#allocation2] sm:$0xff] %vm32_vm1, %v3553_v20  ;;  %v3029_v15 = vmul.f32 %v3021_v13, %v2762_v5  ;;  %v6213_v0 = vld [vmem:[#allocation99_spill] sm:$0xff] }
 0x3e0   :  { %v2835_v56 = vsel %vm32_vm1, %v2813_v11, 0.0  ;;  %v2819_v55 = vadd.f32 %v2818_v58, %v2817_v52  ;;  %v3245_v30 = vmul.f32 %v6207_v38, %v3193_v23  ;;  %v3534_v51 = vpop.permute.xlu0 %3533  ;;  %v3462_v16 = vmul.f32 %v3454_v41, %v3195_v32 }
 0x3e1   :  { %v2836_v39 = vsel %vm32_vm1, %v2814_v1, 0.0  ;;  %v5852_v19 = vld [vmem:[#allocation2 + $0x38] sm:$0xff]  ;;  %v3453_v18 = vsub.f32 1.0, %v6208_v45  ;;  %v3455_v10 = vsub.f32 1.0, %v6209_v43  ;;  %v3122_v57 = vadd.f32 %v3104_v3, %v3029_v15  ;;  %v3199_v5 = vld [vmem:[#allocation2 + $0x30] sm:$0xff] }
 0x3e2   :  { %v2837_v37 = vadd.f32 %v2836_v39, %v2835_v56  ;;  %v2388_v60 = vrot.slane %v2387_v53, 1  ;;  %v2396_v50 = vadd.f32 %v2395_v28, %v2394_v27  ;;  %v2404_v13 = vrot.slane %v2403_v4, 2  ;;  %v3108_v24 = vpop.permute.xlu1 %3107 }
 0x3e3   :  { %v3555_v14 = vadd.f32 %v3534_v51, %v3462_v16  ;;  %v5856_v6 = vld [vmem:[#allocation2 + $0x8] sm:$0xff]  ;;  %v2829_v47 = vrot.slane %v2828_v9, 4  ;;  %3130 = vst.msk [vmem:[#allocation2 + $0x28] sm:$0xff] %vm32_vm1, %v3122_v57  ;;  %v3031_v23 = vmul.f32 %v3023_v25, %v5852_v19  ;;  %v3464_v26 = vmul.f32 %v3456_v31, %v3197_v36 }
 0x3e4   :  { %v3246_v41 = vmul.f32 %v6210_v59, %v5856_v6  ;;  %v2379_v35 = vmul.f32 %v5799_v33, %v5759_v40  ;;  %v2820_v54 = vrot.slane %v2819_v55, 4  ;;  %v3253_v27 = vsel %vm32_vm1, %v3245_v30, 0.0  ;;  %v3538_v46 = vpop.permute.xlu0 %3537 }
 0x3e5   :  { %v3247_v7 = vmul.f32 %v6211_v63, %v3195_v32  ;;  %3563 = vst.msk [vmem:[#allocation2 + $0x10] sm:$0xff] %vm32_vm1, %v3555_v14  ;;  %v2838_v42 = vrot.slane %v2837_v37, 4  ;;  %v3124_v1 = vadd.f32 %v3108_v24, %v3031_v23  ;;  %v3557_v49 = vadd.f32 %v3538_v46, %v3464_v26 }
 0x3e6   :  { %v3254_v25 = vsel %vm32_vm1, %v3246_v41, 0.0  ;;  %v3457_v31 = vsub.f32 1.0, %v6212_v29  ;;  %v2389_v21 = vadd.f32 %v2388_v60, %v2387_v53  ;;  %v2397_v11 = vrot.slane %v2396_v50, 1  ;;  %v5869_v33 = vld [vmem:[#allocation2 + $0x18] sm:$0xff]  ;;  %v6214_v53 = vld [vmem:[#allocation89_spill] sm:$0xff]  ;;  %v2372_v39 = vpop.permute.xlu1 %2371 }
 0x3e7   :  { %v3255_v40 = vadd.f32 %v3254_v25, %v3253_v27  ;;  %v2405_v44 = vadd.f32 %v2404_v13, %v2403_v4  ;;  %v2830_v48 = vadd.f32 %v2829_v47, %v2828_v9  ;;  %3132 = vst.msk [vmem:[#allocation2 + $0x38] sm:$0xff] %vm32_vm1, %v3124_v1  ;;  %3565 = vst.msk [vmem:[#allocation2 + $0x20] sm:$0xff] %vm32_vm1, %v3557_v49  ;;  %v2408_v8 = vsel %vm32_vm1, %v2379_v35, 0.0 }
 0x3e8   :  { %v3466_v61 = vmul.f32 %v3458_v34, %v3199_v5  ;;  %v3248_v58 = vmul.f32 %v6213_v0, %v5869_v33  ;;  %v2821_v20 = vadd.f32 %v2820_v54, %v2819_v55  ;;  %v3262_v32 = vsel %vm32_vm1, %v3247_v7, 0.0  ;;  %v3542_v12 = vpop.permute.xlu0 %3541 }
 0x3e9   :  { %v3249_v28 = vmul.f32 %v6214_v53, %v3197_v36  ;;  %v2839_v52 = vadd.f32 %v2838_v42, %v2837_v37  ;;  %v2380_v4 = vmul.f32 %v2372_v39, %v5801_v2  ;;  %v2398_v56 = vadd.f32 %v2397_v11, %v2396_v50  ;;  %v6215_v36 = vld [vmem:[#allocation100_spill] sm:$0xff] }
 0x3ea   :  { %v3559_v9 = vadd.f32 %v3542_v12, %v3466_v61  ;;  %v3263_v15 = vsel %vm32_vm1, %v3248_v58, 0.0  ;;  %v2815_v34 = vmul.f32 %v5818_v17, %v5807_v62  ;;  %v3256_v38 = vrot.slane %v3255_v40, 4  ;;  %v5882_v3 = vld [vmem:[#allocation2 + $0x28] sm:$0xff]  ;;  %v2808_v50 = vpop.permute.xlu1 %2807 }
 0x3eb   :  { %v3264_v30 = vadd.f32 %v3263_v15, %v3262_v32  ;;  %v2406_v55 = vrot.slane %v2405_v44, 1  ;;  %v2831_v51 = vrot.slane %v2830_v48, 2  ;;  %v2409_v16 = vsel %vm32_vm1, %v2380_v4, 0.0 }
 0x3ec   :  { %3567 = vst.msk [vmem:[#allocation2 + $0x30] sm:$0xff] %vm32_vm1, %v3559_v9  ;;  %v3250_v2 = vmul.f32 %v6215_v36, %v5882_v3  ;;  %v2822_v37 = vrot.slane %v2821_v20, 2  ;;  %v3271_v57 = vsel %vm32_vm1, %v3249_v28, 0.0  ;;  %v2410_v60 = vadd.f32 %v2409_v16, %v2408_v8 }
 0x3ed   :  { %v3265_v13 = vrot.slane %v3264_v30, 4  ;;  %v3251_v62 = vmul.f32 %v5826_v22, %v3199_v5  ;;  %v2840_v17 = vrot.slane %v2839_v52, 2  ;;  %v2816_v14 = vmul.f32 %v2808_v50, %v5852_v19 }
 0x3ee   :  { %v3272_v47 = vsel %vm32_vm1, %v3250_v2, 0.0  ;;  %v2411_v23 = vrot.slane %v2410_v60, 4  ;;  %v3257_v26 = vadd.f32 %v3256_v38, %v3255_v40  ;;  %v2844_v35 = vsel %vm32_vm1, %v2815_v34, 0.0  ;;  %v3244_v22 = vpop.permute.xlu1 %3243  ;;  %v5895_v5 = vld [vmem:[#allocation2 + $0x38] sm:$0xff] }
 0x3ef   :  { %v3266_v59 = vadd.f32 %v3265_v13, %v3264_v30  ;;  %v3273_v41 = vadd.f32 %v3272_v47, %v3271_v57  ;;  %v2832_v54 = vadd.f32 %v2831_v51, %v2830_v48  ;;  %v2421_v27 = vsel %vm220_vm3, %v2398_v56, %v2389_v21 }
 0x3f0   :  { %v2845_v63 = vsel %vm32_vm1, %v2816_v14, 0.0  ;;  %v2407_v7 = vadd.f32 %v2406_v55, %v2405_v44  ;;  %v2412_v24 = vadd.f32 %v2411_v23, %v2410_v60  ;;  %v2823_v42 = vadd.f32 %v2822_v37, %v2821_v20 }
 0x3f1   :  { %v2846_v46 = vadd.f32 %v2845_v63, %v2844_v35  ;;  %v3267_v19 = vrot.slane %v3266_v59, 2  ;;  %v2841_v1 = vadd.f32 %v2840_v17, %v2839_v52  ;;  %v3252_v49 = vmul.f32 %v3244_v22, %v5895_v5 }
 0x3f2   :  { %v3274_v25 = vrot.slane %v3273_v41, 4  ;;  %v3280_v11 = vsel %vm32_vm1, %v3251_v62, 0.0  ;;  %v2413_v40 = vrot.slane %v2412_v24, 2  ;;  %v3258_v61 = vrot.slane %v3257_v26, 2  ;;  %v3532_v53 = vpop.permute.xlu1 %3531 }
 0x3f3   :  { %v2847_v48 = vrot.slane %v2846_v46, 4  ;;  %v2833_v21 = vrot.slane %v2832_v54, 1  ;;  %v3281_v0 = vsel %vm32_vm1, %v3252_v49, 0.0  ;;  %v3461_v44 = vmul.f32 %v3453_v18, %v5856_v6 }
 0x3f4   :  { %v3275_v58 = vadd.f32 %v3274_v25, %v3273_v41  ;;  %v2414_v8 = vadd.f32 %v2413_v40, %v2412_v24  ;;  %v3282_v20 = vadd.f32 %v3281_v0, %v3280_v11  ;;  %v3268_v28 = vadd.f32 %v3267_v19, %v3266_v59 }
 0x3f5   :  { %v2848_v32 = vadd.f32 %v2847_v48, %v2846_v46  ;;  %v2824_v39 = vrot.slane %v2823_v42, 1  ;;  %v2842_v12 = vrot.slane %v2841_v1, 1  ;;  %v3554_v52 = vadd.f32 %v3532_v53, %v3461_v44 }
 0x3f6   :  { %v3276_v4 = vrot.slane %v3275_v58, 2  ;;  %v2415_v9 = vrot.slane %v2414_v8, 1  ;;  %v3283_v56 = vrot.slane %v3282_v20, 4  ;;  %v3259_v34 = vadd.f32 %v3258_v61, %v3257_v26  ;;  %v3536_v16 = vpop.permute.xlu1 %3535  ;;  %v6216_v26 = vld [vmem:[#allocation13_spill] sm:$0xff] }
 0x3f7   :  { %v2849_v15 = vrot.slane %v2848_v32, 2  ;;  %v2834_v38 = vadd.f32 %v2833_v21, %v2832_v54  ;;  %v2422_v30 = vsel %vm222_vm4, %v2407_v7, %v2421_v27  ;;  %3562 = vst.msk [vmem:[#allocation2 + $0x8] sm:$0xff] %vm32_vm1, %v3554_v52  ;;  %v3463_v45 = vmul.f32 %v3455_v10, %v5869_v33 }
 0x3f8   :  { %v3277_v18 = vadd.f32 %v3276_v4, %v3275_v58  ;;  %v2416_v6 = vadd.f32 %v2415_v9, %v2414_v8  ;;  %v3284_v51 = vadd.f32 %v3283_v56, %v3282_v20  ;;  %v3269_v36 = vrot.slane %v3268_v28, 1 }
 0x3f9   :  { %v2850_v55 = vadd.f32 %v2849_v15, %v2848_v32  ;;  %v2825_v2 = vadd.f32 %v2824_v39, %v2823_v42  ;;  %v2843_v37 = vadd.f32 %v2842_v12, %v2841_v1  ;;  %v3556_v57 = vadd.f32 %v3536_v16, %v3463_v45 }
 0x3fa   :  { %v3278_v60 = vrot.slane %v3277_v18, 1  ;;  %v2423_v50 = vsel %vm224_vm5, %v2416_v6, %v2422_v30  ;;  %v3285_v62 = vrot.slane %v3284_v51, 2  ;;  %v3260_v17 = vrot.slane %v3259_v34, 1  ;;  %v3540_v23 = vpop.permute.xlu1 %3539 }
 0x3fb   :  { %v2851_v13 = vrot.slane %v2850_v55, 1  ;;  %3629 = vst.msk [vmem:[%s5945_s7 + $0x14] sm:$0xf] %vm227_vm6, %v2423_v50  ;;  %v3465_v43 = vmul.f32 %v3457_v31, %v5882_v3  ;;  %v2857_v33 = vsel %vm220_vm3, %v2834_v38, %v2825_v2  ;;  %v3270_v47 = vadd.f32 %v3269_v36, %v3268_v28 }
 0x3fc   :  { %3564 = vst.msk [vmem:[#allocation2 + $0x18] sm:$0xff] %vm32_vm1, %v3556_v57  ;;  %v3286_v14 = vadd.f32 %v3285_v62, %v3284_v51  ;;  %v3459_v59 = vsub.f32 1.0, %v6216_v26  ;;  %v2858_v41 = vsel %vm222_vm4, %v2843_v37, %v2857_v33  ;;  %v3279_v35 = vadd.f32 %v3278_v60, %v3277_v18 }
 0x3fd   :  { %v2852_v10 = vadd.f32 %v2851_v13, %v2850_v55  ;;  %v3558_v54 = vadd.f32 %v3540_v23, %v3465_v43  ;;  %v3261_v7 = vadd.f32 %v3260_v17, %v3259_v34 }
 0x3fe   :  { %v3287_v63 = vrot.slane %v3286_v14, 1  ;;  %v3467_v29 = vmul.f32 %v3459_v59, %v5895_v5  ;;  %v3544_v24 = vpop.permute.xlu1 %3543 }
 0x3ff   :  { %v2859_v27 = vsel %vm224_vm5, %v2852_v10, %v2858_v41  ;;  %3566 = vst.msk [vmem:[#allocation2 + $0x28] sm:$0xff] %vm32_vm1, %v3558_v54  ;;  %v3293_v3 = vsel %vm220_vm3, %v3270_v47, %v3261_v7 }
 0x400   :  { %3636 = vst.msk [vmem:[%s5945_s7 + $0x18] sm:$0xf] %vm227_vm6, %v2859_v27  ;;  %v3288_v31 = vadd.f32 %v3287_v63, %v3286_v14  ;;  %v3294_v46 = vsel %vm222_vm4, %v3279_v35, %v3293_v3  ;;  %v3560_v22 = vadd.f32 %v3544_v24, %v3467_v29 }
 0x402   :  { %v3295_v19 = vsel %vm224_vm5, %v3288_v31, %v3294_v46  ;;  %3568 = vst.msk [vmem:[#allocation2 + $0x38] sm:$0xff] %vm32_vm1, %v3560_v22 }
 0x403   :  { %3643 = vst.msk [vmem:[%s5945_s7 + $0x1c] sm:$0xf] %vm227_vm6, %v3295_v19 }
 0x404   :  { %3935 = shalt.err (!%p3932_p4)
}
 0x405   :  { %s3952_s30 = smov 128   ;;  %s3953_s9 = smov 8  }
 0x406   :  { %3582 = dma.vmem_to_hbm [thread:$0]  %s3577_s25, 1024, %s5946_s8, [#allocation3], %s3952_s30, %s3952_s30, %s3953_s9  }
 0x407   :  { %3944 = dma.done.wait [#allocation3], 1024  }
 0x408   :  { %3945 = vsyncadd [#allocation3], 4294966272 }
 0x409   :  { %3588 = vsyncpa [#allocation3], 1 }

</bundles_post_ra>
